<compile_context>
chip_gen: v6e
topology: v6e:2x2x1
jax: 0.10.0
libtpu: 0.0.40
codegen_flags: <defaults>
</compile_context>

<pallas_src>
import functools
import numpy as np
import jax
import jax.numpy as jnp
import jax.scipy.special as jsp
from jax.experimental import pallas as pl
from jax.experimental.pallas import tpu as pltpu


# ------------------------- in-kernel math helpers -------------------------

def _erf_poly(x):
    # Abramowitz & Stegun 7.1.26 (|abs err| < 1.5e-7); exp-only, Mosaic-safe.
    p = 0.3275911
    a1, a2, a3, a4, a5 = 0.254829592, -0.284496736, 1.421413741, -1.453152027, 1.061405429
    sgn = jnp.where(x >= 0, 1.0, -1.0).astype(x.dtype)
    ax = jnp.abs(x)
    t = 1.0 / (1.0 + p * ax)
    poly = ((((a5 * t + a4) * t + a3) * t + a2) * t + a1) * t
    return sgn * (1.0 - poly * jnp.exp(-ax * ax))


def _gelu_exact(x):
    return 0.5 * x * (1.0 + _erf_poly(x * 0.7071067811865476))


# ------------------------------ Pallas kernels -----------------------------

def _dwconv_stats_kernel(xp_ref, w_ref, out_ref, sum_ref, ssq_ref, *, ks, TD, H, W, C):
    """Depthwise 3D conv on a (TD, H, W*C) output slab (lane axis = W*C) plus
    per-(batch, d-tile) partial sums / sums-of-squares for BatchNorm stats.

    xp_ref : (1, Dp, Hp, Wp*C)  zero-padded input, whole batch element resident
    w_ref  : (ks^3, W*C)        per-tap per-channel weights, lane-tiled W times
    out_ref: (1, TD, H, W*C)
    sum_ref, ssq_ref: (1, 1, 1, W*C) partial statistics for this grid step
    """
    WC = W * C
    t = pl.program_id(1)
    d_lo = pl.multiple_of(t * TD, TD)
    nrows = TD + ks - 1                       # padded-D rows needed by this tile

    acc = jnp.zeros((TD, H, WC), jnp.float32)

    if ks <= 5:
        # Fully static unroll. One sublane-offset load per H-tap j (shared by
        # ks*ks taps), one lane relayout per (j, k) (shared by the ks D-taps);
        # the D-taps are free leading-dim slices of the shifted slab.
        for j in range(ks):
            slab = xp_ref[0, pl.ds(d_lo, nrows), j:j + H, :].astype(jnp.float32)
            for k in range(ks):
                sl = slab[:, :, k * C:k * C + WC]          # (nrows, H, WC)
                for i in range(ks):
                    tap = (i * ks + j) * ks + k
                    acc = acc + sl[i:i + TD] * w_ref[tap, :]
    else:
        # Fallback for large RepUX kernels (ks = 7 / 21): visible loop over the
        # outer D-tap axis keeps code size and live ranges bounded.
        def body(i, acc):
            for j in range(ks):
                row = xp_ref[0, pl.ds(d_lo + i, TD), j:j + H, :].astype(jnp.float32)
                for k in range(ks):
                    tap = (i * ks + j) * ks + k
                    acc = acc + row[:, :, k * C:k * C + WC] * w_ref[tap, :]
            return acc
        acc = jax.lax.fori_loop(0, ks, body, acc)

    # NOTE: the conv bias is intentionally NOT added -- it cancels exactly under
    # training-mode BatchNorm.
    out_ref[0] = acc.astype(out_ref.dtype)

    # Per-grid-step partial statistics (no cross-grid accumulator -> both grid
    # axes stay 'parallel').  The W fold-out happens in the wrapper.
    sum_ref[...] = jnp.sum(acc, axis=(0, 1))[None, None, None, :]
    ssq_ref[...] = jnp.sum(acc * acc, axis=(0, 1))[None, None, None, :]


def _bn_gelu_kernel(y_ref, scale_ref, shift_ref, out_ref):
    """Fused per-channel affine (folded BatchNorm) + exact GELU, lane-dense."""
    z = y_ref[...].astype(jnp.float32) * scale_ref[0, :] + shift_ref[0, :]
    out_ref[...] = _gelu_exact(z).astype(out_ref.dtype)


# ------------------------------ tiling helpers ------------------------------

def _pick_d_tile(D, H, WC):
    """Largest D-tile keeping the f32 accumulator within ~8 vregs."""
    vregs_per_d = (-(-H // 8)) * (-(-WC // 128))
    for cand in (8, 4, 2):
        if D % cand == 0 and cand * vregs_per_d <= 8:
            return cand
    return 1


def _pick_row_tile(M, WC):
    budget_elems = (4 * 1024 * 1024) // 4          # <= 4 MiB per f32 block
    for cand in (4096, 2048, 1024, 512, 256, 128, 64, 32, 16, 8):
        if M % cand == 0 and cand * WC <= budget_elems:
            return cand
    return M


# --------------------------------- wrapper ---------------------------------

def repux_block_forward(x_ncdhw, dw_weight, dw_bias, bfm, gamma, beta, *, ks, eps=1e-5):
    """x_ncdhw: (N, C, D, H, W) float32 -- same layout PyTorch Conv3d expects."""
    N, C, D, H, W = x_ncdhw.shape
    pad = ks // 2
    K3 = ks ** 3
    WC = W * C

    # w_1 = w_0 * BFM ; flatten taps -> (K3, C), then tile along the (W, C) lane
    # axis so each tap is a lane-dense vector: w_tile[tap, w*C + c] = w_1[c, tap].
    w_eff = jnp.transpose((dw_weight * bfm).reshape(C, K3), (1, 0)).astype(jnp.float32)
    w_tile = jnp.tile(w_eff, (1, W))                                   # (K3, W*C)

    # dw_bias is a per-channel constant added before training-mode BatchNorm:
    # it shifts the batch mean by exactly that constant and cancels, so it is
    # intentionally unused (semantics unchanged).
    del dw_bias

    # NCDHW -> NDHWC (boundary transpose), zero-pad spatial dims, fold (W, C)
    # into a single lane axis of width Wp*C.
    x = jnp.transpose(x_ncdhw, (0, 2, 3, 4, 1)).astype(jnp.float32)
    xp = jnp.pad(x, ((0, 0), (pad, pad), (pad, pad), (pad, pad), (0, 0)))
    Dp, Hp, Wp = D + 2 * pad, H + 2 * pad, W + 2 * pad
    xpf = xp.reshape(N, Dp, Hp, Wp * C)

    TD = _pick_d_tile(D, H, WC)
    nD = D // TD

    kernel1 = functools.partial(_dwconv_stats_kernel, ks=ks, TD=TD, H=H, W=W, C=C)
    conv_cost = pl.CostEstimate(
        flops=2 * K3 * N * D * H * W * C,
        transcendentals=0,
        bytes_accessed=4 * (N * Dp * Hp * Wp * C + N * D * H * W * C + K3 * WC))

    conv_out, psum, pssq = pl.pallas_call(
        kernel1,
        out_shape=(
            jax.ShapeDtypeStruct((N, D, H, WC), jnp.float32),
            jax.ShapeDtypeStruct((N, nD, 1, WC), jnp.float32),
            jax.ShapeDtypeStruct((N, nD, 1, WC), jnp.float32),
        ),
        grid=(N, nD),
        in_specs=[
            pl.BlockSpec((1, Dp, Hp, Wp * C), lambda n, t: (n, 0, 0, 0)),
            pl.BlockSpec((K3, WC), lambda n, t: (0, 0)),
        ],
        out_specs=(
            pl.BlockSpec((1, TD, H, WC), lambda n, t: (n, t, 0, 0)),
            pl.BlockSpec((1, 1, 1, WC), lambda n, t: (n, t, 0, 0)),
            pl.BlockSpec((1, 1, 1, WC), lambda n, t: (n, t, 0, 0)),
        ),
        compiler_params=pltpu.CompilerParams(
            dimension_semantics=("parallel", "parallel"),
            vmem_limit_bytes=32 * 1024 * 1024),
        cost_estimate=conv_cost,
    )(xpf, w_tile)

    # BatchNorm3d training-mode statistics (biased variance) from the per-tile
    # partials; fold into a lane-tiled per-channel scale/shift.
    # TODO(synk): E[x^2]-E[x]^2 can cancel for channels with |mean| >> std; use
    # a two-pass / Welford reduction if that regime matters.
    count = float(N * D * H * W)
    lane_sum = jnp.sum(psum, axis=(0, 1, 2)).reshape(W, C).sum(axis=0)   # (C,)
    lane_ssq = jnp.sum(pssq, axis=(0, 1, 2)).reshape(W, C).sum(axis=0)   # (C,)
    mean = lane_sum / count
    var = jnp.maximum(lane_ssq / count - mean * mean, 0.0)
    inv = gamma.astype(jnp.float32) / jnp.sqrt(var + eps)
    scale_l = jnp.tile(inv, W).reshape(1, WC)                            # (1, W*C)
    shift_l = jnp.tile(beta.astype(jnp.float32) - mean * inv, W).reshape(1, WC)

    # Lane-dense BN + GELU over a flat (rows, W*C) view of the conv output.
    M = N * D * H
    TR = _pick_row_tile(M, WC)
    y_flat = conv_out.reshape(M, WC)
    gelu_cost = pl.CostEstimate(flops=10 * M * WC, transcendentals=M * WC,
                                bytes_accessed=4 * (2 * M * WC + 2 * WC))

    out_flat = pl.pallas_call(
        _bn_gelu_kernel,
        out_shape=jax.ShapeDtypeStruct((M, WC), jnp.float32),
        grid=(M // TR,),
        in_specs=[
            pl.BlockSpec((TR, WC), lambda r: (r, 0)),
            pl.BlockSpec((1, WC), lambda r: (0, 0)),
            pl.BlockSpec((1, WC), lambda r: (0, 0)),
        ],
        out_specs=pl.BlockSpec((TR, WC), lambda r: (r, 0)),
        compiler_params=pltpu.CompilerParams(
            dimension_semantics=("parallel",),
            vmem_limit_bytes=32 * 1024 * 1024),
        cost_estimate=gelu_cost,
    )(y_flat, scale_l, shift_l)

    out_ndhwc = out_flat.reshape(N, D, H, W, C)
    return jnp.transpose(out_ndhwc, (0, 4, 1, 2, 3))     # back to NCDHW


# --------------------------- parameter construction ------------------------

def make_bfm(dim, ks, alpha):
    c = ks // 2
    bfm = np.zeros((dim, 1, ks, ks, ks), dtype=np.float32)
    for i in range(ks):
        for j in range(ks):
            for k in range(ks):
                dist = float(np.sqrt((i - c) ** 2 + (j - c) ** 2 + (k - c) ** 2))
                bfm[:, :, i, j, k] = alpha / (dist + alpha)
    return jnp.asarray(bfm)


# ------------------------------ pure-JAX reference -------------------------

def reference(x_ncdhw, dw_weight, dw_bias, bfm, gamma, beta, ks, eps=1e-5):
    C = x_ncdhw.shape[1]
    w_eff = dw_weight * bfm                                      # (C,1,ks,ks,ks)
    y = jax.lax.conv_general_dilated(
        x_ncdhw, w_eff,
        window_strides=(1, 1, 1),
        padding=[(ks // 2, ks // 2)] * 3,
        dimension_numbers=("NCDHW", "OIDHW", "NCDHW"),
        feature_group_count=C)
    y = y + dw_bias.reshape(1, C, 1, 1, 1)                       # bias kept here
    mean = jnp.mean(y, axis=(0, 2, 3, 4), keepdims=True)
    var = jnp.mean((y - mean) ** 2, axis=(0, 2, 3, 4), keepdims=True)
    yn = (y - mean) / jnp.sqrt(var + eps)
    yn = yn * gamma.reshape(1, C, 1, 1, 1) + beta.reshape(1, C, 1, 1, 1)
    return 0.5 * yn * (1.0 + jsp.erf(yn / jnp.sqrt(2.0)))        # exact GELU


# ----------------------------------- main -----------------------------------

if __name__ == "__main__":
    dim, ks, alpha = 8, 3, 1.0
    N, D, H, W = 2, 16, 16, 16        # W * dim = 128 -> lane-dense blocks

    key = jax.random.PRNGKey(0)
    k1, k2, k3, k4, k5 = jax.random.split(key, 5)
    x = jax.random.normal(k1, (N, dim, D, H, W), jnp.float32)
    dw_weight = 0.2 * jax.random.normal(k2, (dim, 1, ks, ks, ks), jnp.float32)
    dw_bias = 0.1 * jax.random.normal(k3, (dim,), jnp.float32)
    gamma = 1.0 + 0.1 * jax.random.normal(k4, (dim,), jnp.float32)
    beta = 0.1 * jax.random.normal(k5, (dim,), jnp.float32)
    bfm = make_bfm(dim, ks, alpha)

    out = repux_block_forward(x, dw_weight, dw_bias, bfm, gamma, beta, ks=ks)
    out = jax.block_until_ready(out)

    ref = reference(x, dw_weight, dw_bias, bfm, gamma, beta, ks)
    err = float(jnp.max(jnp.abs(out - ref)))
    assert out.shape == (N, dim, D, H, W), out.shape
    assert err < 1e-3, f"max abs err {err}"
    print("KERNEL_OK")
</pallas_src>

<mosaic_0001>
module attributes {stable_mosaic.version = 11 : i64} {
  func.func @_dwconv_stats_kernel(%arg0: i32, %arg1: i32, %arg2: memref<1x18x18x144xf32, #tpu.memory_space<vmem>>, %arg3: memref<27x128xf32, #tpu.memory_space<vmem>>, %arg4: memref<1x4x16x128xf32, #tpu.memory_space<vmem>>, %arg5: memref<1x1x1x128xf32, #tpu.memory_space<vmem>>, %arg6: memref<1x1x1x128xf32, #tpu.memory_space<vmem>>) attributes {dimension_semantics = [#tpu.dimension_semantics<parallel>, #tpu.dimension_semantics<parallel>], iteration_bounds = array<i64: 2, 4>, scalar_prefetch = 0 : i64, scratch_operands = 0 : i64, tpu.core_type = #tpu.core_type<tc>, window_params = [{transform_indices = @transform_0, window_bounds = array<i64: 1, 18, 18, 144>}, {pipeline_mode = #tpu.pipeline_mode<synchronous>, transform_indices = @transform_1, window_bounds = array<i64: 27, 128>}, {transform_indices = @transform_2, window_bounds = array<i64: 1, 4, 16, 128>}, {transform_indices = @transform_3, window_bounds = array<i64: 1, 1, 1, 128>}, {transform_indices = @transform_4, window_bounds = array<i64: 1, 1, 1, 128>}]} {
    %c4_i32 = arith.constant 4 : i32
    %0 = arith.muli %arg1, %c4_i32 : i32
    %1 = tpu.assume_multiple %0, 4 : i32
    %cst = arith.constant 0.000000e+00 : f32
    %2 = vector.broadcast %cst : f32 to vector<4x16x128xf32>
    %c0 = arith.constant 0 : index
    %3 = arith.index_cast %1 : i32 to index
    %c0_0 = arith.constant 0 : index
    %c0_1 = arith.constant 0 : index
    %4 = vector.load %arg2[%c0, %3, %c0_0, %c0_1] : memref<1x18x18x144xf32, #tpu.memory_space<vmem>>, vector<1x6x16x144xf32>
    %5 = vector.shape_cast %4 : vector<1x6x16x144xf32> to vector<6x16x144xf32>
    %6 = vector.extract_strided_slice %5 {offsets = [0, 0, 0], sizes = [6, 16, 128], strides = [1, 1, 1]} : vector<6x16x144xf32> to vector<6x16x128xf32>
    %7 = vector.extract_strided_slice %6 {offsets = [0, 0, 0], sizes = [4, 16, 128], strides = [1, 1, 1]} : vector<6x16x128xf32> to vector<4x16x128xf32>
    %c0_2 = arith.constant 0 : index
    %c0_3 = arith.constant 0 : index
    %8 = vector.load %arg3[%c0_2, %c0_3] : memref<27x128xf32, #tpu.memory_space<vmem>>, vector<1x128xf32>
    %9 = vector.shape_cast %8 : vector<1x128xf32> to vector<128xf32>
    %10 = vector.shape_cast %9 : vector<128xf32> to vector<1x1x128xf32>
    %11 = vector.broadcast %10 : vector<1x1x128xf32> to vector<4x16x128xf32>
    %12 = arith.mulf %7, %11 : vector<4x16x128xf32>
    %13 = arith.addf %2, %12 : vector<4x16x128xf32>
    %14 = vector.extract_strided_slice %6 {offsets = [1, 0, 0], sizes = [4, 16, 128], strides = [1, 1, 1]} : vector<6x16x128xf32> to vector<4x16x128xf32>
    %c9 = arith.constant 9 : index
    %c0_4 = arith.constant 0 : index
    %15 = vector.load %arg3[%c9, %c0_4] : memref<27x128xf32, #tpu.memory_space<vmem>>, vector<1x128xf32>
    %16 = vector.shape_cast %15 : vector<1x128xf32> to vector<128xf32>
    %17 = vector.shape_cast %16 : vector<128xf32> to vector<1x1x128xf32>
    %18 = vector.broadcast %17 : vector<1x1x128xf32> to vector<4x16x128xf32>
    %19 = arith.mulf %14, %18 : vector<4x16x128xf32>
    %20 = arith.addf %13, %19 : vector<4x16x128xf32>
    %21 = vector.extract_strided_slice %6 {offsets = [2, 0, 0], sizes = [4, 16, 128], strides = [1, 1, 1]} : vector<6x16x128xf32> to vector<4x16x128xf32>
    %c18 = arith.constant 18 : index
    %c0_5 = arith.constant 0 : index
    %22 = vector.load %arg3[%c18, %c0_5] : memref<27x128xf32, #tpu.memory_space<vmem>>, vector<1x128xf32>
    %23 = vector.shape_cast %22 : vector<1x128xf32> to vector<128xf32>
    %24 = vector.shape_cast %23 : vector<128xf32> to vector<1x1x128xf32>
    %25 = vector.broadcast %24 : vector<1x1x128xf32> to vector<4x16x128xf32>
    %26 = arith.mulf %21, %25 : vector<4x16x128xf32>
    %27 = arith.addf %20, %26 : vector<4x16x128xf32>
    %28 = vector.extract_strided_slice %5 {offsets = [0, 0, 8], sizes = [6, 16, 128], strides = [1, 1, 1]} : vector<6x16x144xf32> to vector<6x16x128xf32>
    %29 = vector.extract_strided_slice %28 {offsets = [0, 0, 0], sizes = [4, 16, 128], strides = [1, 1, 1]} : vector<6x16x128xf32> to vector<4x16x128xf32>
    %c1 = arith.constant 1 : index
    %c0_6 = arith.constant 0 : index
    %30 = vector.load %arg3[%c1, %c0_6] : memref<27x128xf32, #tpu.memory_space<vmem>>, vector<1x128xf32>
    %31 = vector.shape_cast %30 : vector<1x128xf32> to vector<128xf32>
    %32 = vector.shape_cast %31 : vector<128xf32> to vector<1x1x128xf32>
    %33 = vector.broadcast %32 : vector<1x1x128xf32> to vector<4x16x128xf32>
    %34 = arith.mulf %29, %33 : vector<4x16x128xf32>
    %35 = arith.addf %27, %34 : vector<4x16x128xf32>
    %36 = vector.extract_strided_slice %28 {offsets = [1, 0, 0], sizes = [4, 16, 128], strides = [1, 1, 1]} : vector<6x16x128xf32> to vector<4x16x128xf32>
    %c10 = arith.constant 10 : index
    %c0_7 = arith.constant 0 : index
    %37 = vector.load %arg3[%c10, %c0_7] : memref<27x128xf32, #tpu.memory_space<vmem>>, vector<1x128xf32>
    %38 = vector.shape_cast %37 : vector<1x128xf32> to vector<128xf32>
    %39 = vector.shape_cast %38 : vector<128xf32> to vector<1x1x128xf32>
    %40 = vector.broadcast %39 : vector<1x1x128xf32> to vector<4x16x128xf32>
    %41 = arith.mulf %36, %40 : vector<4x16x128xf32>
    %42 = arith.addf %35, %41 : vector<4x16x128xf32>
    %43 = vector.extract_strided_slice %28 {offsets = [2, 0, 0], sizes = [4, 16, 128], strides = [1, 1, 1]} : vector<6x16x128xf32> to vector<4x16x128xf32>
    %c19 = arith.constant 19 : index
    %c0_8 = arith.constant 0 : index
    %44 = vector.load %arg3[%c19, %c0_8] : memref<27x128xf32, #tpu.memory_space<vmem>>, vector<1x128xf32>
    %45 = vector.shape_cast %44 : vector<1x128xf32> to vector<128xf32>
    %46 = vector.shape_cast %45 : vector<128xf32> to vector<1x1x128xf32>
    %47 = vector.broadcast %46 : vector<1x1x128xf32> to vector<4x16x128xf32>
    %48 = arith.mulf %43, %47 : vector<4x16x128xf32>
    %49 = arith.addf %42, %48 : vector<4x16x128xf32>
    %50 = vector.extract_strided_slice %5 {offsets = [0, 0, 16], sizes = [6, 16, 128], strides = [1, 1, 1]} : vector<6x16x144xf32> to vector<6x16x128xf32>
    %51 = vector.extract_strided_slice %50 {offsets = [0, 0, 0], sizes = [4, 16, 128], strides = [1, 1, 1]} : vector<6x16x128xf32> to vector<4x16x128xf32>
    %c2 = arith.constant 2 : index
    %c0_9 = arith.constant 0 : index
    %52 = vector.load %arg3[%c2, %c0_9] : memref<27x128xf32, #tpu.memory_space<vmem>>, vector<1x128xf32>
    %53 = vector.shape_cast %52 : vector<1x128xf32> to vector<128xf32>
    %54 = vector.shape_cast %53 : vector<128xf32> to vector<1x1x128xf32>
    %55 = vector.broadcast %54 : vector<1x1x128xf32> to vector<4x16x128xf32>
    %56 = arith.mulf %51, %55 : vector<4x16x128xf32>
    %57 = arith.addf %49, %56 : vector<4x16x128xf32>
    %58 = vector.extract_strided_slice %50 {offsets = [1, 0, 0], sizes = [4, 16, 128], strides = [1, 1, 1]} : vector<6x16x128xf32> to vector<4x16x128xf32>
    %c11 = arith.constant 11 : index
    %c0_10 = arith.constant 0 : index
    %59 = vector.load %arg3[%c11, %c0_10] : memref<27x128xf32, #tpu.memory_space<vmem>>, vector<1x128xf32>
    %60 = vector.shape_cast %59 : vector<1x128xf32> to vector<128xf32>
    %61 = vector.shape_cast %60 : vector<128xf32> to vector<1x1x128xf32>
    %62 = vector.broadcast %61 : vector<1x1x128xf32> to vector<4x16x128xf32>
    %63 = arith.mulf %58, %62 : vector<4x16x128xf32>
    %64 = arith.addf %57, %63 : vector<4x16x128xf32>
    %65 = vector.extract_strided_slice %50 {offsets = [2, 0, 0], sizes = [4, 16, 128], strides = [1, 1, 1]} : vector<6x16x128xf32> to vector<4x16x128xf32>
    %c20 = arith.constant 20 : index
    %c0_11 = arith.constant 0 : index
    %66 = vector.load %arg3[%c20, %c0_11] : memref<27x128xf32, #tpu.memory_space<vmem>>, vector<1x128xf32>
    %67 = vector.shape_cast %66 : vector<1x128xf32> to vector<128xf32>
    %68 = vector.shape_cast %67 : vector<128xf32> to vector<1x1x128xf32>
    %69 = vector.broadcast %68 : vector<1x1x128xf32> to vector<4x16x128xf32>
    %70 = arith.mulf %65, %69 : vector<4x16x128xf32>
    %71 = arith.addf %64, %70 : vector<4x16x128xf32>
    %c0_12 = arith.constant 0 : index
    %72 = arith.index_cast %1 : i32 to index
    %c1_13 = arith.constant 1 : index
    %c0_14 = arith.constant 0 : index
    %73 = vector.load %arg2[%c0_12, %72, %c1_13, %c0_14] : memref<1x18x18x144xf32, #tpu.memory_space<vmem>>, vector<1x6x16x144xf32>
    %74 = vector.shape_cast %73 : vector<1x6x16x144xf32> to vector<6x16x144xf32>
    %75 = vector.extract_strided_slice %74 {offsets = [0, 0, 0], sizes = [6, 16, 128], strides = [1, 1, 1]} : vector<6x16x144xf32> to vector<6x16x128xf32>
    %76 = vector.extract_strided_slice %75 {offsets = [0, 0, 0], sizes = [4, 16, 128], strides = [1, 1, 1]} : vector<6x16x128xf32> to vector<4x16x128xf32>
    %c3 = arith.constant 3 : index
    %c0_15 = arith.constant 0 : index
    %77 = vector.load %arg3[%c3, %c0_15] : memref<27x128xf32, #tpu.memory_space<vmem>>, vector<1x128xf32>
    %78 = vector.shape_cast %77 : vector<1x128xf32> to vector<128xf32>
    %79 = vector.shape_cast %78 : vector<128xf32> to vector<1x1x128xf32>
    %80 = vector.broadcast %79 : vector<1x1x128xf32> to vector<4x16x128xf32>
    %81 = arith.mulf %76, %80 : vector<4x16x128xf32>
    %82 = arith.addf %71, %81 : vector<4x16x128xf32>
    %83 = vector.extract_strided_slice %75 {offsets = [1, 0, 0], sizes = [4, 16, 128], strides = [1, 1, 1]} : vector<6x16x128xf32> to vector<4x16x128xf32>
    %c12 = arith.constant 12 : index
    %c0_16 = arith.constant 0 : index
    %84 = vector.load %arg3[%c12, %c0_16] : memref<27x128xf32, #tpu.memory_space<vmem>>, vector<1x128xf32>
    %85 = vector.shape_cast %84 : vector<1x128xf32> to vector<128xf32>
    %86 = vector.shape_cast %85 : vector<128xf32> to vector<1x1x128xf32>
    %87 = vector.broadcast %86 : vector<1x1x128xf32> to vector<4x16x128xf32>
    %88 = arith.mulf %83, %87 : vector<4x16x128xf32>
    %89 = arith.addf %82, %88 : vector<4x16x128xf32>
    %90 = vector.extract_strided_slice %75 {offsets = [2, 0, 0], sizes = [4, 16, 128], strides = [1, 1, 1]} : vector<6x16x128xf32> to vector<4x16x128xf32>
    %c21 = arith.constant 21 : index
    %c0_17 = arith.constant 0 : index
    %91 = vector.load %arg3[%c21, %c0_17] : memref<27x128xf32, #tpu.memory_space<vmem>>, vector<1x128xf32>
    %92 = vector.shape_cast %91 : vector<1x128xf32> to vector<128xf32>
    %93 = vector.shape_cast %92 : vector<128xf32> to vector<1x1x128xf32>
    %94 = vector.broadcast %93 : vector<1x1x128xf32> to vector<4x16x128xf32>
    %95 = arith.mulf %90, %94 : vector<4x16x128xf32>
    %96 = arith.addf %89, %95 : vector<4x16x128xf32>
    %97 = vector.extract_strided_slice %74 {offsets = [0, 0, 8], sizes = [6, 16, 128], strides = [1, 1, 1]} : vector<6x16x144xf32> to vector<6x16x128xf32>
    %98 = vector.extract_strided_slice %97 {offsets = [0, 0, 0], sizes = [4, 16, 128], strides = [1, 1, 1]} : vector<6x16x128xf32> to vector<4x16x128xf32>
    %c4 = arith.constant 4 : index
    %c0_18 = arith.constant 0 : index
    %99 = vector.load %arg3[%c4, %c0_18] : memref<27x128xf32, #tpu.memory_space<vmem>>, vector<1x128xf32>
    %100 = vector.shape_cast %99 : vector<1x128xf32> to vector<128xf32>
    %101 = vector.shape_cast %100 : vector<128xf32> to vector<1x1x128xf32>
    %102 = vector.broadcast %101 : vector<1x1x128xf32> to vector<4x16x128xf32>
    %103 = arith.mulf %98, %102 : vector<4x16x128xf32>
    %104 = arith.addf %96, %103 : vector<4x16x128xf32>
    %105 = vector.extract_strided_slice %97 {offsets = [1, 0, 0], sizes = [4, 16, 128], strides = [1, 1, 1]} : vector<6x16x128xf32> to vector<4x16x128xf32>
    %c13 = arith.constant 13 : index
    %c0_19 = arith.constant 0 : index
    %106 = vector.load %arg3[%c13, %c0_19] : memref<27x128xf32, #tpu.memory_space<vmem>>, vector<1x128xf32>
    %107 = vector.shape_cast %106 : vector<1x128xf32> to vector<128xf32>
    %108 = vector.shape_cast %107 : vector<128xf32> to vector<1x1x128xf32>
    %109 = vector.broadcast %108 : vector<1x1x128xf32> to vector<4x16x128xf32>
    %110 = arith.mulf %105, %109 : vector<4x16x128xf32>
    %111 = arith.addf %104, %110 : vector<4x16x128xf32>
    %112 = vector.extract_strided_slice %97 {offsets = [2, 0, 0], sizes = [4, 16, 128], strides = [1, 1, 1]} : vector<6x16x128xf32> to vector<4x16x128xf32>
    %c22 = arith.constant 22 : index
    %c0_20 = arith.constant 0 : index
    %113 = vector.load %arg3[%c22, %c0_20] : memref<27x128xf32, #tpu.memory_space<vmem>>, vector<1x128xf32>
    %114 = vector.shape_cast %113 : vector<1x128xf32> to vector<128xf32>
    %115 = vector.shape_cast %114 : vector<128xf32> to vector<1x1x128xf32>
    %116 = vector.broadcast %115 : vector<1x1x128xf32> to vector<4x16x128xf32>
    %117 = arith.mulf %112, %116 : vector<4x16x128xf32>
    %118 = arith.addf %111, %117 : vector<4x16x128xf32>
    %119 = vector.extract_strided_slice %74 {offsets = [0, 0, 16], sizes = [6, 16, 128], strides = [1, 1, 1]} : vector<6x16x144xf32> to vector<6x16x128xf32>
    %120 = vector.extract_strided_slice %119 {offsets = [0, 0, 0], sizes = [4, 16, 128], strides = [1, 1, 1]} : vector<6x16x128xf32> to vector<4x16x128xf32>
    %c5 = arith.constant 5 : index
    %c0_21 = arith.constant 0 : index
    %121 = vector.load %arg3[%c5, %c0_21] : memref<27x128xf32, #tpu.memory_space<vmem>>, vector<1x128xf32>
    %122 = vector.shape_cast %121 : vector<1x128xf32> to vector<128xf32>
    %123 = vector.shape_cast %122 : vector<128xf32> to vector<1x1x128xf32>
    %124 = vector.broadcast %123 : vector<1x1x128xf32> to vector<4x16x128xf32>
    %125 = arith.mulf %120, %124 : vector<4x16x128xf32>
    %126 = arith.addf %118, %125 : vector<4x16x128xf32>
    %127 = vector.extract_strided_slice %119 {offsets = [1, 0, 0], sizes = [4, 16, 128], strides = [1, 1, 1]} : vector<6x16x128xf32> to vector<4x16x128xf32>
    %c14 = arith.constant 14 : index
    %c0_22 = arith.constant 0 : index
    %128 = vector.load %arg3[%c14, %c0_22] : memref<27x128xf32, #tpu.memory_space<vmem>>, vector<1x128xf32>
    %129 = vector.shape_cast %128 : vector<1x128xf32> to vector<128xf32>
    %130 = vector.shape_cast %129 : vector<128xf32> to vector<1x1x128xf32>
    %131 = vector.broadcast %130 : vector<1x1x128xf32> to vector<4x16x128xf32>
    %132 = arith.mulf %127, %131 : vector<4x16x128xf32>
    %133 = arith.addf %126, %132 : vector<4x16x128xf32>
    %134 = vector.extract_strided_slice %119 {offsets = [2, 0, 0], sizes = [4, 16, 128], strides = [1, 1, 1]} : vector<6x16x128xf32> to vector<4x16x128xf32>
    %c23 = arith.constant 23 : index
    %c0_23 = arith.constant 0 : index
    %135 = vector.load %arg3[%c23, %c0_23] : memref<27x128xf32, #tpu.memory_space<vmem>>, vector<1x128xf32>
    %136 = vector.shape_cast %135 : vector<1x128xf32> to vector<128xf32>
    %137 = vector.shape_cast %136 : vector<128xf32> to vector<1x1x128xf32>
    %138 = vector.broadcast %137 : vector<1x1x128xf32> to vector<4x16x128xf32>
    %139 = arith.mulf %134, %138 : vector<4x16x128xf32>
    %140 = arith.addf %133, %139 : vector<4x16x128xf32>
    %c0_24 = arith.constant 0 : index
    %141 = arith.index_cast %1 : i32 to index
    %c2_25 = arith.constant 2 : index
    %c0_26 = arith.constant 0 : index
    %142 = vector.load %arg2[%c0_24, %141, %c2_25, %c0_26] : memref<1x18x18x144xf32, #tpu.memory_space<vmem>>, vector<1x6x16x144xf32>
    %143 = vector.shape_cast %142 : vector<1x6x16x144xf32> to vector<6x16x144xf32>
    %144 = vector.extract_strided_slice %143 {offsets = [0, 0, 0], sizes = [6, 16, 128], strides = [1, 1, 1]} : vector<6x16x144xf32> to vector<6x16x128xf32>
    %145 = vector.extract_strided_slice %144 {offsets = [0, 0, 0], sizes = [4, 16, 128], strides = [1, 1, 1]} : vector<6x16x128xf32> to vector<4x16x128xf32>
    %c6 = arith.constant 6 : index
    %c0_27 = arith.constant 0 : index
    %146 = vector.load %arg3[%c6, %c0_27] : memref<27x128xf32, #tpu.memory_space<vmem>>, vector<1x128xf32>
    %147 = vector.shape_cast %146 : vector<1x128xf32> to vector<128xf32>
    %148 = vector.shape_cast %147 : vector<128xf32> to vector<1x1x128xf32>
    %149 = vector.broadcast %148 : vector<1x1x128xf32> to vector<4x16x128xf32>
    %150 = arith.mulf %145, %149 : vector<4x16x128xf32>
    %151 = arith.addf %140, %150 : vector<4x16x128xf32>
    %152 = vector.extract_strided_slice %144 {offsets = [1, 0, 0], sizes = [4, 16, 128], strides = [1, 1, 1]} : vector<6x16x128xf32> to vector<4x16x128xf32>
    %c15 = arith.constant 15 : index
    %c0_28 = arith.constant 0 : index
    %153 = vector.load %arg3[%c15, %c0_28] : memref<27x128xf32, #tpu.memory_space<vmem>>, vector<1x128xf32>
    %154 = vector.shape_cast %153 : vector<1x128xf32> to vector<128xf32>
    %155 = vector.shape_cast %154 : vector<128xf32> to vector<1x1x128xf32>
    %156 = vector.broadcast %155 : vector<1x1x128xf32> to vector<4x16x128xf32>
    %157 = arith.mulf %152, %156 : vector<4x16x128xf32>
    %158 = arith.addf %151, %157 : vector<4x16x128xf32>
    %159 = vector.extract_strided_slice %144 {offsets = [2, 0, 0], sizes = [4, 16, 128], strides = [1, 1, 1]} : vector<6x16x128xf32> to vector<4x16x128xf32>
    %c24 = arith.constant 24 : index
    %c0_29 = arith.constant 0 : index
    %160 = vector.load %arg3[%c24, %c0_29] : memref<27x128xf32, #tpu.memory_space<vmem>>, vector<1x128xf32>
    %161 = vector.shape_cast %160 : vector<1x128xf32> to vector<128xf32>
    %162 = vector.shape_cast %161 : vector<128xf32> to vector<1x1x128xf32>
    %163 = vector.broadcast %162 : vector<1x1x128xf32> to vector<4x16x128xf32>
    %164 = arith.mulf %159, %163 : vector<4x16x128xf32>
    %165 = arith.addf %158, %164 : vector<4x16x128xf32>
    %166 = vector.extract_strided_slice %143 {offsets = [0, 0, 8], sizes = [6, 16, 128], strides = [1, 1, 1]} : vector<6x16x144xf32> to vector<6x16x128xf32>
    %167 = vector.extract_strided_slice %166 {offsets = [0, 0, 0], sizes = [4, 16, 128], strides = [1, 1, 1]} : vector<6x16x128xf32> to vector<4x16x128xf32>
    %c7 = arith.constant 7 : index
    %c0_30 = arith.constant 0 : index
    %168 = vector.load %arg3[%c7, %c0_30] : memref<27x128xf32, #tpu.memory_space<vmem>>, vector<1x128xf32>
    %169 = vector.shape_cast %168 : vector<1x128xf32> to vector<128xf32>
    %170 = vector.shape_cast %169 : vector<128xf32> to vector<1x1x128xf32>
    %171 = vector.broadcast %170 : vector<1x1x128xf32> to vector<4x16x128xf32>
    %172 = arith.mulf %167, %171 : vector<4x16x128xf32>
    %173 = arith.addf %165, %172 : vector<4x16x128xf32>
    %174 = vector.extract_strided_slice %166 {offsets = [1, 0, 0], sizes = [4, 16, 128], strides = [1, 1, 1]} : vector<6x16x128xf32> to vector<4x16x128xf32>
    %c16 = arith.constant 16 : index
    %c0_31 = arith.constant 0 : index
    %175 = vector.load %arg3[%c16, %c0_31] : memref<27x128xf32, #tpu.memory_space<vmem>>, vector<1x128xf32>
    %176 = vector.shape_cast %175 : vector<1x128xf32> to vector<128xf32>
    %177 = vector.shape_cast %176 : vector<128xf32> to vector<1x1x128xf32>
    %178 = vector.broadcast %177 : vector<1x1x128xf32> to vector<4x16x128xf32>
    %179 = arith.mulf %174, %178 : vector<4x16x128xf32>
    %180 = arith.addf %173, %179 : vector<4x16x128xf32>
    %181 = vector.extract_strided_slice %166 {offsets = [2, 0, 0], sizes = [4, 16, 128], strides = [1, 1, 1]} : vector<6x16x128xf32> to vector<4x16x128xf32>
    %c25 = arith.constant 25 : index
    %c0_32 = arith.constant 0 : index
    %182 = vector.load %arg3[%c25, %c0_32] : memref<27x128xf32, #tpu.memory_space<vmem>>, vector<1x128xf32>
    %183 = vector.shape_cast %182 : vector<1x128xf32> to vector<128xf32>
    %184 = vector.shape_cast %183 : vector<128xf32> to vector<1x1x128xf32>
    %185 = vector.broadcast %184 : vector<1x1x128xf32> to vector<4x16x128xf32>
    %186 = arith.mulf %181, %185 : vector<4x16x128xf32>
    %187 = arith.addf %180, %186 : vector<4x16x128xf32>
    %188 = vector.extract_strided_slice %143 {offsets = [0, 0, 16], sizes = [6, 16, 128], strides = [1, 1, 1]} : vector<6x16x144xf32> to vector<6x16x128xf32>
    %189 = vector.extract_strided_slice %188 {offsets = [0, 0, 0], sizes = [4, 16, 128], strides = [1, 1, 1]} : vector<6x16x128xf32> to vector<4x16x128xf32>
    %c8 = arith.constant 8 : index
    %c0_33 = arith.constant 0 : index
    %190 = vector.load %arg3[%c8, %c0_33] : memref<27x128xf32, #tpu.memory_space<vmem>>, vector<1x128xf32>
    %191 = vector.shape_cast %190 : vector<1x128xf32> to vector<128xf32>
    %192 = vector.shape_cast %191 : vector<128xf32> to vector<1x1x128xf32>
    %193 = vector.broadcast %192 : vector<1x1x128xf32> to vector<4x16x128xf32>
    %194 = arith.mulf %189, %193 : vector<4x16x128xf32>
    %195 = arith.addf %187, %194 : vector<4x16x128xf32>
    %196 = vector.extract_strided_slice %188 {offsets = [1, 0, 0], sizes = [4, 16, 128], strides = [1, 1, 1]} : vector<6x16x128xf32> to vector<4x16x128xf32>
    %c17 = arith.constant 17 : index
    %c0_34 = arith.constant 0 : index
    %197 = vector.load %arg3[%c17, %c0_34] : memref<27x128xf32, #tpu.memory_space<vmem>>, vector<1x128xf32>
    %198 = vector.shape_cast %197 : vector<1x128xf32> to vector<128xf32>
    %199 = vector.shape_cast %198 : vector<128xf32> to vector<1x1x128xf32>
    %200 = vector.broadcast %199 : vector<1x1x128xf32> to vector<4x16x128xf32>
    %201 = arith.mulf %196, %200 : vector<4x16x128xf32>
    %202 = arith.addf %195, %201 : vector<4x16x128xf32>
    %203 = vector.extract_strided_slice %188 {offsets = [2, 0, 0], sizes = [4, 16, 128], strides = [1, 1, 1]} : vector<6x16x128xf32> to vector<4x16x128xf32>
    %c26 = arith.constant 26 : index
    %c0_35 = arith.constant 0 : index
    %204 = vector.load %arg3[%c26, %c0_35] : memref<27x128xf32, #tpu.memory_space<vmem>>, vector<1x128xf32>
    %205 = vector.shape_cast %204 : vector<1x128xf32> to vector<128xf32>
    %206 = vector.shape_cast %205 : vector<128xf32> to vector<1x1x128xf32>
    %207 = vector.broadcast %206 : vector<1x1x128xf32> to vector<4x16x128xf32>
    %208 = arith.mulf %203, %207 : vector<4x16x128xf32>
    %209 = arith.addf %202, %208 : vector<4x16x128xf32>
    %c0_36 = arith.constant 0 : index
    %c0_37 = arith.constant 0 : index
    %c0_38 = arith.constant 0 : index
    %c0_39 = arith.constant 0 : index
    %210 = vector.load %arg4[%c0_36, %c0_37, %c0_38, %c0_39] : memref<1x4x16x128xf32, #tpu.memory_space<vmem>>, vector<1x4x16x128xf32>
    %211 = vector.shape_cast %210 : vector<1x4x16x128xf32> to vector<4x16x128xf32>
    %212 = vector.shape_cast %209 : vector<4x16x128xf32> to vector<1x4x16x128xf32>
    tpu.vector_store %arg4[%c0_36, %c0_37, %c0_38, %c0_39], %212 {strides = array<i32>} : memref<1x4x16x128xf32, #tpu.memory_space<vmem>>, vector<1x4x16x128xf32>,
    %cst_40 = arith.constant dense<0.000000e+00> : vector<128xf32>
    %213 = vector.multi_reduction <add>, %209, %cst_40 [0, 1] : vector<4x16x128xf32> to vector<128xf32>
    %214 = vector.shape_cast %213 : vector<128xf32> to vector<1x1x1x128xf32>
    %c0_41 = arith.constant 0 : index
    %c0_42 = arith.constant 0 : index
    %c0_43 = arith.constant 0 : index
    %c0_44 = arith.constant 0 : index
    %215 = vector.load %arg5[%c0_41, %c0_42, %c0_43, %c0_44] : memref<1x1x1x128xf32, #tpu.memory_space<vmem>>, vector<1x1x1x128xf32>
    tpu.vector_store %arg5[%c0_41, %c0_42, %c0_43, %c0_44], %214 {strides = array<i32>} : memref<1x1x1x128xf32, #tpu.memory_space<vmem>>, vector<1x1x1x128xf32>,
    %216 = arith.mulf %209, %209 : vector<4x16x128xf32>
    %cst_45 = arith.constant dense<0.000000e+00> : vector<128xf32>
    %217 = vector.multi_reduction <add>, %216, %cst_45 [0, 1] : vector<4x16x128xf32> to vector<128xf32>
    %218 = vector.shape_cast %217 : vector<128xf32> to vector<1x1x1x128xf32>
    %c0_46 = arith.constant 0 : index
    %c0_47 = arith.constant 0 : index
    %c0_48 = arith.constant 0 : index
    %c0_49 = arith.constant 0 : index
    %219 = vector.load %arg6[%c0_46, %c0_47, %c0_48, %c0_49] : memref<1x1x1x128xf32, #tpu.memory_space<vmem>>, vector<1x1x1x128xf32>
    tpu.vector_store %arg6[%c0_46, %c0_47, %c0_48, %c0_49], %218 {strides = array<i32>} : memref<1x1x1x128xf32, #tpu.memory_space<vmem>>, vector<1x1x1x128xf32>,
    return
  }
  func.func @transform_0(%arg0: i32, %arg1: i32) -> (i32, i32, i32, i32) {
    %c0_i32 = arith.constant 0 : i32
    %c0_i32_0 = arith.constant 0 : i32
    %c0_i32_1 = arith.constant 0 : i32
    %c0_i32_2 = arith.constant 0 : i32
    return %arg0, %c0_i32, %c0_i32_0, %c0_i32_1 : i32, i32, i32, i32
  }
  func.func @transform_1(%arg0: i32, %arg1: i32) -> (i32, i32) {
    %c0_i32 = arith.constant 0 : i32
    %c0_i32_0 = arith.constant 0 : i32
    %c0_i32_1 = arith.constant 0 : i32
    return %c0_i32, %c0_i32_0 : i32, i32
  }
  func.func @transform_2(%arg0: i32, %arg1: i32) -> (i32, i32, i32, i32) {
    %c0_i32 = arith.constant 0 : i32
    %c0_i32_0 = arith.constant 0 : i32
    %c0_i32_1 = arith.constant 0 : i32
    return %arg0, %arg1, %c0_i32, %c0_i32_0 : i32, i32, i32, i32
  }
  func.func @transform_3(%arg0: i32, %arg1: i32) -> (i32, i32, i32, i32) {
    %c0_i32 = arith.constant 0 : i32
    %c0_i32_0 = arith.constant 0 : i32
    %c0_i32_1 = arith.constant 0 : i32
    return %arg0, %arg1, %c0_i32, %c0_i32_0 : i32, i32, i32, i32
  }
  func.func @transform_4(%arg0: i32, %arg1: i32) -> (i32, i32, i32, i32) {
    %c0_i32 = arith.constant 0 : i32
    %c0_i32_0 = arith.constant 0 : i32
    %c0_i32_1 = arith.constant 0 : i32
    return %arg0, %arg1, %c0_i32, %c0_i32_0 : i32, i32, i32, i32
  }
}

</mosaic_0001>

<bundles_post_ra>
// kernel: tpu_custom_call.1
= control target key start
LH: loop header
LB: loop body
LE: loop exit
PB: predicated region body
PF: predicated region fallthrough
CT: control target
= control target key end

     0   :  { %10 = vsyncpa [#allocation3], 0  ;;  %s6785_s0 = inlined_call_operand.vmem [shape: f32[2,18,18,144], index: 0, kind: input, shape index: {}]   ;;  %s6786_s1 = inlined_call_operand.vmem [shape: f32[27,128], index: 1, kind: input, shape index: {}]   ;;  %s6787_s2 = inlined_call_operand.hbm [shape: f32[2,16,16,128], index: 2, kind: output, shape index: {0}]   ;;  %s6788_s3 = inlined_call_operand.hbm [shape: f32[2,4,1,128], index: 3, kind: output, shape index: {1}]   ;;  %s6789_s4 = inlined_call_operand.hbm [shape: f32[2,4,1,128], index: 4, kind: output, shape index: {2}]  }
   0x1   :  { %12 = vsyncpa [#allocation3 + $0x1], 0 }
   0x2   :  { %13 = vsyncpa [#allocation5], 0 }
   0x3   :  { %15 = vsyncpa [#allocation5 + $0x1], 0  ;;  %s3825_s15 = smov 0   ;;  %s3827_s16 = smov 0  }
   0x4   :  { %s3829_s17 = smov 0   ;;  %s3831_s18 = smov 0  }
   0x5   :  { %s3833_s19 = smov 0   ;;  %s3835_s20 = smov 0  }
   0x6   :  { %s3837_s21 = smov 0   ;;  %s3839_s22 = smov 0  }
   0x7 LB: > { %s6791_s23 = sadd.s32 4294967295, %s3790_s22   ;;  %s6790_s24 = sadd.s32 4294967294, %s3790_s22   ;;  %s3790_s22 = sphi %s3839_s22, %s21_s22   ;;  %s3786_s21 = sphi %s3837_s21, %s7231_s21   ;;  %s3782_s20 = sphi %s3835_s20, %s7230_s20   ;;  %s3778_s19 = sphi %s3833_s19, %s7229_s19   ;;  %s3774_s18 = sphi %s3831_s18, %s7228_s18   ;;  %s3770_s17 = sphi %s3829_s17, %s7227_s17   ;;  %s3766_s16 = sphi %s3827_s16, %s7226_s16   ;;  %s3762_s15 = sphi %s3825_s15, %s7225_s15  }
   0x8   : > { %s30_s25 = sadd.s32 1, %s3782_s20  ;;  %s33_s26 = sadd.s32 1, %s3786_s21 }
   0x9   : > { %p31_p0 = scmp.ge.s32.totalorder %s30_s25, 4  ;;  %p99_p1 = scmp.ne.s32.totalorder %s3770_s17, %s3766_s16 }
   0xa   : > { %p100_p2 = scmp.eq.s32.totalorder %s6791_s23, 7  ;;  %p105_p5 = scmp.ne.s32.totalorder %s3766_s16, %s3762_s15 }
   0xb   : > { %s7233_s25 = smov (%p31_p0, %s30_s25), 0  ;;  %s7235_s26 = smov (!%p31_p0, %s33_s26), %s3786_s21 }
   0xc   : > { %s85_s27 = ssub.s32 %s3782_s20, %s7233_s25  ;;  %p3878_p3 = por %p100_p2, %p99_p1 }
   0xd   : > { %p35_p4 = scmp.ge.s32.totalorder %s7235_s26, 2  ;;  %p106_p6 = scmp.eq.s32.totalorder %s6790_s24, 7 }
   0xe   : > { %p3420_p7 = scmp.ge.s32.totalorder %s3790_s22, 1  ;;  %p191_p9 = scmp.lt.s32.totalorder %s3790_s22, 9 }
   0xf   : > { %s7237_s26 = smov (%p35_p4, %s7235_s26), 0  ;;  %p3889_p8 = por %p106_p6, %p105_p5 }
  0x10   : > { %s84_s30 = ssub.s32 %s3786_s21, %s7237_s26  ;;  %s89_s5 = sadd.s32 1, %s3770_s17 }
  0x11   : > { %s86_s6 = sor.u32 %s85_s27, %s84_s30  ;;  %p192_p10 = pnand %p3420_p7, %p191_p9 }
  0x12   : > { %p87_p11 = scmp.eq.s32.totalorder %s86_s6, 0 }
  0x13   : > { %195 = sbr.rel (%p192_p10) target bundleno = 2185 (0x889), region = 28 }
  0x14   : > { %s3898_s7 = scalar_select %p87_p11, %s3770_s17, %s89_s5  }
  0x18   : > { %v3429_v0 = vld [vmem:[%s6786_s1 + $0x1] ss:$0 sm:$0xff]  ;;  %v3430_v1 = vld [vmem:[%s6786_s1 + $0xa] ss:$0 sm:$0xff]  ;;  %s3792_s12 = smov 8   ;;  %s3793_s5 = smov 16  }
  0x19   : > { %328 = vrot.lane.b32.xlu0 %v3429_v0, %s3792_s12  ;;  %426 = vrot.lane.b32.xlu1 %v3430_v1, %s3792_s12  ;;  %v3431_v2 = vld [vmem:[%s6786_s1 + $0x13] ss:$0 sm:$0xff]  ;;  %v3432_v3 = vld [vmem:[%s6786_s1 + $0x2] ss:$0 sm:$0xff]  ;;  %p225_p12 = scmp.lt.s32.totalorder %s3778_s19, 1  ;;  %s3464_s9 = smul.u32 192, %s3774_s18 }
  0x1a   : > { %v3426_v27 = vld [vmem:[%s6786_s1] ss:$0 sm:$0xff]  ;;  %v3427_v33 = vld [vmem:[%s6786_s1 + $0x9] ss:$0 sm:$0xff]  ;;  %v3428_v36 = vld [vmem:[%s6786_s1 + $0x12] ss:$0 sm:$0xff] }
  0x1b   : > { %s226_s6 = scalar_select %p225_p12, %s3778_s19, 1  ;;  %vm395_vm0 = vcmask 982016   ;;  %vm687_vm1 = vcmask 916480   ;;  %vm959_vm2 = vcmask 1046528   ;;  %vm2097_vm3 = vcmask 1045504  }
  0x1c   : > { %s6601_s10 = sand.u32 1, %s3766_s16   ;;  %s3465_s14 = sshll.u32 %s3774_s18, 3 }
  0x1d   : > { %523 = vrot.lane.b32.xlu0 %v3431_v2, %s3792_s12  ;;  %620 = vrot.lane.b32.xlu1 %v3432_v3, %s3793_s5  ;;  %s3466_s8 = smul.u32 864, %s226_s6  ;;  %s3421_s11 = sshll.u32 %s6601_s10, 6 }
  0x1e   : > { %s6612_s13 = scalar_lea.vmem [#allocation2], %s3421_s11  ;;  %s3456_s27 = sshll.u32 %s3778_s19, 5 }
  0x1f   : > { %s229_s24 = scalar_lea.vmem %s6785_s0, %s3466_s8  ;;  %s3248_s30 = sadd.s32 %s3465_s14, %s3456_s27 }
  0x20   : > { %s3922_s23 = scalar_lea.vmem %s229_s24, %s3464_s9  ;;  %s3794_s24 = smov 120  }
  0x21   : > { %v3925_v4 = vld [vmem:[%s3922_s23 + $0x8] sm:$0xff]  ;;  %v3928_v5 = vld [vmem:[%s3922_s23] sm:$0xff]  ;;  %v3933_v9 = vld [vmem:[%s3922_s23 + $0x10] sm:$0xff]  ;;  %s3795_s9 = smov 112   ;;  %s3251_s6 = sshll.u32 %s6612_s13, 4  ;;  %s6652_s6 = int_to_ptr.vmem [resolvable:$true] %s3251_s6 }
  0x22   : > { %v3936_v10 = vld [vmem:[%s3922_s23 + $0x18] sm:$0xff]  ;;  %v3943_v13 = vld [vmem:[%s3922_s23 + $0x30] sm:$0xff]  ;;  %v3953_v17 = vld [vmem:[%s3922_s23 + $0x40] sm:$0xff]  ;;  %s3457_s8 = sshll.u32 %s3248_s30, 7  ;;  %s3642_s11 = scalar_lea.vmem %s6652_s6, 1024 }
  0x23   : > { %v3946_v14 = vld [vmem:[%s3922_s23 + $0x38] sm:$0xff]  ;;  %v3956_v18 = vld [vmem:[%s3922_s23 + $0x48] sm:$0xff]  ;;  %v3963_v21 = vld [vmem:[%s3922_s23 + $0x60] sm:$0xff]  ;;  %p3643_p13 = scmp.ne.s32.totalorder %s6652_s6, %s3642_s11  ;;  %s3796_s14 = smov [#allocation2]  }
  0x24   : > { %v3966_v22 = vld [vmem:[%s3922_s23 + $0x68] sm:$0xff]  ;;  %v3973_v25 = vld [vmem:[%s3922_s23 + $0x70] sm:$0xff]  ;;  %v3976_v26 = vld [vmem:[%s3922_s23 + $0x78] sm:$0xff]  ;;  %s3646_s27 = sshll.u32 %s3796_s14, 4  ;;  %s3647_s27 = int_to_ptr.vmem [resolvable:$false] %s3646_s27 }
  0x25   : > { %v3984_v28 = vld [vmem:[%s3922_s23 + $0x90] sm:$0xff]  ;;  %v3989_v31 = vld [vmem:[%s3922_s23 + $0xa0] sm:$0xff]  ;;  %v3998_v34 = vld [vmem:[%s3922_s23 + $0x98] sm:$0xff]  ;;  %p3644_p0 = pnand %p3643_p13, %p3878_p3  ;;  %s3648_s30 = scalar_lea.vmem %s3647_s27, 2048 }
  0x26   : > { %v3992_v32 = vld [vmem:[%s3922_s23 + $0xd0] sm:$0xff]  ;;  %v4001_v35 = vld [vmem:[%s3922_s23 + $0x100] sm:$0xff]  ;;  %v271_v37 = vmul.f32 %v3426_v27, %v3989_v31  ;;  %v4014_v43 = vld [vmem:[%s3922_s23 + $0xa8] sm:$0xff]  ;;  %p3649_p2 = scmp.lt.s32.totalorder %s6652_s6, %s3647_s27  ;;  %p3650_p4 = scmp.lt.s32.totalorder %s3648_s30, %s3642_s11 }
  0x27   : > { %v292_v38 = vmul.f32 %v3427_v33, %v3992_v32  ;;  %v313_v39 = vmul.f32 %v3428_v36, %v4001_v35  ;;  %v4047_v60 = vld [vmem:[%s3922_s23 + $0xc8] sm:$0xff]  ;;  %v4050_v61 = vld [vmem:[%s3922_s23 + $0xc0] sm:$0xff]  ;;  %v4057_v0 = vld [vmem:[%s3922_s23 + $0xd8] sm:$0xff]  ;;  %p3645_p1 = pneg %p3644_p0 }
  0x28   : > { %p3651_p5 = por %p3650_p4, %p3649_p2 }
  0x29   : > { %v300_v40 = vadd.f32 %v292_v38, %v271_v37  ;;  %v4098_v37 = vld [vmem:[%s3922_s23 + $0x108] sm:$0xff] }
  0x2a   : > { %p3652_p6 = pnand %p3651_p5, %p3645_p1 }
  0x2b   : > { %v4016_v44 = vadd.f32 %v313_v39, %v300_v40 }
  0x8b   : > { %v329_v6 = vpop.permute.xlu0 %328  ;;  %v427_v45 = vpop.permute.xlu1 %426 }
  0x8c   : > { %v332_v7 = vmul.f32 %v329_v6, %v3925_v4  ;;  %v331_v8 = vmul.f32 %v329_v6, %v3928_v5  ;;  %v333_v11 = vmul.f32 %v329_v6, %v3933_v9  ;;  %v334_v12 = vmul.f32 %v329_v6, %v3936_v10 }
  0x8d   : > { %v335_v15 = vmul.f32 %v329_v6, %v3943_v13  ;;  %v336_v16 = vmul.f32 %v329_v6, %v3946_v14  ;;  %v337_v19 = vmul.f32 %v329_v6, %v3953_v17  ;;  %v338_v20 = vmul.f32 %v329_v6, %v3956_v18 }
  0x8e   : > { %365 = vrot.lane.b32.xlu1 %v332_v7, %s3794_s24  ;;  %363 = vrot.lane.b32.xlu0 %v331_v8, %s3794_s24  ;;  %v339_v23 = vmul.f32 %v329_v6, %v3963_v21  ;;  %v340_v24 = vmul.f32 %v329_v6, %v3966_v22  ;;  %v341_v29 = vmul.f32 %v329_v6, %v3973_v25 }
  0x8f   : > { %v342_v30 = vmul.f32 %v329_v6, %v3976_v26  ;;  %v343_v41 = vmul.f32 %v329_v6, %v3984_v28  ;;  %v344_v42 = vmul.f32 %v329_v6, %v3998_v34  ;;  %v345_v46 = vmul.f32 %v329_v6, %v3989_v31  ;;  %v524_v1 = vpop.permute.xlu0 %523  ;;  %v621_v38 = vpop.permute.xlu1 %620 }
  0x90   : > { %v346_v47 = vmul.f32 %v329_v6, %v4014_v43  ;;  %v430_v48 = vmul.f32 %v427_v45, %v3946_v14  ;;  %v429_v49 = vmul.f32 %v427_v45, %v3943_v13  ;;  %v432_v50 = vmul.f32 %v427_v45, %v3956_v18 }
  0x91   : > { %v431_v51 = vmul.f32 %v427_v45, %v3953_v17  ;;  %v434_v52 = vmul.f32 %v427_v45, %v3966_v22  ;;  %v433_v53 = vmul.f32 %v427_v45, %v3963_v21  ;;  %v436_v54 = vmul.f32 %v427_v45, %v3976_v26 }
  0x92   : > { %367 = vrot.lane.b32.xlu1 %v333_v11, %s3794_s24  ;;  %369 = vrot.lane.b32.xlu0 %v334_v12, %s3794_s24  ;;  %v435_v55 = vmul.f32 %v427_v45, %v3973_v25  ;;  %v438_v56 = vmul.f32 %v427_v45, %v3998_v34  ;;  %v437_v57 = vmul.f32 %v427_v45, %v3984_v28 }
  0x93   : > { %v440_v58 = vmul.f32 %v427_v45, %v4014_v43  ;;  %v439_v59 = vmul.f32 %v427_v45, %v3989_v31  ;;  %v442_v62 = vmul.f32 %v427_v45, %v4047_v60  ;;  %v441_v63 = vmul.f32 %v427_v45, %v4050_v61 }
  0x94   : > { %v444_v2 = vmul.f32 %v427_v45, %v4057_v0  ;;  %v443_v3 = vmul.f32 %v427_v45, %v3992_v32  ;;  %v526_v6 = vmul.f32 %v524_v1, %v3963_v21  ;;  %v527_v7 = vmul.f32 %v524_v1, %v3966_v22 }
  0x95   : > { %v528_v8 = vmul.f32 %v524_v1, %v3973_v25  ;;  %v529_v11 = vmul.f32 %v524_v1, %v3976_v26  ;;  %v530_v12 = vmul.f32 %v524_v1, %v3984_v28  ;;  %v537_v27 = vmul.f32 %v524_v1, %v4057_v0 }
  0x96   : > { %371 = vrot.lane.b32.xlu1 %v335_v15, %s3794_s24  ;;  %373 = vrot.lane.b32.xlu0 %v336_v16, %s3794_s24  ;;  %v531_v15 = vmul.f32 %v524_v1, %v3998_v34  ;;  %v532_v16 = vmul.f32 %v524_v1, %v3989_v31  ;;  %v540_v39 = vmul.f32 %v524_v1, %v4001_v35 }
  0x97   : > { %v541_v40 = vmul.f32 %v524_v1, %v4098_v37  ;;  %v626_v45 = vmul.f32 %v621_v38, %v3936_v10 }
  0x9a   : > { %375 = vrot.lane.b32.xlu1 %v337_v19, %s3794_s24  ;;  %377 = vrot.lane.b32.xlu0 %v338_v20, %s3794_s24  ;;  %v533_v19 = vmul.f32 %v524_v1, %v4014_v43  ;;  %v534_v20 = vmul.f32 %v524_v1, %v4050_v61 }
  0x9e   : > { %379 = vrot.lane.b32.xlu1 %v339_v23, %s3794_s24  ;;  %381 = vrot.lane.b32.xlu0 %v340_v24, %s3794_s24  ;;  %v535_v23 = vmul.f32 %v524_v1, %v4047_v60  ;;  %v536_v24 = vmul.f32 %v524_v1, %v3992_v32 }
  0xa2   : > { %383 = vrot.lane.b32.xlu1 %v341_v29, %s3794_s24  ;;  %385 = vrot.lane.b32.xlu0 %v342_v30, %s3794_s24  ;;  %v4088_v29 = vld [vmem:[%s3922_s23 + $0xf0] sm:$0xff]  ;;  %v4091_v30 = vld [vmem:[%s3922_s23 + $0xf8] sm:$0xff] }
  0xa3   : > { %v538_v33 = vmul.f32 %v524_v1, %v4088_v29  ;;  %v539_v36 = vmul.f32 %v524_v1, %v4091_v30 }
  0xa6   : > { %387 = vrot.lane.b32.xlu1 %v343_v41, %s3794_s24  ;;  %389 = vrot.lane.b32.xlu0 %v344_v42, %s3794_s24  ;;  %v624_v41 = vmul.f32 %v621_v38, %v3925_v4  ;;  %v623_v42 = vmul.f32 %v621_v38, %v3928_v5  ;;  %v630_v4 = vmul.f32 %v621_v38, %v3956_v18 }
  0xa7   : > { %v629_v5 = vmul.f32 %v621_v38, %v3953_v17 }
  0xaa   : > { %391 = vrot.lane.b32.xlu1 %v345_v46, %s3794_s24  ;;  %393 = vrot.lane.b32.xlu0 %v346_v47, %s3794_s24  ;;  %v625_v46 = vmul.f32 %v621_v38, %v3933_v9  ;;  %v628_v47 = vmul.f32 %v621_v38, %v3946_v14 }
  0xae   : > { %463 = vrot.lane.b32.xlu1 %v430_v48, %s3794_s24  ;;  %461 = vrot.lane.b32.xlu0 %v429_v49, %s3794_s24  ;;  %v627_v48 = vmul.f32 %v621_v38, %v3943_v13  ;;  %v632_v49 = vmul.f32 %v621_v38, %v3966_v22 }
  0xb2   : > { %467 = vrot.lane.b32.xlu1 %v432_v50, %s3794_s24  ;;  %465 = vrot.lane.b32.xlu0 %v431_v51, %s3794_s24  ;;  %v631_v50 = vmul.f32 %v621_v38, %v3963_v21 }
  0xb6   : > { %471 = vrot.lane.b32.xlu1 %v434_v52, %s3794_s24  ;;  %469 = vrot.lane.b32.xlu0 %v433_v53, %s3794_s24  ;;  %v634_v52 = vmul.f32 %v621_v38, %v3976_v26  ;;  %v633_v53 = vmul.f32 %v621_v38, %v3973_v25 }
  0xba   : > { %475 = vrot.lane.b32.xlu1 %v436_v54, %s3794_s24  ;;  %473 = vrot.lane.b32.xlu0 %v435_v55, %s3794_s24  ;;  %v636_v55 = vmul.f32 %v621_v38, %v3998_v34 }
  0xbe   : > { %479 = vrot.lane.b32.xlu1 %v438_v56, %s3794_s24  ;;  %477 = vrot.lane.b32.xlu0 %v437_v57, %s3794_s24  ;;  %v635_v56 = vmul.f32 %v621_v38, %v3984_v28 }
  0xc2   : > { %483 = vrot.lane.b32.xlu1 %v440_v58, %s3794_s24  ;;  %481 = vrot.lane.b32.xlu0 %v439_v59, %s3794_s24  ;;  %v638_v58 = vmul.f32 %v621_v38, %v4014_v43  ;;  %v637_v59 = vmul.f32 %v621_v38, %v3989_v31 }
  0xc6   : > { %487 = vrot.lane.b32.xlu1 %v442_v62, %s3794_s24  ;;  %485 = vrot.lane.b32.xlu0 %v441_v63, %s3794_s24  ;;  %v3433_v62 = vld [vmem:[%s6786_s1 + $0xb] ss:$0 sm:$0xff] }
  0xca   : > { %491 = vrot.lane.b32.xlu1 %v444_v2, %s3794_s24  ;;  %489 = vrot.lane.b32.xlu0 %v443_v3, %s3794_s24 }
  0xce   : > { %558 = vrot.lane.b32.xlu1 %v526_v6, %s3794_s24  ;;  %560 = vrot.lane.b32.xlu0 %v527_v7, %s3794_s24 }
  0xd2   : > { %562 = vrot.lane.b32.xlu1 %v528_v8, %s3794_s24  ;;  %564 = vrot.lane.b32.xlu0 %v529_v11, %s3794_s24 }
  0xd6   : > { %566 = vrot.lane.b32.xlu1 %v530_v12, %s3794_s24  ;;  %568 = vrot.lane.b32.xlu0 %v531_v15, %s3794_s24 }
  0xda   : > { %570 = vrot.lane.b32.xlu1 %v532_v16, %s3794_s24  ;;  %572 = vrot.lane.b32.xlu0 %v533_v19, %s3794_s24 }
  0xde   : > { %574 = vrot.lane.b32.xlu1 %v534_v20, %s3794_s24  ;;  %576 = vrot.lane.b32.xlu0 %v535_v23, %s3794_s24 }
  0xe2   : > { %578 = vrot.lane.b32.xlu1 %v536_v24, %s3794_s24  ;;  %580 = vrot.lane.b32.xlu0 %v537_v27, %s3794_s24 }
  0xe6   : > { %582 = vrot.lane.b32.xlu1 %v538_v33, %s3794_s24  ;;  %584 = vrot.lane.b32.xlu0 %v539_v36, %s3794_s24 }
  0xea   : > { %586 = vrot.lane.b32.xlu1 %v540_v39, %s3794_s24  ;;  %588 = vrot.lane.b32.xlu0 %v541_v40, %s3794_s24 }
  0xee   : > { %657 = vrot.lane.b32.xlu1 %v624_v41, %s3795_s9  ;;  %655 = vrot.lane.b32.xlu0 %v623_v42, %s3795_s9 }
  0xf2   : > { %661 = vrot.lane.b32.xlu1 %v626_v45, %s3795_s9  ;;  %659 = vrot.lane.b32.xlu0 %v625_v46, %s3795_s9 }
  0xf6   : > { %665 = vrot.lane.b32.xlu1 %v628_v47, %s3795_s9  ;;  %663 = vrot.lane.b32.xlu0 %v627_v48, %s3795_s9 }
  0xfa   : > { %669 = vrot.lane.b32.xlu1 %v630_v4, %s3795_s9  ;;  %667 = vrot.lane.b32.xlu0 %v629_v5, %s3795_s9 }
  0xfe   : > { %673 = vrot.lane.b32.xlu1 %v632_v49, %s3795_s9  ;;  %671 = vrot.lane.b32.xlu0 %v631_v50, %s3795_s9 }
 0x100   : > { %v4126_v51 = vpop.permute.xlu0 %363  ;;  %v4170_v19 = vpop.permute.xlu1 %365 }
 0x101   : > { %6838 = vst [vmem:[#allocation9_spill] sm:$0xff] %v4126_v51  ;;  %6847 = vst [vmem:[#allocation18_spill] sm:$0xff] %v4170_v19 }
 0x102   : > { %677 = vrot.lane.b32.xlu1 %v634_v52, %s3795_s9  ;;  %675 = vrot.lane.b32.xlu0 %v633_v53, %s3795_s9 }
 0x104   : > { %v4132_v54 = vpop.permute.xlu0 %369  ;;  %v4176_v24 = vpop.permute.xlu1 %367 }
 0x106   : > { %681 = vrot.lane.b32.xlu1 %v636_v55, %s3795_s9  ;;  %679 = vrot.lane.b32.xlu0 %v635_v56, %s3795_s9 }
 0x108   : > { %v4138_v57 = vpop.permute.xlu0 %373  ;;  %v4180_v33 = vpop.permute.xlu1 %371 }
 0x10a   : > { %685 = vrot.lane.b32.xlu1 %v638_v58, %s3795_s9  ;;  %683 = vrot.lane.b32.xlu0 %v637_v59, %s3795_s9 }
 0x10c   : > { %v4147_v63 = vpop.permute.xlu0 %377  ;;  %v4186_v39 = vpop.permute.xlu1 %375 }
 0x10e   : > { %718 = vrot.lane.b32.xlu0 %v3433_v62, %s3793_s5 }
 0x110   : > { %v4150_v1 = vpop.permute.xlu0 %381  ;;  %v4190_v41 = vpop.permute.xlu1 %379 }
 0x111   : > { %6853 = vst [vmem:[#allocation24_spill] sm:$0xff] %v4190_v41 }
 0x114   : > { %v4152_v2 = vpop.permute.xlu0 %385  ;;  %v4196_v46 = vpop.permute.xlu1 %383 }
 0x115   : > { %6839 = vst [vmem:[#allocation10_spill] sm:$0xff] %v4152_v2  ;;  %6856 = vst [vmem:[#allocation27_spill] sm:$0xff] %v4196_v46 }
 0x118   : > { %v4154_v3 = vpop.permute.xlu0 %389  ;;  %v4200_v48 = vpop.permute.xlu1 %387 }
 0x119   : > { %6840 = vst [vmem:[#allocation11_spill] sm:$0xff] %v4154_v3  ;;  %6858 = vst [vmem:[#allocation29_spill] sm:$0xff] %v4200_v48 }
 0x11c   : > { %v4156_v6 = vpop.permute.xlu0 %393  ;;  %v4206_v49 = vpop.permute.xlu1 %391 }
 0x120   : > { %v4158_v7 = vpop.permute.xlu0 %461  ;;  %v4210_v52 = vpop.permute.xlu1 %463 }
 0x121   : > { %6841 = vst [vmem:[#allocation12_spill] sm:$0xff] %v4158_v7  ;;  %6861 = vst [vmem:[#allocation32_spill] sm:$0xff] %v4210_v52 }
 0x124   : > { %v4160_v8 = vpop.permute.xlu0 %465  ;;  %v4216_v56 = vpop.permute.xlu1 %467 }
 0x125   : > { %6842 = vst [vmem:[#allocation13_spill] sm:$0xff] %v4160_v8  ;;  %6864 = vst [vmem:[#allocation35_spill] sm:$0xff] %v4216_v56 }
 0x128   : > { %v4162_v11 = vpop.permute.xlu0 %469  ;;  %v4220_v59 = vpop.permute.xlu1 %471 }
 0x129   : > { %6843 = vst [vmem:[#allocation14_spill] sm:$0xff] %v4162_v11  ;;  %6866 = vst [vmem:[#allocation37_spill] sm:$0xff] %v4220_v59 }
 0x12c   : > { %v4164_v12 = vpop.permute.xlu0 %473 }
 0x12d   : > { %6844 = vst [vmem:[#allocation15_spill] sm:$0xff] %v4164_v12 }
 0x130   : > { %v4166_v15 = vpop.permute.xlu0 %477 }
 0x131   : > { %6845 = vst [vmem:[#allocation16_spill] sm:$0xff] %v4166_v15 }
 0x134   : > { %v4168_v16 = vpop.permute.xlu0 %481 }
 0x135   : > { %6846 = vst [vmem:[#allocation17_spill] sm:$0xff] %v4168_v16 }
 0x138   : > { %v4172_v20 = vpop.permute.xlu0 %485 }
 0x139   : > { %6848 = vst [vmem:[#allocation19_spill] sm:$0xff] %v4172_v20 }
 0x13c   : > { %v4174_v23 = vpop.permute.xlu0 %489 }
 0x140   : > { %v4178_v27 = vpop.permute.xlu0 %560 }
 0x141   : > { %6849 = vst [vmem:[#allocation20_spill] sm:$0xff] %v4178_v27 }
 0x144   : > { %v4182_v36 = vpop.permute.xlu0 %564 }
 0x145   : > { %6850 = vst [vmem:[#allocation21_spill] sm:$0xff] %v4182_v36 }
 0x148   : > { %v4184_v38 = vpop.permute.xlu0 %568 }
 0x149   : > { %6851 = vst [vmem:[#allocation22_spill] sm:$0xff] %v4184_v38 }
 0x14c   : > { %v4188_v40 = vpop.permute.xlu0 %572 }
 0x14d   : > { %6852 = vst [vmem:[#allocation23_spill] sm:$0xff] %v4188_v40 }
 0x150   : > { %v4192_v42 = vpop.permute.xlu0 %576 }
 0x151   : > { %6854 = vst [vmem:[#allocation25_spill] sm:$0xff] %v4192_v42 }
 0x154   : > { %v4194_v45 = vpop.permute.xlu0 %580 }
 0x155   : > { %6855 = vst [vmem:[#allocation26_spill] sm:$0xff] %v4194_v45 }
 0x158   : > { %v4198_v47 = vpop.permute.xlu0 %584 }
 0x159   : > { %6857 = vst [vmem:[#allocation28_spill] sm:$0xff] %v4198_v47 }
 0x15c   : > { %v4202_v4 = vpop.permute.xlu0 %588 }
 0x160   : > { %v4204_v5 = vpop.permute.xlu0 %655 }
 0x161   : > { %6859 = vst [vmem:[#allocation30_spill] sm:$0xff] %v4204_v5  ;;  %v4226_v5 = vpop.permute.xlu1 %475 }
 0x162   : > { %6869 = vst [vmem:[#allocation40_spill] sm:$0xff] %v4226_v5 }
 0x164   : > { %v4208_v50 = vpop.permute.xlu0 %659 }
 0x165   : > { %6860 = vst [vmem:[#allocation31_spill] sm:$0xff] %v4208_v50  ;;  %v4230_v51 = vpop.permute.xlu1 %479 }
 0x166   : > { %6870 = vst [vmem:[#allocation41_spill] sm:$0xff] %v4230_v51 }
 0x168   : > { %v4212_v53 = vpop.permute.xlu0 %663 }
 0x169   : > { %6862 = vst [vmem:[#allocation33_spill] sm:$0xff] %v4212_v53 }
 0x16c   : > { %v4214_v55 = vpop.permute.xlu0 %667 }
 0x16d   : > { %6863 = vst [vmem:[#allocation34_spill] sm:$0xff] %v4214_v55 }
 0x170   : > { %v4218_v58 = vpop.permute.xlu0 %671 }
 0x171   : > { %6865 = vst [vmem:[#allocation36_spill] sm:$0xff] %v4218_v58  ;;  %v4236_v58 = vpop.permute.xlu1 %483 }
 0x172   : > { %6871 = vst [vmem:[#allocation42_spill] sm:$0xff] %v4236_v58 }
 0x174   : > { %v4222_v62 = vpop.permute.xlu0 %675 }
 0x175   : > { %6867 = vst [vmem:[#allocation38_spill] sm:$0xff] %v4222_v62  ;;  %v4244_v50 = vpop.permute.xlu1 %487 }
 0x176   : > { %6872 = vst [vmem:[#allocation43_spill] sm:$0xff] %v4244_v50 }
 0x178   : > { %v4224_v27 = vpop.permute.xlu0 %679 }
 0x179   : > { %6868 = vst [vmem:[#allocation39_spill] sm:$0xff] %v4224_v27 }
 0x17c   : > { %v4228_v7 = vpop.permute.xlu0 %683 }
 0x180   : > { %v719_v52 = vpop.permute.xlu0 %718 }
 0x181   : > { %v722_v19 = vmul.f32 %v719_v52, %v3946_v14  ;;  %v721_v55 = vmul.f32 %v719_v52, %v3943_v13  ;;  %v724_v62 = vmul.f32 %v719_v52, %v3956_v18  ;;  %v723_v27 = vmul.f32 %v719_v52, %v3953_v17 }
 0x182   : > { %v726_v53 = vmul.f32 %v719_v52, %v3966_v22  ;;  %v725_v14 = vmul.f32 %v719_v52, %v3963_v21  ;;  %v728_v13 = vmul.f32 %v719_v52, %v3976_v26  ;;  %v735_v45 = vmul.f32 %v719_v52, %v3992_v32 }
 0x183   : > { %755 = vrot.lane.b32.xlu0 %v722_v19, %s3795_s9  ;;  %753 = vrot.lane.b32.xlu1 %v721_v55, %s3795_s9  ;;  %v727_v19 = vmul.f32 %v719_v52, %v3973_v25  ;;  %v4252_v55 = vpop.permute.xlu1 %491 }
 0x187   : > { %759 = vrot.lane.b32.xlu0 %v724_v62, %s3795_s9  ;;  %757 = vrot.lane.b32.xlu1 %v723_v27, %s3795_s9  ;;  %v730_v27 = vmul.f32 %v719_v52, %v3998_v34  ;;  %v729_v62 = vmul.f32 %v719_v52, %v3984_v28  ;;  %v4260_v47 = vpop.permute.xlu1 %558 }
 0x188   : > { %6873 = vst [vmem:[#allocation44_spill] sm:$0xff] %v4260_v47 }
 0x18b   : > { %763 = vrot.lane.b32.xlu0 %v726_v53, %s3795_s9  ;;  %761 = vrot.lane.b32.xlu1 %v725_v14, %s3795_s9  ;;  %v732_v53 = vmul.f32 %v719_v52, %v4014_v43  ;;  %v731_v14 = vmul.f32 %v719_v52, %v3989_v31 }
 0x18f   : > { %767 = vrot.lane.b32.xlu0 %v728_v13, %s3795_s9  ;;  %765 = vrot.lane.b32.xlu1 %v727_v19, %s3795_s9  ;;  %v734_v13 = vmul.f32 %v719_v52, %v4047_v60  ;;  %v733_v19 = vmul.f32 %v719_v52, %v4050_v61 }
 0x193   : > { %771 = vrot.lane.b32.xlu0 %v730_v27, %s3795_s9  ;;  %769 = vrot.lane.b32.xlu1 %v729_v62, %s3795_s9  ;;  %v4268_v27 = vpop.permute.xlu1 %562  ;;  %v736_v62 = vmul.f32 %v719_v52, %v4057_v0 }
 0x194   : > { %6874 = vst [vmem:[#allocation45_spill] sm:$0xff] %v4268_v27 }
 0x197   : > { %775 = vrot.lane.b32.xlu0 %v732_v53, %s3795_s9  ;;  %773 = vrot.lane.b32.xlu1 %v731_v14, %s3795_s9  ;;  %v3434_v53 = vld [vmem:[%s6786_s1 + $0x14] ss:$0 sm:$0xff]  ;;  %v4277_v14 = vpop.permute.xlu1 %566 }
 0x198   : > { %6875 = vst [vmem:[#allocation46_spill] sm:$0xff] %v4277_v14 }
 0x19b   : > { %779 = vrot.lane.b32.xlu0 %v734_v13, %s3795_s9  ;;  %777 = vrot.lane.b32.xlu1 %v733_v19, %s3795_s9  ;;  %v4280_v13 = vpop.permute.xlu1 %570 }
 0x19c   : > { %6876 = vst [vmem:[#allocation47_spill] sm:$0xff] %v4280_v13 }
 0x19f   : > { %783 = vrot.lane.b32.xlu0 %v736_v62, %s3795_s9  ;;  %781 = vrot.lane.b32.xlu1 %v735_v45, %s3795_s9  ;;  %v4282_v19 = vpop.permute.xlu1 %574 }
 0x1a0   : > { %6877 = vst [vmem:[#allocation48_spill] sm:$0xff] %v4282_v19 }
 0x1a3   : > { %815 = vrot.lane.b32.xlu1 %v3434_v53, %s3793_s5  ;;  %v4284_v47 = vpop.permute.xlu1 %578 }
 0x1a4   : > { %6878 = vst [vmem:[#allocation49_spill] sm:$0xff] %v4284_v47 }
 0x1a7   : > { %v4286_v42 = vpop.permute.xlu1 %582 }
 0x1a8   : > { %6879 = vst [vmem:[#allocation50_spill] sm:$0xff] %v4286_v42 }
 0x1ab   : > { %v4288_v52 = vpop.permute.xlu1 %586 }
 0x1af   : > { %v4290_v62 = vpop.permute.xlu1 %657 }
 0x1b0   : > { %6880 = vst [vmem:[#allocation51_spill] sm:$0xff] %v4290_v62 }
 0x1b3   : > { %v4292_v45 = vpop.permute.xlu1 %661 }
 0x1b4   : > { %6881 = vst [vmem:[#allocation52_spill] sm:$0xff] %v4292_v45 }
 0x1b7   : > { %v4294_v40 = vpop.permute.xlu1 %665 }
 0x1b8   : > { %6882 = vst [vmem:[#allocation53_spill] sm:$0xff] %v4294_v40 }
 0x1bb   : > { %v4296_v38 = vpop.permute.xlu1 %669 }
 0x1bc   : > { %6883 = vst [vmem:[#allocation54_spill] sm:$0xff] %v4296_v38 }
 0x1bf   : > { %v4298_v14 = vpop.permute.xlu1 %673 }
 0x1c0   : > { %6884 = vst [vmem:[#allocation55_spill] sm:$0xff] %v4298_v14 }
 0x1c3   : > { %v4300_v53 = vpop.permute.xlu1 %677 }
 0x1c4   : > { %6885 = vst [vmem:[#allocation56_spill] sm:$0xff] %v4300_v53 }
 0x1c7   : > { %v4302_v13 = vpop.permute.xlu1 %681 }
 0x1c8   : > { %6886 = vst [vmem:[#allocation57_spill] sm:$0xff] %v4302_v13 }
 0x1cb   : > { %v4304_v19 = vpop.permute.xlu1 %685 }
 0x1f5   : > { %v4306_v47 = vpop.permute.xlu1 %753 }
 0x1f6   : > { %6887 = vst [vmem:[#allocation58_spill] sm:$0xff] %v4306_v47 }
 0x1f9   : > { %v4308_v42 = vpop.permute.xlu1 %757 }
 0x1fa   : > { %6888 = vst [vmem:[#allocation59_spill] sm:$0xff] %v4308_v42  ;;  %v4501_v42 = vld [vmem:[%s3922_s23 + $0x50] sm:$0x1] }
 0x1fd   : > { %v4310_v27 = vpop.permute.xlu1 %761 }
 0x1fe   : > { %6889 = vst [vmem:[#allocation60_spill] sm:$0xff] %v4310_v27 }
 0x201   : > { %v4312_v62 = vpop.permute.xlu1 %765 }
 0x202   : > { %6890 = vst [vmem:[#allocation61_spill] sm:$0xff] %v4312_v62 }
 0x205   : > { %v4314_v45 = vpop.permute.xlu1 %769 }
 0x206   : > { %6891 = vst [vmem:[#allocation62_spill] sm:$0xff] %v4314_v45 }
 0x209   : > { %v4316_v40 = vpop.permute.xlu1 %773 }
 0x20a   : > { %6892 = vst [vmem:[#allocation63_spill] sm:$0xff] %v4316_v40 }
 0x20d   : > { %v4318_v38 = vpop.permute.xlu1 %777 }
 0x20e   : > { %6893 = vst [vmem:[#allocation64_spill] sm:$0xff] %v4318_v38 }
 0x211   : > { %v4320_v14 = vpop.permute.xlu1 %781 }
 0x215   : > { %v816_v53 = vpop.permute.xlu1 %815 }
 0x216   : > { %v819_v13 = vmul.f32 %v816_v53, %v3966_v22  ;;  %v818_v36 = vmul.f32 %v816_v53, %v3963_v21  ;;  %v821_v47 = vmul.f32 %v816_v53, %v3976_v26  ;;  %v820_v62 = vmul.f32 %v816_v53, %v3973_v25 }
 0x217   : > { %v823_v38 = vmul.f32 %v816_v53, %v3998_v34  ;;  %v822_v40 = vmul.f32 %v816_v53, %v3984_v28  ;;  %v825_v21 = vmul.f32 %v816_v53, %v4014_v43  ;;  %v824_v22 = vmul.f32 %v816_v53, %v3989_v31 }
 0x218   : > { %852 = vrot.lane.b32.xlu1 %v819_v13, %s3795_s9  ;;  %850 = vrot.lane.b32.xlu0 %v818_v36, %s3795_s9  ;;  %v827_v36 = vmul.f32 %v816_v53, %v4047_v60  ;;  %v829_v28 = vmul.f32 %v816_v53, %v4057_v0  ;;  %v828_v34 = vmul.f32 %v816_v53, %v3992_v32  ;;  %v3438_v13 = vld [vmem:[%s6786_s1 + $0x4] ss:$0 sm:$0xff] }
 0x219   : > { %v833_v60 = vmul.f32 %v816_v53, %v4098_v37 }
 0x21c   : > { %856 = vrot.lane.b32.xlu1 %v821_v47, %s3795_s9  ;;  %854 = vrot.lane.b32.xlu0 %v820_v62, %s3795_s9  ;;  %v826_v47 = vmul.f32 %v816_v53, %v4050_v61  ;;  %v832_v61 = vmul.f32 %v816_v53, %v4001_v35 }
 0x220   : > { %860 = vrot.lane.b32.xlu1 %v823_v38, %s3795_s9  ;;  %858 = vrot.lane.b32.xlu0 %v822_v40, %s3795_s9  ;;  %v831_v38 = vmul.f32 %v816_v53, %v4091_v30  ;;  %v830_v40 = vmul.f32 %v816_v53, %v4088_v29  ;;  %v4358_v30 = vpop.permute.xlu0 %755 }
 0x221   : > { %6894 = vst [vmem:[#allocation65_spill] sm:$0xff] %v4358_v30 }
 0x224   : > { %864 = vrot.lane.b32.xlu1 %v825_v21, %s3795_s9  ;;  %862 = vrot.lane.b32.xlu0 %v824_v22, %s3795_s9  ;;  %v4360_v29 = vpop.permute.xlu0 %759 }
 0x225   : > { %6895 = vst [vmem:[#allocation66_spill] sm:$0xff] %v4360_v29 }
 0x228   : > { %868 = vrot.lane.b32.xlu1 %v827_v36, %s3795_s9  ;;  %866 = vrot.lane.b32.xlu0 %v826_v47, %s3795_s9  ;;  %v4362_v62 = vpop.permute.xlu0 %763 }
 0x229   : > { %6896 = vst [vmem:[#allocation67_spill] sm:$0xff] %v4362_v62 }
 0x22c   : > { %872 = vrot.lane.b32.xlu1 %v829_v28, %s3795_s9  ;;  %870 = vrot.lane.b32.xlu0 %v828_v34, %s3795_s9  ;;  %v4364_v21 = vpop.permute.xlu0 %767 }
 0x22d   : > { %6897 = vst [vmem:[#allocation68_spill] sm:$0xff] %v4364_v21 }
 0x230   : > { %876 = vrot.lane.b32.xlu1 %v831_v38, %s3795_s9  ;;  %874 = vrot.lane.b32.xlu0 %v830_v40, %s3795_s9  ;;  %v4366_v37 = vpop.permute.xlu0 %771 }
 0x231   : > { %6898 = vst [vmem:[#allocation69_spill] sm:$0xff] %v4366_v37 }
 0x234   : > { %880 = vrot.lane.b32.xlu1 %v833_v60, %s3795_s9  ;;  %878 = vrot.lane.b32.xlu0 %v832_v61, %s3795_s9  ;;  %v4368_v53 = vpop.permute.xlu0 %775 }
 0x235   : > { %6899 = vst [vmem:[#allocation70_spill] sm:$0xff] %v4368_v53  ;;  %v4475_v53 = vld [vmem:[%s3922_s23 + $0x30] sm:$0xfe] }
 0x238   : > { %1132 = vrot.lane.b32.xlu0 %v3438_v13, %s3792_s12  ;;  %v4370_v22 = vpop.permute.xlu0 %779 }
 0x239   : > { %6900 = vst [vmem:[#allocation71_spill] sm:$0xff] %v4370_v22 }
 0x23c   : > { %v784_v36 = vpop.permute.xlu0 %783 }
 0x28a   : > { %v4372_v47 = vpop.permute.xlu1 %852  ;;  %v4374_v28 = vpop.permute.xlu0 %850 }
 0x28b   : > { %6901 = vst [vmem:[#allocation72_spill] sm:$0xff] %v4372_v47  ;;  %6902 = vst [vmem:[#allocation73_spill] sm:$0xff] %v4374_v28  ;;  %v403_v28 = vsel %vm395_vm0, %v4206_v49, %v4156_v6  ;;  %v500_v47 = vsel %vm395_vm0, %v4174_v23, %v4252_v55  ;;  %v597_v6 = vsel %vm395_vm0, %v4288_v52, %v4202_v4 }
 0x28c   : > { %v792_v4 = vsel %vm687_vm1, %v4320_v14, %v784_v36  ;;  %v4434_v14 = vld [vmem:[%s3922_s23 + $0x28] sm:$0x1]  ;;  %v4437_v36 = vld [vmem:[%s3922_s23] sm:$0xfe] }
 0x28e   : > { %v4376_v34 = vpop.permute.xlu1 %856  ;;  %v4378_v38 = vpop.permute.xlu0 %854 }
 0x28f   : > { %6903 = vst [vmem:[#allocation74_spill] sm:$0xff] %v4376_v34  ;;  %6904 = vst [vmem:[#allocation75_spill] sm:$0xff] %v4378_v38  ;;  %v4472_v34 = vld [vmem:[%s3922_s23 + $0x110] sm:$0x1] }
 0x292   : > { %v4380_v40 = vpop.permute.xlu1 %860  ;;  %v4382_v60 = vpop.permute.xlu0 %858 }
 0x293   : > { %6905 = vst [vmem:[#allocation76_spill] sm:$0xff] %v4380_v40  ;;  %6906 = vst [vmem:[#allocation77_spill] sm:$0xff] %v4382_v60  ;;  %v419_v40 = vadd.f32 %v403_v28, %v4016_v44  ;;  %v695_v44 = vsel %vm687_vm1, %v4228_v7, %v4304_v19 }
 0x296   : > { %v4384_v61 = vpop.permute.xlu1 %864  ;;  %v4386_v13 = vpop.permute.xlu0 %862 }
 0x297   : > { %6907 = vst [vmem:[#allocation78_spill] sm:$0xff] %v4384_v61  ;;  %6908 = vst [vmem:[#allocation79_spill] sm:$0xff] %v4386_v13  ;;  %v3435_v61 = vld [vmem:[%s6786_s1 + $0x3] ss:$0 sm:$0xff] }
 0x298   : > { %v4417_v23 = vmul.f32 %v3435_v61, %v3989_v31 }
 0x29a   : > { %v4388_v30 = vpop.permute.xlu1 %868  ;;  %v4390_v22 = vpop.permute.xlu0 %866  ;;  %6913 = vst [vmem:[#allocation84_spill] sm:$0xff] %v4417_v23 }
 0x29b   : > { %6909 = vst [vmem:[#allocation80_spill] sm:$0xff] %v4388_v30  ;;  %6910 = vst [vmem:[#allocation81_spill] sm:$0xff] %v4390_v22  ;;  %v4407_v30 = vld [vmem:[%s3922_s23 + $0xb0] sm:$0x1]  ;;  %v516_v22 = vadd.f32 %v500_v47, %v419_v40  ;;  %v6792_v40 = vrot.slane %v4417_v23, 1 }
 0x29c   : > { %v946_v49 = vmul.f32 %v3435_v61, %v4407_v30 }
 0x29d   : > { %v613_v55 = vadd.f32 %v597_v6, %v516_v22 }
 0x29e   : > { %v4402_v13 = vpop.permute.xlu1 %872  ;;  %v4404_v60 = vpop.permute.xlu0 %870  ;;  %v978_v52 = vrot.slane %v946_v49, 1  ;;  %v4440_v49 = vld [vmem:[%s3922_s23 + $0x20] sm:$0x1] }
 0x29f   : > { %6911 = vst [vmem:[#allocation82_spill] sm:$0xff] %v4402_v13  ;;  %6912 = vst [vmem:[#allocation83_spill] sm:$0xff] %v4404_v60  ;;  %v711_v47 = vadd.f32 %v695_v44, %v613_v55 }
 0x2a0   : > { %v979_v22 = vsel %vm959_vm2, %v6792_v40, %v978_v52 }
 0x2a1   : > { %v808_v7 = vadd.f32 %v792_v4, %v711_v47 }
 0x2a2   : > { %v4419_v28 = vpop.permute.xlu1 %876  ;;  %v4421_v60 = vpop.permute.xlu0 %874 }
 0x2a3   : > { %6914 = vst [vmem:[#allocation85_spill] sm:$0xff] %v4419_v28  ;;  %6915 = vst [vmem:[#allocation86_spill] sm:$0xff] %v4421_v60  ;;  %v4431_v28 = vld [vmem:[%s3922_s23 + $0x8] sm:$0xfe] }
 0x2a6   : > { %v881_v19 = vpop.permute.xlu1 %880  ;;  %v879_v61 = vpop.permute.xlu0 %878 }
 0x2a7   : > { %v889_v6 = vsel %vm687_vm1, %v879_v61, %v881_v19  ;;  %v4455_v19 = vld [vmem:[%s3922_s23 + $0x38] sm:$0xfe]  ;;  %v4461_v61 = vld [vmem:[%s3922_s23 + $0xe0] sm:$0x1] }
 0x2a8   : > { %v905_v60 = vadd.f32 %v889_v6, %v808_v7 }
 0x2aa   : > { %v4442_v44 = vadd.f32 %v979_v22, %v905_v60  ;;  %v4444_v55 = vpop.permute.xlu0 %1132  ;;  %v3436_v60 = vld [vmem:[%s6786_s1 + $0xc] ss:$0 sm:$0xff] }
 0x2ab   : > { %v1136_v4 = vmul.f32 %v4444_v55, %v4431_v28  ;;  %v1138_v52 = vmul.f32 %v4444_v55, %v3936_v10  ;;  %v1135_v47 = vmul.f32 %v4444_v55, %v4437_v36  ;;  %v1137_v7 = vmul.f32 %v4444_v55, %v3933_v9 }
 0x2ac   : > { %v1140_v22 = vmul.f32 %v4444_v55, %v4434_v14  ;;  %v1139_v10 = vmul.f32 %v4444_v55, %v4440_v49  ;;  %v4468_v6 = vmul.f32 %v3436_v60, %v3992_v32  ;;  %v1012_v40 = vmul.f32 %v3436_v60, %v4461_v61 }
 0x2ad   : > { %v1186_v9 = vrot.slane %v1136_v4, 1  ;;  %v1187_v23 = vrot.slane %v1138_v52, 1  ;;  %v1183_v13 = vrot.slane %v1135_v47, 1  ;;  %v1184_v38 = vrot.slane %v1137_v7, 1  ;;  %v3437_v7 = vld [vmem:[%s6786_s1 + $0x15] ss:$0 sm:$0xff] }
 0x2ae   : > { %6916 = vst [vmem:[#allocation87_spill] sm:$0xff] %v4468_v6  ;;  %v1191_v45 = vrot.slane %v1140_v22, 1  ;;  %v1189_v37 = vrot.slane %v1139_v10, 1  ;;  %v1142_v21 = vmul.f32 %v4444_v55, %v4455_v19  ;;  %v1144_v27 = vmul.f32 %v4444_v55, %v3956_v18  ;;  %v4493_v22 = vld [vmem:[%s3922_s23 + $0x58] sm:$0x1] }
 0x2af   : > { %v1188_v60 = vsel %vm959_vm2, %v1186_v9, %v1187_v23  ;;  %v1185_v4 = vsel %vm959_vm2, %v1183_v13, %v1184_v38  ;;  %v1141_v52 = vmul.f32 %v4444_v55, %v4475_v53  ;;  %v1143_v47 = vmul.f32 %v4444_v55, %v3953_v17 }
 0x2b0   : > { %1225 = vrot.lane.b32.xlu0 %v1188_v60, %s3794_s24  ;;  %1223 = vrot.lane.b32.xlu1 %v1185_v4, %s3794_s24  ;;  %v1077_v10 = vmul.f32 %v3437_v7, %v4472_v34  ;;  %v4498_v9 = vmul.f32 %v3437_v7, %v4001_v35  ;;  %v1043_v62 = vrot.slane %v1012_v40, 1  ;;  %v1192_v29 = vsel %vm959_vm2, %v1187_v23, %v1191_v45  ;;  %v4510_v35 = vld [vmem:[%s3922_s23 + $0x68] sm:$0xfe]  ;;  %v4515_v23 = vld [vmem:[%s3922_s23 + $0x60] sm:$0xfe] }
 0x2b1   : > { %v1190_v60 = vsel %vm959_vm2, %v1184_v38, %v1189_v37  ;;  %v1196_v20 = vrot.slane %v1142_v21, 1  ;;  %v1197_v50 = vrot.slane %v1144_v27, 1  ;;  %v1193_v4 = vrot.slane %v1141_v52, 1 }
 0x2b2   : > { %6917 = vst [vmem:[#allocation88_spill] sm:$0xff] %v4498_v9  ;;  %v1194_v16 = vrot.slane %v1143_v47, 1  ;;  %v1146_v58 = vmul.f32 %v4444_v55, %v4493_v22  ;;  %v1145_v13 = vmul.f32 %v4444_v55, %v4501_v42  ;;  %v1108_v45 = vrot.slane %v1077_v10, 1  ;;  %v4530_v47 = vld [vmem:[%s3922_s23 + $0x88] sm:$0x1] }
 0x2b3   : > { %v6796_v27 = vrot.slane %v4498_v9, 1  ;;  %v6918_v21 = vrot.slane %v4468_v6, 1  ;;  %v1148_v38 = vmul.f32 %v4444_v55, %v4510_v35  ;;  %v1150_v40 = vmul.f32 %v4444_v55, %v3976_v26 }
 0x2b4   : > { %1229 = vrot.lane.b32.xlu0 %v1192_v29, %s3794_s24  ;;  %1227 = vrot.lane.b32.xlu1 %v1190_v60, %s3794_s24  ;;  %v1147_v29 = vmul.f32 %v4444_v55, %v4515_v23  ;;  %v1149_v52 = vmul.f32 %v4444_v55, %v3973_v25  ;;  %v1198_v7 = vsel %vm959_vm2, %v1196_v20, %v1197_v50  ;;  %v1199_v60 = vrot.slane %v1145_v13, 1  ;;  %v4543_v20 = vld [vmem:[%s3922_s23 + $0x80] sm:$0x1] }
 0x2b5   : > { %v1044_v37 = vsel %vm959_vm2, %v6918_v21, %v1043_v62  ;;  %v1195_v10 = vsel %vm959_vm2, %v1193_v4, %v1194_v16  ;;  %v1201_v62 = vrot.slane %v1146_v58, 1  ;;  %v1109_v21 = vsel %vm959_vm2, %v6796_v27, %v1108_v45  ;;  %v4550_v45 = vld [vmem:[%s3922_s23 + $0x98] sm:$0xfe] }
 0x2b6   : > { %v1152_v6 = vmul.f32 %v4444_v55, %v4530_v47  ;;  %v1060_v15 = vadd.f32 %v1044_v37, %v4442_v44  ;;  %v1206_v4 = vrot.slane %v1148_v38, 1  ;;  %v1207_v51 = vrot.slane %v1150_v40, 1  ;;  %v4557_v44 = vld [vmem:[%s3922_s23 + $0x90] sm:$0xfe] }
 0x2b7   : > { %v1203_v58 = vrot.slane %v1147_v29, 1  ;;  %v1204_v13 = vrot.slane %v1149_v52, 1  ;;  %v1151_v9 = vmul.f32 %v4444_v55, %v4543_v20  ;;  %v1155_v52 = vmul.f32 %v4444_v55, %v3989_v31 }
 0x2b8   : > { %1233 = vrot.lane.b32.xlu0 %v1198_v7, %s3794_s24  ;;  %1231 = vrot.lane.b32.xlu1 %v1195_v10, %s3794_s24  ;;  %v1202_v7 = vsel %vm959_vm2, %v1197_v50, %v1201_v62  ;;  %v1200_v10 = vsel %vm959_vm2, %v1194_v16, %v1199_v60  ;;  %v4552_v27 = vadd.f32 %v1109_v21, %v1060_v15  ;;  %v1211_v38 = vrot.slane %v1152_v6, 1  ;;  %v4570_v62 = vld [vmem:[%s3922_s23 + $0xb8] sm:$0x1] }
 0x2b9   : > { %v1208_v37 = vsel %vm959_vm2, %v1206_v4, %v1207_v51  ;;  %v1154_v50 = vmul.f32 %v4444_v55, %v4550_v45  ;;  %v1156_v16 = vmul.f32 %v4444_v55, %v4014_v43  ;;  %v1205_v40 = vsel %vm959_vm2, %v1203_v58, %v1204_v13 }
 0x2ba   : > { %v1209_v29 = vrot.slane %v1151_v9, 1  ;;  %v1153_v15 = vmul.f32 %v4444_v55, %v4557_v44  ;;  %v1212_v6 = vsel %vm959_vm2, %v1207_v51, %v1211_v38  ;;  %v1158_v4 = vmul.f32 %v4444_v55, %v4570_v62 }
 0x2bb   : > { %v1216_v60 = vrot.slane %v1154_v50, 1  ;;  %v1217_v21 = vrot.slane %v1156_v16, 1 }
 0x2bc   : > { %1237 = vrot.lane.b32.xlu0 %v1202_v7, %s3794_s24  ;;  %1235 = vrot.lane.b32.xlu1 %v1200_v10, %s3794_s24  ;;  %v1210_v9 = vsel %vm959_vm2, %v1204_v13, %v1209_v29  ;;  %v1213_v58 = vrot.slane %v1153_v15, 1  ;;  %v1214_v7 = vrot.slane %v1155_v52, 1  ;;  %v1157_v10 = vmul.f32 %v4444_v55, %v4407_v30  ;;  %v3439_v55 = vld [vmem:[%s6786_s1 + $0xd] ss:$0 sm:$0xff] }
 0x2bd   : > { %v1221_v38 = vrot.slane %v1158_v4, 1 }
 0x2be   : > { %v1215_v51 = vsel %vm959_vm2, %v1213_v58, %v1214_v7  ;;  %v1219_v50 = vrot.slane %v1157_v10, 1 }
 0x2bf   : > { %v1222_v13 = vsel %vm959_vm2, %v1217_v21, %v1221_v38 }
 0x2c0   : > { %1241 = vrot.lane.b32.xlu0 %v1208_v37, %s3794_s24  ;;  %1239 = vrot.lane.b32.xlu1 %v1205_v40, %s3794_s24  ;;  %v1218_v37 = vsel %vm959_vm2, %v1216_v60, %v1217_v21  ;;  %v1220_v16 = vsel %vm959_vm2, %v1214_v7, %v1219_v50 }
 0x2c4   : > { %1245 = vrot.lane.b32.xlu0 %v1212_v6, %s3794_s24  ;;  %1243 = vrot.lane.b32.xlu1 %v1210_v9, %s3794_s24 }
 0x2c8   : > { %1249 = vrot.lane.b32.xlu0 %v1218_v37, %s3794_s24  ;;  %1247 = vrot.lane.b32.xlu1 %v1215_v51, %s3794_s24 }
 0x2cc   : > { %1253 = vrot.lane.b32.xlu0 %v1222_v13, %s3794_s24  ;;  %1251 = vrot.lane.b32.xlu1 %v1220_v16, %s3794_s24 }
 0x2d0   : > { %1285 = vrot.lane.b32.xlu1 %v3439_v55, %s3792_s12 }
 0x322   : > { %v4594_v40 = vpop.permute.xlu1 %1223 }
 0x323   : > { %6919 = vst [vmem:[#allocation89_spill] sm:$0xff] %v4594_v40 }
 0x326   : > { %v4596_v29 = vpop.permute.xlu1 %1227 }
 0x327   : > { %6920 = vst [vmem:[#allocation90_spill] sm:$0xff] %v4596_v29 }
 0x32a   : > { %v4598_v15 = vpop.permute.xlu1 %1231 }
 0x32b   : > { %6921 = vst [vmem:[#allocation91_spill] sm:$0xff] %v4598_v15 }
 0x32e   : > { %v4600_v52 = vpop.permute.xlu1 %1235 }
 0x32f   : > { %6922 = vst [vmem:[#allocation92_spill] sm:$0xff] %v4600_v52 }
 0x332   : > { %v4602_v6 = vpop.permute.xlu1 %1239 }
 0x333   : > { %6923 = vst [vmem:[#allocation93_spill] sm:$0xff] %v4602_v6 }
 0x336   : > { %v4604_v60 = vpop.permute.xlu1 %1243 }
 0x337   : > { %6924 = vst [vmem:[#allocation94_spill] sm:$0xff] %v4604_v60 }
 0x33a   : > { %v4606_v21 = vpop.permute.xlu1 %1247 }
 0x33b   : > { %6925 = vst [vmem:[#allocation95_spill] sm:$0xff] %v4606_v21 }
 0x33e   : > { %v4608_v4 = vpop.permute.xlu1 %1251 }
 0x342   : > { %v4610_v9 = vpop.permute.xlu1 %1285 }
 0x343   : > { %v1289_v58 = vmul.f32 %v4610_v9, %v4455_v19  ;;  %v1291_v7 = vmul.f32 %v4610_v9, %v3956_v18  ;;  %v1288_v10 = vmul.f32 %v4610_v9, %v4475_v53  ;;  %v1290_v37 = vmul.f32 %v4610_v9, %v3953_v17 }
 0x344   : > { %v1293_v51 = vmul.f32 %v4610_v9, %v4493_v22  ;;  %v1292_v38 = vmul.f32 %v4610_v9, %v4501_v42  ;;  %v1295_v18 = vmul.f32 %v4610_v9, %v4510_v35  ;;  %v1297_v60 = vmul.f32 %v4610_v9, %v3976_v26 }
 0x345   : > { %v1339_v50 = vrot.slane %v1289_v58, 1  ;;  %v1340_v13 = vrot.slane %v1291_v7, 1  ;;  %v1336_v16 = vrot.slane %v1288_v10, 1  ;;  %v1337_v55 = vrot.slane %v1290_v37, 1 }
 0x346   : > { %v1344_v40 = vrot.slane %v1293_v51, 1  ;;  %v1342_v21 = vrot.slane %v1292_v38, 1  ;;  %v1294_v52 = vmul.f32 %v4610_v9, %v4515_v23  ;;  %v1296_v58 = vmul.f32 %v4610_v9, %v3973_v25 }
 0x347   : > { %v1341_v17 = vsel %vm959_vm2, %v1339_v50, %v1340_v13  ;;  %v1338_v6 = vsel %vm959_vm2, %v1336_v16, %v1337_v55  ;;  %v1349_v37 = vrot.slane %v1295_v18, 1  ;;  %v1350_v26 = vrot.slane %v1297_v60, 1 }
 0x348   : > { %1378 = vrot.lane.b32.xlu1 %v1341_v17, %s3794_s24  ;;  %1376 = vrot.lane.b32.xlu0 %v1338_v6, %s3794_s24  ;;  %v1345_v7 = vsel %vm959_vm2, %v1340_v13, %v1344_v40  ;;  %v1343_v10 = vsel %vm959_vm2, %v1337_v55, %v1342_v21  ;;  %v1346_v51 = vrot.slane %v1294_v52, 1  ;;  %v1347_v38 = vrot.slane %v1296_v58, 1 }
 0x349   : > { %v1299_v50 = vmul.f32 %v4610_v9, %v4530_v47  ;;  %v1298_v16 = vmul.f32 %v4610_v9, %v4543_v20  ;;  %v1351_v25 = vsel %vm959_vm2, %v1349_v37, %v1350_v26  ;;  %v1301_v40 = vmul.f32 %v4610_v9, %v4550_v45 }
 0x34a   : > { %v1303_v6 = vmul.f32 %v4610_v9, %v4014_v43  ;;  %v1300_v52 = vmul.f32 %v4610_v9, %v4557_v44  ;;  %v1348_v60 = vsel %vm959_vm2, %v1346_v51, %v1347_v38  ;;  %v1302_v55 = vmul.f32 %v4610_v9, %v3989_v31  ;;  %v4663_v31 = vld [vmem:[%s3922_s23 + $0xc8] sm:$0xfe] }
 0x34b   : > { %v1354_v21 = vrot.slane %v1299_v50, 1  ;;  %v1352_v13 = vrot.slane %v1298_v16, 1  ;;  %v1359_v18 = vrot.slane %v1301_v40, 1  ;;  %v1305_v43 = vmul.f32 %v4610_v9, %v4570_v62  ;;  %v4668_v50 = vld [vmem:[%s3922_s23 + $0xc0] sm:$0xfe] }
 0x34c   : > { %1382 = vrot.lane.b32.xlu1 %v1345_v7, %s3794_s24  ;;  %1380 = vrot.lane.b32.xlu0 %v1343_v10, %s3794_s24  ;;  %v1360_v17 = vrot.slane %v1303_v6, 1  ;;  %v1356_v58 = vrot.slane %v1300_v52, 1  ;;  %v1357_v37 = vrot.slane %v1302_v55, 1  ;;  %v1304_v51 = vmul.f32 %v4610_v9, %v4407_v30 }
 0x34d   : > { %v1355_v7 = vsel %vm959_vm2, %v1350_v26, %v1354_v21  ;;  %v1353_v10 = vsel %vm959_vm2, %v1347_v38, %v1352_v13  ;;  %v1307_v26 = vmul.f32 %v4610_v9, %v4663_v31  ;;  %v1309_v38 = vmul.f32 %v4610_v9, %v4057_v0  ;;  %v4681_v21 = vld [vmem:[%s3922_s23 + $0xe8] sm:$0x1] }
 0x34e   : > { %v1361_v16 = vsel %vm959_vm2, %v1359_v18, %v1360_v17  ;;  %v1358_v40 = vsel %vm959_vm2, %v1356_v58, %v1357_v37  ;;  %v1362_v6 = vrot.slane %v1304_v51, 1  ;;  %v1306_v52 = vmul.f32 %v4610_v9, %v4668_v50 }
 0x34f   : > { %v1369_v55 = vrot.slane %v1307_v26, 1  ;;  %v1370_v18 = vrot.slane %v1309_v38, 1  ;;  %v1311_v0 = vmul.f32 %v4610_v9, %v4681_v21  ;;  %v4705_v26 = vpop.permute.xlu0 %1225 }
 0x350   : > { %1386 = vrot.lane.b32.xlu1 %v1351_v25, %s3794_s24  ;;  %1384 = vrot.lane.b32.xlu0 %v1348_v60, %s3794_s24  ;;  %v1364_v25 = vrot.slane %v1305_v43, 1  ;;  %v1308_v60 = vmul.f32 %v4610_v9, %v3992_v32  ;;  %v1363_v58 = vsel %vm959_vm2, %v1357_v37, %v1362_v6  ;;  %v1366_v43 = vrot.slane %v1306_v52, 1  ;;  %6926 = vst [vmem:[#allocation96_spill] sm:$0xff] %v4705_v26 }
 0x351   : > { %v1310_v32 = vmul.f32 %v4610_v9, %v4461_v61  ;;  %v1374_v51 = vrot.slane %v1311_v0, 1  ;;  %v3440_v9 = vld [vmem:[%s6786_s1 + $0x16] ss:$0 sm:$0xff] }
 0x352   : > { %v1365_v13 = vsel %vm959_vm2, %v1360_v17, %v1364_v25 }
 0x353   : > { %v1375_v37 = vsel %vm959_vm2, %v1370_v18, %v1374_v51  ;;  %v4707_v38 = vpop.permute.xlu0 %1229 }
 0x354   : > { %1390 = vrot.lane.b32.xlu1 %v1355_v7, %s3794_s24  ;;  %1388 = vrot.lane.b32.xlu0 %v1353_v10, %s3794_s24  ;;  %v1367_v7 = vrot.slane %v1308_v60, 1  ;;  %v1371_v10 = vsel %vm959_vm2, %v1369_v55, %v1370_v18  ;;  %6927 = vst [vmem:[#allocation97_spill] sm:$0xff] %v4707_v38 }
 0x356   : > { %v1368_v17 = vsel %vm959_vm2, %v1366_v43, %v1367_v7 }
 0x358   : > { %1394 = vrot.lane.b32.xlu1 %v1361_v16, %s3794_s24  ;;  %1392 = vrot.lane.b32.xlu0 %v1358_v40, %s3794_s24  ;;  %v1372_v16 = vrot.slane %v1310_v32, 1  ;;  %v4709_v40 = vpop.permute.xlu0 %1233 }
 0x359   : > { %6928 = vst [vmem:[#allocation98_spill] sm:$0xff] %v4709_v40 }
 0x35a   : > { %v1373_v25 = vsel %vm959_vm2, %v1367_v7, %v1372_v16 }
 0x35c   : > { %1398 = vrot.lane.b32.xlu1 %v1365_v13, %s3794_s24  ;;  %1396 = vrot.lane.b32.xlu0 %v1363_v58, %s3794_s24  ;;  %v4711_v6 = vpop.permute.xlu0 %1237 }
 0x35d   : > { %6929 = vst [vmem:[#allocation99_spill] sm:$0xff] %v4711_v6  ;;  %v4760_v6 = vld [vmem:[%s3922_s23 + $0xa8] sm:$0xff] }
 0x360   : > { %1402 = vrot.lane.b32.xlu1 %v1371_v10, %s3794_s24  ;;  %1400 = vrot.lane.b32.xlu0 %v1368_v17, %s3794_s24  ;;  %v4713_v52 = vpop.permute.xlu0 %1241 }
 0x361   : > { %6930 = vst [vmem:[#allocation100_spill] sm:$0xff] %v4713_v52 }
 0x364   : > { %1406 = vrot.lane.b32.xlu1 %v1375_v37, %s3794_s24  ;;  %1404 = vrot.lane.b32.xlu0 %v1373_v25, %s3794_s24  ;;  %v4715_v60 = vpop.permute.xlu0 %1245  ;;  %v4742_v37 = vld [vmem:[%s3922_s23 + $0x78] sm:$0xff] }
 0x365   : > { %6931 = vst [vmem:[#allocation101_spill] sm:$0xff] %v4715_v60 }
 0x368   : > { %1438 = vrot.lane.b32.xlu0 %v3440_v9, %s3792_s12  ;;  %v4717_v13 = vpop.permute.xlu0 %1249 }
 0x369   : > { %6932 = vst [vmem:[#allocation102_spill] sm:$0xff] %v4717_v13 }
 0x36c   : > { %v4719_v55 = vpop.permute.xlu0 %1253 }
 0x3ba   : > { %v4721_v18 = vpop.permute.xlu0 %1376 }
 0x3bb   : > { %6933 = vst [vmem:[#allocation103_spill] sm:$0xff] %v4721_v18  ;;  %v4749_v18 = vld [vmem:[%s3922_s23 + $0x70] sm:$0xff] }
 0x3be   : > { %v4723_v0 = vpop.permute.xlu0 %1380 }
 0x3bf   : > { %6934 = vst [vmem:[#allocation104_spill] sm:$0xff] %v4723_v0 }
 0x3c2   : > { %v4725_v58 = vpop.permute.xlu0 %1384 }
 0x3c3   : > { %6935 = vst [vmem:[#allocation105_spill] sm:$0xff] %v4725_v58 }
 0x3c6   : > { %v4727_v43 = vpop.permute.xlu0 %1388 }
 0x3c7   : > { %6936 = vst [vmem:[#allocation106_spill] sm:$0xff] %v4727_v43 }
 0x3ca   : > { %v4729_v7 = vpop.permute.xlu0 %1392 }
 0x3cb   : > { %6937 = vst [vmem:[#allocation107_spill] sm:$0xff] %v4729_v7 }
 0x3ce   : > { %v4731_v32 = vpop.permute.xlu0 %1396 }
 0x3cf   : > { %6938 = vst [vmem:[#allocation108_spill] sm:$0xff] %v4731_v32 }
 0x3d2   : > { %v4733_v10 = vpop.permute.xlu0 %1400 }
 0x3d3   : > { %6939 = vst [vmem:[#allocation109_spill] sm:$0xff] %v4733_v10 }
 0x3d6   : > { %v4735_v17 = vpop.permute.xlu0 %1404 }
 0x3da   : > { %v4737_v51 = vpop.permute.xlu0 %1438 }
 0x3db   : > { %v1442_v16 = vmul.f32 %v4737_v51, %v4510_v35  ;;  %v1444_v25 = vmul.f32 %v4742_v37, %v4737_v51  ;;  %v1441_v9 = vmul.f32 %v4737_v51, %v4515_v23  ;;  %v1443_v26 = vmul.f32 %v4749_v18, %v4737_v51 }
 0x3dc   : > { %v1446_v10 = vmul.f32 %v4737_v51, %v4530_v47  ;;  %v1445_v32 = vmul.f32 %v4737_v51, %v4543_v20  ;;  %v1448_v52 = vmul.f32 %v4737_v51, %v4550_v45  ;;  %v1450_v15 = vmul.f32 %v4760_v6, %v4737_v51 }
 0x3dd   : > { %v1492_v7 = vrot.slane %v1442_v16, 1  ;;  %v1493_v43 = vrot.slane %v1444_v25, 1  ;;  %v1489_v58 = vrot.slane %v1441_v9, 1  ;;  %v1490_v0 = vrot.slane %v1443_v26, 1  ;;  %v4769_v25 = vld [vmem:[%s3922_s23 + $0xa0] sm:$0xff] }
 0x3de   : > { %v1497_v13 = vrot.slane %v1446_v10, 1  ;;  %v1495_v60 = vrot.slane %v1445_v32, 1  ;;  %v1447_v16 = vmul.f32 %v4737_v51, %v4557_v44  ;;  %v1449_v26 = vmul.f32 %v4769_v25, %v4737_v51 }
 0x3df   : > { %v1494_v40 = vsel %vm959_vm2, %v1492_v7, %v1493_v43  ;;  %v1491_v29 = vsel %vm959_vm2, %v1489_v58, %v1490_v0  ;;  %v1502_v7 = vrot.slane %v1448_v52, 1  ;;  %v1503_v58 = vrot.slane %v1450_v15, 1  ;;  %v4787_v52 = vld [vmem:[%s3922_s23 + $0xd8] sm:$0xff] }
 0x3e0   : > { %1531 = vrot.lane.b32.xlu0 %v1494_v40, %s3794_s24  ;;  %1529 = vrot.lane.b32.xlu1 %v1491_v29, %s3794_s24  ;;  %v1498_v32 = vsel %vm959_vm2, %v1493_v43, %v1497_v13  ;;  %v1496_v10 = vsel %vm959_vm2, %v1490_v0, %v1495_v60  ;;  %v1499_v9 = vrot.slane %v1447_v16, 1  ;;  %v1500_v38 = vrot.slane %v1449_v26, 1  ;;  %v4795_v16 = vld [vmem:[%s3922_s23 + $0xd0] sm:$0xff] }
 0x3e1   : > { %v1452_v12 = vmul.f32 %v4737_v51, %v4570_v62  ;;  %v1451_v5 = vmul.f32 %v4737_v51, %v4407_v30  ;;  %v1504_v29 = vsel %vm959_vm2, %v1502_v7, %v1503_v58  ;;  %v1454_v40 = vmul.f32 %v4737_v51, %v4663_v31 }
 0x3e2   : > { %v1456_v15 = vmul.f32 %v4787_v52, %v4737_v51  ;;  %v1453_v60 = vmul.f32 %v4737_v51, %v4668_v50  ;;  %v1501_v13 = vsel %vm959_vm2, %v1499_v9, %v1500_v38  ;;  %v1455_v26 = vmul.f32 %v4795_v16, %v4737_v51 }
 0x3e3   : > { %v1507_v0 = vrot.slane %v1452_v12, 1  ;;  %v1505_v43 = vrot.slane %v1451_v5, 1  ;;  %v1458_v11 = vmul.f32 %v4737_v51, %v4681_v21  ;;  %v1457_v59 = vmul.f32 %v4737_v51, %v4461_v61 }
 0x3e4   : > { %1535 = vrot.lane.b32.xlu0 %v1498_v32, %s3794_s24  ;;  %1533 = vrot.lane.b32.xlu1 %v1496_v10, %s3794_s24  ;;  %v1512_v32 = vrot.slane %v1454_v40, 1  ;;  %v1513_v10 = vrot.slane %v1456_v15, 1  ;;  %v1509_v7 = vrot.slane %v1453_v60, 1  ;;  %v1510_v9 = vrot.slane %v1455_v26, 1  ;;  %v4813_v40 = vld [vmem:[%s3922_s23 + $0xf0] sm:$0xfe] }
 0x3e5   : > { %v1508_v12 = vsel %vm959_vm2, %v1503_v58, %v1507_v0  ;;  %v1506_v5 = vsel %vm959_vm2, %v1500_v38, %v1505_v43  ;;  %v1517_v60 = vrot.slane %v1458_v11, 1  ;;  %v4819_v38 = vld [vmem:[%s3922_s23 + $0x108] sm:$0xff]  ;;  %v1515_v43 = vrot.slane %v1457_v59, 1  ;;  %v4832_v11 = vld [vmem:[%s3922_s23 + $0x118] sm:$0x1] }
 0x3e6   : > { %v1514_v15 = vsel %vm959_vm2, %v1512_v32, %v1513_v10  ;;  %v1511_v0 = vsel %vm959_vm2, %v1509_v7, %v1510_v9  ;;  %v1459_v26 = vmul.f32 %v4737_v51, %v4813_v40  ;;  %v1464_v59 = vmul.f32 %v4737_v51, %v4832_v11 }
 0x3e7   : > { %v1516_v7 = vsel %vm959_vm2, %v1510_v9, %v1515_v43  ;;  %v1463_v46 = vmul.f32 %v4737_v51, %v4472_v34 }
 0x3e8   : > { %1539 = vrot.lane.b32.xlu0 %v1504_v29, %s3794_s24  ;;  %1537 = vrot.lane.b32.xlu1 %v1501_v13, %s3794_s24  ;;  %v4808_v29 = vld [vmem:[%s3922_s23 + $0xf8] sm:$0xfe]  ;;  %v1462_v13 = vmul.f32 %v4819_v38, %v4737_v51  ;;  %v1519_v48 = vrot.slane %v1459_v26, 1 }
 0x3e9   : > { %v1460_v58 = vmul.f32 %v4737_v51, %v4808_v29 }
 0x3ea   : > { %v1523_v56 = vrot.slane %v1462_v13, 1 }
 0x3eb   : > { %v1522_v8 = vrot.slane %v1460_v58, 1  ;;  %v1525_v58 = vrot.slane %v1463_v46, 1 }
 0x3ec   : > { %1543 = vrot.lane.b32.xlu0 %v1508_v12, %s3794_s24  ;;  %1541 = vrot.lane.b32.xlu1 %v1506_v5, %s3794_s24  ;;  %v4827_v12 = vld [vmem:[%s3922_s23 + $0x100] sm:$0xff]  ;;  %v1518_v5 = vsel %vm959_vm2, %v1513_v10, %v1517_v60  ;;  %v1527_v60 = vrot.slane %v1464_v59, 1 }
 0x3ed   : > { %v1461_v32 = vmul.f32 %v4827_v12, %v4737_v51 }
 0x3ee   : > { %v1528_v9 = vsel %vm959_vm2, %v1523_v56, %v1527_v60 }
 0x3ef   : > { %v1520_v3 = vrot.slane %v1461_v32, 1 }
 0x3f0   : > { %1547 = vrot.lane.b32.xlu0 %v1514_v15, %s3794_s24  ;;  %1545 = vrot.lane.b32.xlu1 %v1511_v0, %s3794_s24  ;;  %v1524_v15 = vsel %vm959_vm2, %v1522_v8, %v1523_v56  ;;  %v3441_v8 = vld [vmem:[%s6786_s1 + $0x5] ss:$0 sm:$0xff] }
 0x3f1   : > { %v1521_v10 = vsel %vm959_vm2, %v1519_v48, %v1520_v3  ;;  %v1526_v13 = vsel %vm959_vm2, %v1520_v3, %v1525_v58  ;;  %v4856_v48 = vpop.permute.xlu1 %1378 }
 0x3f2   : > { %6940 = vst [vmem:[#allocation110_spill] sm:$0xff] %v4856_v48  ;;  %v4900_v48 = vld [vmem:[%s3922_s23 + $0x10] sm:$0xff] }
 0x3f4   : > { %1551 = vrot.lane.b32.xlu0 %v1518_v5, %s3794_s24  ;;  %1549 = vrot.lane.b32.xlu1 %v1516_v7, %s3794_s24 }
 0x3f5   : > { %v4858_v46 = vpop.permute.xlu1 %1382 }
 0x3f6   : > { %6941 = vst [vmem:[#allocation111_spill] sm:$0xff] %v4858_v46 }
 0x3f8   : > { %1555 = vrot.lane.b32.xlu0 %v1524_v15, %s3794_s24  ;;  %1553 = vrot.lane.b32.xlu1 %v1521_v10, %s3794_s24 }
 0x3f9   : > { %v4860_v34 = vpop.permute.xlu1 %1386 }
 0x3fa   : > { %6942 = vst [vmem:[#allocation112_spill] sm:$0xff] %v4860_v34 }
 0x3fc   : > { %1559 = vrot.lane.b32.xlu0 %v1528_v9, %s3794_s24  ;;  %1557 = vrot.lane.b32.xlu1 %v1526_v13, %s3794_s24  ;;  %v4893_v13 = vld [vmem:[%s3922_s23 + $0x18] sm:$0xff] }
 0x3fd   : > { %v4862_v56 = vpop.permute.xlu1 %1390 }
 0x3fe   : > { %6943 = vst [vmem:[#allocation113_spill] sm:$0xff] %v4862_v56 }
 0x400   : > { %1591 = vrot.lane.b32.xlu1 %v3441_v8, %s3793_s5 }
 0x401   : > { %v4864_v3 = vpop.permute.xlu1 %1394 }
 0x402   : > { %6944 = vst [vmem:[#allocation114_spill] sm:$0xff] %v4864_v3  ;;  %v4911_v3 = vld [vmem:[%s3922_s23 + $0x48] sm:$0xff] }
 0x405   : > { %v4866_v51 = vpop.permute.xlu1 %1398 }
 0x406   : > { %6945 = vst [vmem:[#allocation115_spill] sm:$0xff] %v4866_v51 }
 0x409   : > { %v4868_v0 = vpop.permute.xlu1 %1402 }
 0x40a   : > { %6946 = vst [vmem:[#allocation116_spill] sm:$0xff] %v4868_v0 }
 0x40d   : > { %v4870_v43 = vpop.permute.xlu1 %1406 }
 0x452   : > { %v4872_v26 = vpop.permute.xlu1 %1529 }
 0x453   : > { %6947 = vst [vmem:[#allocation117_spill] sm:$0xff] %v4872_v26 }
 0x456   : > { %v4874_v32 = vpop.permute.xlu1 %1533 }
 0x457   : > { %6948 = vst [vmem:[#allocation118_spill] sm:$0xff] %v4874_v32 }
 0x45a   : > { %v4876_v5 = vpop.permute.xlu1 %1537 }
 0x45b   : > { %6949 = vst [vmem:[#allocation119_spill] sm:$0xff] %v4876_v5 }
 0x45e   : > { %v4878_v59 = vpop.permute.xlu1 %1541 }
 0x45f   : > { %6950 = vst [vmem:[#allocation120_spill] sm:$0xff] %v4878_v59 }
 0x462   : > { %v4880_v7 = vpop.permute.xlu1 %1545 }
 0x463   : > { %6951 = vst [vmem:[#allocation121_spill] sm:$0xff] %v4880_v7 }
 0x466   : > { %v4882_v15 = vpop.permute.xlu1 %1549 }
 0x467   : > { %6952 = vst [vmem:[#allocation122_spill] sm:$0xff] %v4882_v15 }
 0x46a   : > { %v4884_v10 = vpop.permute.xlu1 %1553 }
 0x46b   : > { %6953 = vst [vmem:[#allocation123_spill] sm:$0xff] %v4884_v10 }
 0x46e   : > { %v4886_v60 = vpop.permute.xlu1 %1557 }
 0x472   : > { %v4888_v58 = vpop.permute.xlu1 %1591 }
 0x473   : > { %v1595_v9 = vmul.f32 %v4888_v58, %v4431_v28  ;;  %v1597_v8 = vmul.f32 %v4893_v13, %v4888_v58  ;;  %v1594_v26 = vmul.f32 %v4888_v58, %v4437_v36  ;;  %v1596_v10 = vmul.f32 %v4900_v48, %v4888_v58 }
 0x474   : > { %v1599_v15 = vmul.f32 %v4888_v58, %v4434_v14  ;;  %v1598_v28 = vmul.f32 %v4888_v58, %v4440_v49  ;;  %v1601_v36 = vmul.f32 %v4888_v58, %v4455_v19  ;;  %v1603_v56 = vmul.f32 %v4911_v3, %v4888_v58 }
 0x475   : > { %v1645_v7 = vrot.slane %v1595_v9, 1  ;;  %v1646_v59 = vrot.slane %v1597_v8, 1  ;;  %v1642_v5 = vrot.slane %v1594_v26, 1  ;;  %v1643_v32 = vrot.slane %v1596_v10, 1  ;;  %v4920_v9 = vld [vmem:[%s3922_s23 + $0x40] sm:$0xff] }
 0x476   : > { %v1650_v0 = vrot.slane %v1599_v15, 1  ;;  %v1648_v51 = vrot.slane %v1598_v28, 1  ;;  %v1600_v49 = vmul.f32 %v4888_v58, %v4475_v53  ;;  %v1602_v26 = vmul.f32 %v4920_v9, %v4888_v58 }
 0x477   : > { %v1647_v34 = vsel %vm959_vm2, %v1645_v7, %v1646_v59  ;;  %v1644_v14 = vsel %vm959_vm2, %v1642_v5, %v1643_v32  ;;  %v1655_v8 = vrot.slane %v1601_v36, 1  ;;  %v1656_v7 = vrot.slane %v1603_v56, 1 }
 0x478   : > { %1684 = vrot.lane.b32.xlu1 %v1647_v34, %s3795_s9  ;;  %1682 = vrot.lane.b32.xlu0 %v1644_v14, %s3795_s9  ;;  %v1651_v15 = vsel %vm959_vm2, %v1646_v59, %v1650_v0  ;;  %v1649_v10 = vsel %vm959_vm2, %v1643_v32, %v1648_v51  ;;  %v1652_v28 = vrot.slane %v1600_v49, 1  ;;  %v1653_v5 = vrot.slane %v1602_v26, 1 }
 0x479   : > { %v1605_v46 = vmul.f32 %v4888_v58, %v4493_v22  ;;  %v1604_v2 = vmul.f32 %v4888_v58, %v4501_v42  ;;  %v1657_v34 = vsel %vm959_vm2, %v1655_v8, %v1656_v7  ;;  %v1607_v0 = vmul.f32 %v4888_v58, %v4510_v35 }
 0x47a   : > { %v1609_v56 = vmul.f32 %v4742_v37, %v4888_v58  ;;  %v1606_v51 = vmul.f32 %v4888_v58, %v4515_v23  ;;  %v1654_v32 = vsel %vm959_vm2, %v1652_v28, %v1653_v5  ;;  %v1608_v14 = vmul.f32 %v4749_v18, %v4888_v58 }
 0x47b   : > { %v1660_v59 = vrot.slane %v1605_v46, 1  ;;  %v1658_v36 = vrot.slane %v1604_v2, 1  ;;  %v1665_v49 = vrot.slane %v1607_v0, 1  ;;  %v1610_v2 = vmul.f32 %v4888_v58, %v4543_v20 }
 0x47c   : > { %1688 = vrot.lane.b32.xlu1 %v1651_v15, %s3795_s9  ;;  %1686 = vrot.lane.b32.xlu0 %v1649_v10, %s3795_s9  ;;  %v1666_v26 = vrot.slane %v1609_v56, 1  ;;  %v1662_v15 = vrot.slane %v1606_v51, 1  ;;  %v1611_v10 = vmul.f32 %v4888_v58, %v4530_v47  ;;  %v1663_v28 = vrot.slane %v1608_v14, 1 }
 0x47d   : > { %v1661_v8 = vsel %vm959_vm2, %v1656_v7, %v1660_v59  ;;  %v1659_v41 = vsel %vm959_vm2, %v1653_v5, %v1658_v36  ;;  %v1613_v0 = vmul.f32 %v4888_v58, %v4550_v45  ;;  %v1615_v56 = vmul.f32 %v4760_v6, %v4888_v58 }
 0x47e   : > { %v1667_v46 = vsel %vm959_vm2, %v1665_v49, %v1666_v26  ;;  %v1664_v7 = vsel %vm959_vm2, %v1662_v15, %v1663_v28  ;;  %v1668_v5 = vrot.slane %v1610_v2, 1  ;;  %v1612_v51 = vmul.f32 %v4888_v58, %v4557_v44 }
 0x47f   : > { %v1675_v59 = vrot.slane %v1613_v0, 1  ;;  %v1676_v36 = vrot.slane %v1615_v56, 1  ;;  %v1617_v14 = vmul.f32 %v4888_v58, %v4570_v62  ;;  %v4986_v56 = vpop.permute.xlu0 %1531 }
 0x480   : > { %1692 = vrot.lane.b32.xlu1 %v1657_v34, %s3795_s9  ;;  %1690 = vrot.lane.b32.xlu0 %v1654_v32, %s3795_s9  ;;  %v1670_v34 = vrot.slane %v1611_v10, 1  ;;  %v1614_v32 = vmul.f32 %v4769_v25, %v4888_v58  ;;  %v1669_v49 = vsel %vm959_vm2, %v1663_v28, %v1668_v5  ;;  %v1672_v15 = vrot.slane %v1612_v51, 1  ;;  %6954 = vst [vmem:[#allocation124_spill] sm:$0xff] %v4986_v56 }
 0x481   : > { %v1677_v2 = vsel %vm959_vm2, %v1675_v59, %v1676_v36 }
 0x482   : > { %v1673_v10 = vrot.slane %v1614_v32, 1 }
 0x484   : > { %1696 = vrot.lane.b32.xlu1 %v1661_v8, %s3795_s9  ;;  %1694 = vrot.lane.b32.xlu0 %v1659_v41, %s3795_s9  ;;  %v1671_v41 = vsel %vm959_vm2, %v1666_v26, %v1670_v34  ;;  %v1616_v8 = vmul.f32 %v4888_v58, %v4407_v30  ;;  %v1674_v26 = vsel %vm959_vm2, %v1672_v15, %v1673_v10  ;;  %v3442_v58 = vld [vmem:[%s6786_s1 + $0xe] ss:$0 sm:$0xff] }
 0x486   : > { %v1678_v34 = vrot.slane %v1616_v8, 1 }
 0x488   : > { %1700 = vrot.lane.b32.xlu1 %v1667_v46, %s3795_s9  ;;  %1698 = vrot.lane.b32.xlu0 %v1664_v7, %s3795_s9  ;;  %v1680_v46 = vrot.slane %v1617_v14, 1  ;;  %v1679_v0 = vsel %vm959_vm2, %v1673_v10, %v1678_v34  ;;  %v4988_v7 = vpop.permute.xlu0 %1535 }
 0x48a   : > { %v1681_v28 = vsel %vm959_vm2, %v1676_v36, %v1680_v46 }
 0x48c   : > { %1704 = vrot.lane.b32.xlu1 %v1671_v41, %s3795_s9  ;;  %1702 = vrot.lane.b32.xlu0 %v1669_v49, %s3795_s9  ;;  %v4990_v5 = vpop.permute.xlu0 %1539 }
 0x490   : > { %1708 = vrot.lane.b32.xlu1 %v1677_v2, %s3795_s9  ;;  %1706 = vrot.lane.b32.xlu0 %v1674_v26, %s3795_s9  ;;  %v4992_v51 = vpop.permute.xlu0 %1543 }
 0x491   : > { %6955 = vst [vmem:[#allocation125_spill] sm:$0xff] %v4992_v51 }
 0x494   : > { %1712 = vrot.lane.b32.xlu1 %v1681_v28, %s3795_s9  ;;  %1710 = vrot.lane.b32.xlu0 %v1679_v0, %s3795_s9  ;;  %v4994_v32 = vpop.permute.xlu0 %1547 }
 0x495   : > { %6956 = vst [vmem:[#allocation126_spill] sm:$0xff] %v4994_v32 }
 0x498   : > { %1744 = vrot.lane.b32.xlu0 %v3442_v58, %s3793_s5  ;;  %v4996_v41 = vpop.permute.xlu0 %1551 }
 0x499   : > { %6957 = vst [vmem:[#allocation127_spill] sm:$0xff] %v4996_v41 }
 0x49c   : > { %v4998_v59 = vpop.permute.xlu0 %1555 }
 0x49d   : > { %6958 = vst [vmem:[#allocation128_spill] sm:$0xff] %v4998_v59 }
 0x4a0   : > { %v5000_v36 = vpop.permute.xlu0 %1559 }
 0x4ea   : > { %v5002_v14 = vpop.permute.xlu0 %1682 }
 0x4eb   : > { %6959 = vst [vmem:[#allocation129_spill] sm:$0xff] %v5002_v14 }
 0x4ee   : > { %v5004_v49 = vpop.permute.xlu0 %1686 }
 0x4ef   : > { %6960 = vst [vmem:[#allocation130_spill] sm:$0xff] %v5004_v49 }
 0x4f2   : > { %v5006_v15 = vpop.permute.xlu0 %1690 }
 0x4f3   : > { %6961 = vst [vmem:[#allocation131_spill] sm:$0xff] %v5006_v15 }
 0x4f6   : > { %v5008_v10 = vpop.permute.xlu0 %1694 }
 0x4f7   : > { %6962 = vst [vmem:[#allocation132_spill] sm:$0xff] %v5008_v10 }
 0x4fa   : > { %v5010_v8 = vpop.permute.xlu0 %1698 }
 0x4fb   : > { %6963 = vst [vmem:[#allocation133_spill] sm:$0xff] %v5010_v8 }
 0x4fe   : > { %v5012_v2 = vpop.permute.xlu0 %1702 }
 0x4ff   : > { %6964 = vst [vmem:[#allocation134_spill] sm:$0xff] %v5012_v2 }
 0x502   : > { %v5014_v26 = vpop.permute.xlu0 %1706 }
 0x503   : > { %6965 = vst [vmem:[#allocation135_spill] sm:$0xff] %v5014_v26 }
 0x506   : > { %v5016_v46 = vpop.permute.xlu0 %1710 }
 0x50a   : > { %v5018_v34 = vpop.permute.xlu0 %1744 }
 0x50b   : > { %v1748_v28 = vmul.f32 %v5018_v34, %v4455_v19  ;;  %v1750_v0 = vmul.f32 %v4911_v3, %v5018_v34  ;;  %v1747_v58 = vmul.f32 %v5018_v34, %v4475_v53  ;;  %v1749_v14 = vmul.f32 %v4920_v9, %v5018_v34 }
 0x50c   : > { %v1752_v56 = vmul.f32 %v5018_v34, %v4493_v22  ;;  %v1751_v26 = vmul.f32 %v5018_v34, %v4501_v42  ;;  %v1754_v59 = vmul.f32 %v5018_v34, %v4510_v35  ;;  %v1756_v53 = vmul.f32 %v4742_v37, %v5018_v34 }
 0x50d   : > { %v1798_v2 = vrot.slane %v1748_v28, 1  ;;  %v1799_v8 = vrot.slane %v1750_v0, 1  ;;  %v1795_v10 = vrot.slane %v1747_v58, 1  ;;  %v1796_v15 = vrot.slane %v1749_v14, 1 }
 0x50e   : > { %v1803_v19 = vrot.slane %v1752_v56, 1  ;;  %v1801_v49 = vrot.slane %v1751_v26, 1  ;;  %v1753_v22 = vmul.f32 %v5018_v34, %v4515_v23  ;;  %v1755_v42 = vmul.f32 %v4749_v18, %v5018_v34 }
 0x50f   : > { %v1800_v41 = vsel %vm959_vm2, %v1798_v2, %v1799_v8  ;;  %v1797_v32 = vsel %vm959_vm2, %v1795_v10, %v1796_v15  ;;  %v1808_v26 = vrot.slane %v1754_v59, 1  ;;  %v1809_v28 = vrot.slane %v1756_v53, 1 }
 0x510   : > { %1837 = vrot.lane.b32.xlu0 %v1800_v41, %s3795_s9  ;;  %1835 = vrot.lane.b32.xlu1 %v1797_v32, %s3795_s9  ;;  %v1804_v56 = vsel %vm959_vm2, %v1799_v8, %v1803_v19  ;;  %v1802_v14 = vsel %vm959_vm2, %v1796_v15, %v1801_v49  ;;  %v1805_v0 = vrot.slane %v1753_v22, 1  ;;  %v1806_v2 = vrot.slane %v1755_v42, 1 }
 0x511   : > { %v1758_v10 = vmul.f32 %v5018_v34, %v4530_v47  ;;  %v1757_v58 = vmul.f32 %v5018_v34, %v4543_v20  ;;  %v1810_v32 = vsel %vm959_vm2, %v1808_v26, %v1809_v28  ;;  %v1760_v41 = vmul.f32 %v5018_v34, %v4550_v45 }
 0x512   : > { %v1762_v59 = vmul.f32 %v4760_v6, %v5018_v34  ;;  %v1759_v49 = vmul.f32 %v5018_v34, %v4557_v44  ;;  %v1807_v15 = vsel %vm959_vm2, %v1805_v0, %v1806_v2  ;;  %v1761_v53 = vmul.f32 %v4769_v25, %v5018_v34 }
 0x513   : > { %v1813_v8 = vrot.slane %v1758_v10, 1  ;;  %v1811_v19 = vrot.slane %v1757_v58, 1  ;;  %v1818_v22 = vrot.slane %v1760_v41, 1  ;;  %v1763_v10 = vmul.f32 %v5018_v34, %v4407_v30 }
 0x514   : > { %1841 = vrot.lane.b32.xlu0 %v1804_v56, %s3795_s9  ;;  %1839 = vrot.lane.b32.xlu1 %v1802_v14, %s3795_s9  ;;  %v1819_v42 = vrot.slane %v1762_v59, 1  ;;  %v1815_v56 = vrot.slane %v1759_v49, 1  ;;  %v1764_v14 = vmul.f32 %v5018_v34, %v4570_v62  ;;  %v1816_v0 = vrot.slane %v1761_v53, 1 }
 0x515   : > { %v1814_v26 = vsel %vm959_vm2, %v1809_v28, %v1813_v8  ;;  %v1812_v51 = vsel %vm959_vm2, %v1806_v2, %v1811_v19  ;;  %v1766_v41 = vmul.f32 %v5018_v34, %v4663_v31  ;;  %v1768_v59 = vmul.f32 %v4787_v52, %v5018_v34 }
 0x516   : > { %v1820_v58 = vsel %vm959_vm2, %v1818_v22, %v1819_v42  ;;  %v1817_v28 = vsel %vm959_vm2, %v1815_v56, %v1816_v0  ;;  %v1821_v2 = vrot.slane %v1763_v10, 1  ;;  %v1765_v49 = vmul.f32 %v5018_v34, %v4668_v50 }
 0x517   : > { %v1767_v30 = vmul.f32 %v4795_v16, %v5018_v34  ;;  %v1829_v8 = vrot.slane %v1768_v59, 1  ;;  %v1770_v19 = vmul.f32 %v5018_v34, %v4681_v21 }
 0x518   : > { %1845 = vrot.lane.b32.xlu0 %v1810_v32, %s3795_s9  ;;  %1843 = vrot.lane.b32.xlu1 %v1807_v15, %s3795_s9  ;;  %v1823_v32 = vrot.slane %v1764_v14, 1  ;;  %v1828_v15 = vrot.slane %v1766_v41, 1  ;;  %v1822_v53 = vsel %vm959_vm2, %v1816_v0, %v1821_v2  ;;  %v1825_v22 = vrot.slane %v1765_v49, 1 }
 0x519   : > { %v1826_v56 = vrot.slane %v1767_v30, 1  ;;  %v1769_v14 = vmul.f32 %v5018_v34, %v4461_v61  ;;  %v1833_v10 = vrot.slane %v1770_v19, 1  ;;  %v3443_v61 = vld [vmem:[%s6786_s1 + $0x17] ss:$0 sm:$0xff]  ;;  %v5104_v34 = vpop.permute.xlu1 %1684 }
 0x51a   : > { %6966 = vst [vmem:[#allocation136_spill] sm:$0xff] %v5104_v34 }
 0x51b   : > { %v1834_v0 = vsel %vm959_vm2, %v1829_v8, %v1833_v10 }
 0x51c   : > { %1849 = vrot.lane.b32.xlu0 %v1814_v26, %s3795_s9  ;;  %1847 = vrot.lane.b32.xlu1 %v1812_v51, %s3795_s9  ;;  %v1824_v51 = vsel %vm959_vm2, %v1819_v42, %v1823_v32  ;;  %v1830_v26 = vsel %vm959_vm2, %v1828_v15, %v1829_v8  ;;  %v1827_v42 = vsel %vm959_vm2, %v1825_v22, %v1826_v56 }
 0x51d   : > { %v5106_v41 = vpop.permute.xlu1 %1688 }
 0x520   : > { %1853 = vrot.lane.b32.xlu0 %v1820_v58, %s3795_s9  ;;  %1851 = vrot.lane.b32.xlu1 %v1817_v28, %s3795_s9  ;;  %v1831_v58 = vrot.slane %v1769_v14, 1 }
 0x521   : > { %v5108_v59 = vpop.permute.xlu1 %1692 }
 0x522   : > { %v1832_v32 = vsel %vm959_vm2, %v1826_v56, %v1831_v58 }
 0x524   : > { %1857 = vrot.lane.b32.xlu0 %v1824_v51, %s3795_s9  ;;  %1855 = vrot.lane.b32.xlu1 %v1822_v53, %s3795_s9 }
 0x525   : > { %v5110_v28 = vpop.permute.xlu1 %1696 }
 0x528   : > { %1861 = vrot.lane.b32.xlu0 %v1830_v26, %s3795_s9  ;;  %1859 = vrot.lane.b32.xlu1 %v1827_v42, %s3795_s9 }
 0x529   : > { %v5112_v2 = vpop.permute.xlu1 %1700 }
 0x52c   : > { %1865 = vrot.lane.b32.xlu0 %v1834_v0, %s3795_s9  ;;  %1863 = vrot.lane.b32.xlu1 %v1832_v32, %s3795_s9 }
 0x52d   : > { %v5114_v49 = vpop.permute.xlu1 %1704 }
 0x530   : > { %1897 = vrot.lane.b32.xlu1 %v3443_v61, %s3793_s5 }
 0x531   : > { %v5116_v30 = vpop.permute.xlu1 %1708 }
 0x535   : > { %v5118_v51 = vpop.permute.xlu1 %1712 }
 0x582   : > { %v5120_v15 = vpop.permute.xlu1 %1835 }
 0x583   : > { %6967 = vst [vmem:[#allocation137_spill] sm:$0xff] %v5120_v15 }
 0x586   : > { %v5122_v8 = vpop.permute.xlu1 %1839 }
 0x587   : > { %6968 = vst [vmem:[#allocation138_spill] sm:$0xff] %v5122_v8 }
 0x58a   : > { %v5124_v19 = vpop.permute.xlu1 %1843 }
 0x58b   : > { %6969 = vst [vmem:[#allocation139_spill] sm:$0xff] %v5124_v19 }
 0x58e   : > { %v5126_v53 = vpop.permute.xlu1 %1847 }
 0x58f   : > { %6970 = vst [vmem:[#allocation140_spill] sm:$0xff] %v5126_v53 }
 0x592   : > { %v5128_v22 = vpop.permute.xlu1 %1851 }
 0x593   : > { %6971 = vst [vmem:[#allocation141_spill] sm:$0xff] %v5128_v22 }
 0x596   : > { %v5130_v56 = vpop.permute.xlu1 %1855 }
 0x597   : > { %6972 = vst [vmem:[#allocation142_spill] sm:$0xff] %v5130_v56 }
 0x59a   : > { %v5132_v14 = vpop.permute.xlu1 %1859 }
 0x59b   : > { %6973 = vst [vmem:[#allocation143_spill] sm:$0xff] %v5132_v14 }
 0x59e   : > { %v5134_v26 = vpop.permute.xlu1 %1863 }
 0x5a2   : > { %v5136_v42 = vpop.permute.xlu1 %1897 }
 0x5a3   : > { %v1901_v10 = vmul.f32 %v5136_v42, %v4510_v35  ;;  %v1903_v58 = vmul.f32 %v4742_v37, %v5136_v42  ;;  %v1900_v0 = vmul.f32 %v5136_v42, %v4515_v23  ;;  %v1902_v32 = vmul.f32 %v4749_v18, %v5136_v42 }
 0x5a4   : > { %v1905_v61 = vmul.f32 %v5136_v42, %v4530_v47  ;;  %v1904_v15 = vmul.f32 %v5136_v42, %v4543_v20  ;;  %v1907_v19 = vmul.f32 %v5136_v42, %v4550_v45  ;;  %v1909_v23 = vmul.f32 %v4760_v6, %v5136_v42 }
 0x5a5   : > { %v1951_v34 = vrot.slane %v1901_v10, 1  ;;  %v1952_v14 = vrot.slane %v1903_v58, 1  ;;  %v1948_v56 = vrot.slane %v1900_v0, 1  ;;  %v1949_v22 = vrot.slane %v1902_v32, 1 }
 0x5a6   : > { %v1956_v35 = vrot.slane %v1905_v61, 1  ;;  %v1954_v53 = vrot.slane %v1904_v15, 1  ;;  %v1906_v20 = vmul.f32 %v5136_v42, %v4557_v44  ;;  %v1908_v10 = vmul.f32 %v4769_v25, %v5136_v42  ;;  %v5167_v61 = vld [vmem:[%s3922_s23 + $0xb0] sm:$0x1] }
 0x5a7   : > { %v1953_v8 = vsel %vm959_vm2, %v1951_v34, %v1952_v14  ;;  %v1950_v47 = vsel %vm959_vm2, %v1948_v56, %v1949_v22  ;;  %v1961_v58 = vrot.slane %v1907_v19, 1  ;;  %v1962_v0 = vrot.slane %v1909_v23, 1 }
 0x5a8   : > { %1990 = vrot.lane.b32.xlu1 %v1953_v8, %s3795_s9  ;;  %1988 = vrot.lane.b32.xlu0 %v1950_v47, %s3795_s9  ;;  %v1957_v15 = vsel %vm959_vm2, %v1952_v14, %v1956_v35  ;;  %v1955_v45 = vsel %vm959_vm2, %v1949_v22, %v1954_v53  ;;  %v1958_v32 = vrot.slane %v1906_v20, 1  ;;  %v1959_v34 = vrot.slane %v1908_v10, 1 }
 0x5a9   : > { %v1911_v56 = vmul.f32 %v5136_v42, %v4570_v62  ;;  %v1910_v44 = vmul.f32 %v5167_v61, %v5136_v42  ;;  %v1963_v8 = vsel %vm959_vm2, %v1961_v58, %v1962_v0  ;;  %v1913_v19 = vmul.f32 %v5136_v42, %v4663_v31 }
 0x5aa   : > { %v1915_v53 = vmul.f32 %v4787_v52, %v5136_v42  ;;  %v1912_v62 = vmul.f32 %v5136_v42, %v4668_v50  ;;  %v1960_v22 = vsel %vm959_vm2, %v1958_v32, %v1959_v34  ;;  %v1914_v23 = vmul.f32 %v4795_v16, %v5136_v42 }
 0x5ab   : > { %v1966_v14 = vrot.slane %v1911_v56, 1  ;;  %v1964_v35 = vrot.slane %v1910_v44, 1  ;;  %v1971_v47 = vrot.slane %v1913_v19, 1  ;;  %v1917_v52 = vmul.f32 %v5136_v42, %v4681_v21 }
 0x5ac   : > { %1994 = vrot.lane.b32.xlu1 %v1957_v15, %s3795_s9  ;;  %1992 = vrot.lane.b32.xlu0 %v1955_v45, %s3795_s9  ;;  %v1972_v31 = vrot.slane %v1915_v53, 1  ;;  %v1968_v20 = vrot.slane %v1912_v62, 1  ;;  %v1969_v15 = vrot.slane %v1914_v23, 1  ;;  %v5190_v45 = vld [vmem:[%s3922_s23 + $0xe0] sm:$0x1]  ;;  %v1919_v21 = vmul.f32 %v5136_v42, %v4808_v29 }
 0x5ad   : > { %v1967_v10 = vsel %vm959_vm2, %v1962_v0, %v1966_v14  ;;  %v1965_v50 = vsel %vm959_vm2, %v1959_v34, %v1964_v35  ;;  %v1916_v58 = vmul.f32 %v5190_v45, %v5136_v42  ;;  %v1976_v56 = vrot.slane %v1917_v52, 1  ;;  %v3567_v23 = vld [vmem:[%s3922_s23 + $0x110] sm:$0x1] }
 0x5ae   : > { %v1973_v32 = vsel %vm959_vm2, %v1971_v47, %v1972_v31  ;;  %v1921_v0 = vmul.f32 %v4819_v38, %v5136_v42  ;;  %v1970_v34 = vsel %vm959_vm2, %v1968_v20, %v1969_v15  ;;  %v1920_v19 = vmul.f32 %v4827_v12, %v5136_v42 }
 0x5af   : > { %v1974_v44 = vrot.slane %v1916_v58, 1  ;;  %v1977_v53 = vsel %vm959_vm2, %v1972_v31, %v1976_v56  ;;  %v1981_v62 = vrot.slane %v1919_v21, 1  ;;  %v1923_v38 = vmul.f32 %v5136_v42, %v4832_v11 }
 0x5b0   : > { %1998 = vrot.lane.b32.xlu1 %v1963_v8, %s3795_s9  ;;  %1996 = vrot.lane.b32.xlu0 %v1960_v22, %s3795_s9  ;;  %v1918_v8 = vmul.f32 %v5136_v42, %v4813_v40  ;;  %v1982_v29 = vrot.slane %v1921_v0, 1  ;;  %v1979_v35 = vrot.slane %v1920_v19, 1  ;;  %v1922_v40 = vmul.f32 %v3567_v23, %v5136_v42  ;;  %v3447_v42 = vld [vmem:[%s6786_s1 + $0x7] ss:$0 sm:$0xff] }
 0x5b1   : > { %v1975_v22 = vsel %vm959_vm2, %v1969_v15, %v1974_v44  ;;  %v1986_v20 = vrot.slane %v1923_v38, 1  ;;  %v1262_v23 = vsel %vm395_vm0, %v4608_v4, %v4719_v55  ;;  %v1568_v4 = vsel %vm395_vm0, %v4886_v60, %v5000_v36 }
 0x5b2   : > { %v1978_v14 = vrot.slane %v1918_v8, 1  ;;  %v1983_v47 = vsel %vm959_vm2, %v1981_v62, %v1982_v29  ;;  %v1984_v52 = vrot.slane %v1922_v40, 1  ;;  %v1415_v40 = vsel %vm395_vm0, %v4735_v17, %v4870_v43 }
 0x5b3   : > { %v1987_v11 = vsel %vm959_vm2, %v1982_v29, %v1986_v20 }
 0x5b4   : > { %2002 = vrot.lane.b32.xlu1 %v1967_v10, %s3795_s9  ;;  %2000 = vrot.lane.b32.xlu0 %v1965_v50, %s3795_s9  ;;  %v1980_v31 = vsel %vm959_vm2, %v1978_v14, %v1979_v35  ;;  %v1985_v10 = vsel %vm959_vm2, %v1979_v35, %v1984_v52  ;;  %v5228_v50 = vpop.permute.xlu0 %1837 }
 0x5b5   : > { %6974 = vst [vmem:[#allocation144_spill] sm:$0xff] %v5228_v50  ;;  %v2045_v50 = vld [vmem:[%s3922_s23 + $0x8] sm:$0xfc] }
 0x5b8   : > { %2006 = vrot.lane.b32.xlu1 %v1973_v32, %s3795_s9  ;;  %2004 = vrot.lane.b32.xlu0 %v1970_v34, %s3795_s9  ;;  %v5230_v15 = vpop.permute.xlu0 %1841 }
 0x5bc   : > { %2010 = vrot.lane.b32.xlu1 %v1977_v53, %s3795_s9  ;;  %2008 = vrot.lane.b32.xlu0 %v1975_v22, %s3795_s9  ;;  %v5232_v58 = vpop.permute.xlu0 %1845 }
 0x5c0   : > { %2014 = vrot.lane.b32.xlu1 %v1983_v47, %s3795_s9  ;;  %2012 = vrot.lane.b32.xlu0 %v1980_v31, %s3795_s9  ;;  %v5234_v32 = vpop.permute.xlu0 %1849  ;;  %v1278_v47 = vadd.f32 %v1262_v23, %v4552_v27  ;;  %v5272_v31 = vld [vmem:[%s6786_s1 + $0x6] ss:$0 sm:$0xff]  ;;  %v1721_v27 = vsel %vm687_vm1, %v5016_v46, %v5118_v51 }
 0x5c1   : > { %v5291_v43 = vmul.f32 %v4769_v25, %v5272_v31 }
 0x5c2   : > { %v1431_v17 = vadd.f32 %v1415_v40, %v1278_v47 }
 0x5c3   : > { %6989 = vst [vmem:[#allocation159_spill] sm:$0xff] %v5291_v43  ;;  %v6797_v46 = vrot.slane %v5291_v43, 2 }
 0x5c4   : > { %2018 = vrot.lane.b32.xlu1 %v1987_v11, %s3795_s9  ;;  %2016 = vrot.lane.b32.xlu0 %v1985_v10, %s3795_s9  ;;  %v5236_v56 = vpop.permute.xlu0 %1853  ;;  %v5279_v11 = vld [vmem:[%s3922_s23 + $0xb0] sm:$0x3]  ;;  %v1584_v10 = vadd.f32 %v1568_v4, %v1431_v17 }
 0x5c5   : > { %v2084_v55 = vmul.f32 %v5272_v31, %v5279_v11 }
 0x5c6   : > { %v1737_v40 = vadd.f32 %v1721_v27, %v1584_v10 }
 0x5c7   : > { %v2116_v23 = vrot.slane %v2084_v55, 2 }
 0x5c8   : > { %2270 = vrot.lane.b32.xlu0 %v3447_v42, %s3792_s12  ;;  %v5238_v21 = vpop.permute.xlu0 %1857 }
 0x5c9   : > { %6975 = vst [vmem:[#allocation145_spill] sm:$0xff] %v5238_v21  ;;  %v2117_v4 = vsel %vm2097_vm3, %v6797_v46, %v2116_v23 }
 0x5cc   : > { %v5240_v0 = vpop.permute.xlu0 %1861 }
 0x5cd   : > { %6976 = vst [vmem:[#allocation146_spill] sm:$0xff] %v5240_v0 }
 0x5d0   : > { %v1866_v34 = vpop.permute.xlu0 %1865 }
 0x5d1   : > { %v1874_v36 = vsel %vm687_vm1, %v5134_v26, %v1866_v34  ;;  %v2044_v26 = vld [vmem:[%s3922_s23] sm:$0xfc]  ;;  %v5308_v34 = vld [vmem:[%s3922_s23 + $0x20] sm:$0x3] }
 0x5d2   : > { %v1890_v51 = vadd.f32 %v1874_v36, %v1737_v40  ;;  %v5321_v40 = vld [vmem:[%s3922_s23 + $0x38] sm:$0xfc] }
 0x61a   : > { %v5242_v44 = vpop.permute.xlu1 %1990  ;;  %v5244_v8 = vpop.permute.xlu0 %1988 }
 0x61b   : > { %6977 = vst [vmem:[#allocation147_spill] sm:$0xff] %v5242_v44  ;;  %6978 = vst [vmem:[#allocation148_spill] sm:$0xff] %v5244_v8 }
 0x61e   : > { %v5246_v19 = vpop.permute.xlu1 %1994  ;;  %v5248_v53 = vpop.permute.xlu0 %1992 }
 0x61f   : > { %6979 = vst [vmem:[#allocation149_spill] sm:$0xff] %v5246_v19  ;;  %6980 = vst [vmem:[#allocation150_spill] sm:$0xff] %v5248_v53  ;;  %v7086_v19 = vld [vmem:[#allocation82_spill] sm:$0xff] }
 0x622   : > { %v5250_v62 = vpop.permute.xlu1 %1998  ;;  %v5252_v29 = vpop.permute.xlu0 %1996 }
 0x623   : > { %6981 = vst [vmem:[#allocation151_spill] sm:$0xff] %v5250_v62  ;;  %6982 = vst [vmem:[#allocation152_spill] sm:$0xff] %v5252_v29 }
 0x626   : > { %v5254_v38 = vpop.permute.xlu1 %2002  ;;  %v5256_v22 = vpop.permute.xlu0 %2000 }
 0x627   : > { %6983 = vst [vmem:[#allocation153_spill] sm:$0xff] %v5254_v38  ;;  %6984 = vst [vmem:[#allocation154_spill] sm:$0xff] %v5256_v22  ;;  %v5371_v22 = vld [vmem:[%s3922_s23 + $0x50] sm:$0x3] }
 0x628   : > { %6997 = vst [vmem:[#allocation167_spill] sm:$0xff] %v5371_v22 }
 0x62a   : > { %v5258_v14 = vpop.permute.xlu1 %2006  ;;  %v5260_v35 = vpop.permute.xlu0 %2004 }
 0x62b   : > { %6985 = vst [vmem:[#allocation155_spill] sm:$0xff] %v5258_v14  ;;  %6986 = vst [vmem:[#allocation156_spill] sm:$0xff] %v5260_v35 }
 0x62e   : > { %v5274_v20 = vpop.permute.xlu1 %2010  ;;  %v5276_v52 = vpop.permute.xlu0 %2008 }
 0x62f   : > { %6987 = vst [vmem:[#allocation157_spill] sm:$0xff] %v5274_v20  ;;  %6988 = vst [vmem:[#allocation158_spill] sm:$0xff] %v5276_v52  ;;  %v5342_v52 = vld [vmem:[%s3922_s23 + $0x30] sm:$0xfc] }
 0x630   : > { %6994 = vst [vmem:[#allocation164_spill] sm:$0xff] %v5342_v52 }
 0x632   : > { %v5293_v42 = vpop.permute.xlu1 %2014  ;;  %v5295_v60 = vpop.permute.xlu0 %2012 }
 0x633   : > { %6990 = vst [vmem:[#allocation160_spill] sm:$0xff] %v5293_v42  ;;  %6991 = vst [vmem:[#allocation161_spill] sm:$0xff] %v5295_v60  ;;  %v2047_v60 = vld [vmem:[%s3922_s23 + $0x28] sm:$0x3]  ;;  %v2066_v42 = vld [vmem:[%s3922_s23 + $0x110] sm:$0x3] }
 0x636   : > { %v2019_v47 = vpop.permute.xlu1 %2018  ;;  %v2017_v8 = vpop.permute.xlu0 %2016 }
 0x637   : > { %v2027_v17 = vsel %vm687_vm1, %v2017_v8, %v2019_v47 }
 0x638   : > { %v2043_v44 = vadd.f32 %v2027_v17, %v1890_v51  ;;  %v5329_v51 = vld [vmem:[%s3922_s23 + $0xe0] sm:$0x3] }
 0x63a   : > { %v5310_v55 = vadd.f32 %v2117_v4, %v2043_v44  ;;  %v5312_v27 = vpop.permute.xlu0 %2270  ;;  %v5326_v44 = vld [vmem:[%s6786_s1 + $0xf] ss:$0 sm:$0xff] }
 0x63b   : > { %v2274_v10 = vmul.f32 %v5312_v27, %v2045_v50  ;;  %v2276_v36 = vmul.f32 %v4893_v13, %v5312_v27  ;;  %v2273_v23 = vmul.f32 %v5312_v27, %v2044_v26  ;;  %v2275_v8 = vmul.f32 %v4900_v48, %v5312_v27  ;;  %6992 = vst [vmem:[#allocation162_spill] sm:$0xff] %v5326_v44 }
 0x63c   : > { %v2278_v50 = vmul.f32 %v5312_v27, %v2047_v60  ;;  %v2277_v47 = vmul.f32 %v5312_v27, %v5308_v34  ;;  %v5336_v13 = vmul.f32 %v4795_v16, %v5326_v44  ;;  %v2150_v48 = vmul.f32 %v5326_v44, %v5329_v51 }
 0x63d   : > { %v2324_v4 = vrot.slane %v2274_v10, 2  ;;  %v2325_v17 = vrot.slane %v2276_v36, 2  ;;  %v2321_v26 = vrot.slane %v2273_v23, 2  ;;  %v2322_v46 = vrot.slane %v2275_v8, 2  ;;  %v5357_v8 = vld [vmem:[%s6786_s1 + $0x18] ss:$0 sm:$0xff] }
 0x63e   : > { %6993 = vst [vmem:[#allocation163_spill] sm:$0xff] %v5336_v13  ;;  %v2329_v20 = vrot.slane %v2278_v50, 2  ;;  %v2327_v60 = vrot.slane %v2277_v47, 2  ;;  %v2280_v43 = vmul.f32 %v5312_v27, %v5321_v40  ;;  %v2282_v16 = vmul.f32 %v4911_v3, %v5312_v27  ;;  %6995 = vst [vmem:[#allocation165_spill] sm:$0xff] %v5357_v8  ;;  %v5362_v50 = vld [vmem:[%s3922_s23 + $0x58] sm:$0x3] }
 0x63f   : > { %v2326_v35 = vsel %vm2097_vm3, %v2324_v4, %v2325_v17  ;;  %v2323_v10 = vsel %vm2097_vm3, %v2321_v26, %v2322_v46  ;;  %v2279_v36 = vmul.f32 %v5312_v27, %v5342_v52  ;;  %v2281_v23 = vmul.f32 %v4920_v9, %v5312_v27 }
 0x640   : > { %2363 = vrot.lane.b32.xlu0 %v2326_v35, %s3794_s24  ;;  %2361 = vrot.lane.b32.xlu1 %v2323_v10, %s3794_s24  ;;  %v2215_v47 = vmul.f32 %v5357_v8, %v2066_v42  ;;  %v5368_v26 = vmul.f32 %v4827_v12, %v5357_v8  ;;  %v2181_v14 = vrot.slane %v2150_v48, 2  ;;  %v2330_v38 = vsel %vm2097_vm3, %v2325_v17, %v2329_v20  ;;  %v5380_v12 = vld [vmem:[%s3922_s23 + $0x68] sm:$0xfc]  ;;  %v5385_v48 = vld [vmem:[%s3922_s23 + $0x60] sm:$0xfc] }
 0x641   : > { %v2328_v35 = vsel %vm2097_vm3, %v2322_v46, %v2327_v60  ;;  %v2334_v29 = vrot.slane %v2280_v43, 2  ;;  %v2335_v10 = vrot.slane %v2282_v16, 2  ;;  %v2331_v62 = vrot.slane %v2279_v36, 2  ;;  %6998 = vst [vmem:[#allocation168_spill] sm:$0xff] %v5385_v48 }
 0x642   : > { %6996 = vst [vmem:[#allocation166_spill] sm:$0xff] %v5368_v26  ;;  %v2332_v0 = vrot.slane %v2281_v23, 2  ;;  %v2284_v42 = vmul.f32 %v5312_v27, %v5362_v50  ;;  %v2283_v4 = vmul.f32 %v5312_v27, %v5371_v22  ;;  %v2246_v20 = vrot.slane %v2215_v47, 2  ;;  %v5400_v23 = vld [vmem:[%s3922_s23 + $0x88] sm:$0x3] }
 0x643   : > { %v6803_v43 = vrot.slane %v5368_v26, 2  ;;  %v6999_v46 = vrot.slane %v5336_v13, 2  ;;  %v2286_v60 = vmul.f32 %v5312_v27, %v5380_v12  ;;  %v2288_v16 = vmul.f32 %v4742_v37, %v5312_v27 }
 0x644   : > { %2367 = vrot.lane.b32.xlu0 %v2330_v38, %s3794_s24  ;;  %2365 = vrot.lane.b32.xlu1 %v2328_v35, %s3794_s24  ;;  %v2285_v38 = vmul.f32 %v5312_v27, %v5385_v48  ;;  %v2287_v36 = vmul.f32 %v4749_v18, %v5312_v27  ;;  %v2336_v47 = vsel %vm2097_vm3, %v2334_v29, %v2335_v10  ;;  %v5413_v29 = vld [vmem:[%s3922_s23 + $0x80] sm:$0x3] }
 0x645   : > { %v2182_v17 = vsel %vm2097_vm3, %v6999_v46, %v2181_v14  ;;  %v2333_v35 = vsel %vm2097_vm3, %v2331_v62, %v2332_v0  ;;  %v2339_v14 = vrot.slane %v2284_v42, 2  ;;  %v2337_v46 = vrot.slane %v2283_v4, 2  ;;  %7000 = vst [vmem:[#allocation169_spill] sm:$0xff] %v5413_v29 }
 0x646   : > { %v2247_v37 = vsel %vm2097_vm3, %v6803_v43, %v2246_v20  ;;  %v2290_v18 = vmul.f32 %v5312_v27, %v5400_v23  ;;  %v2198_v13 = vadd.f32 %v2182_v17, %v5310_v55  ;;  %v2344_v62 = vrot.slane %v2286_v60, 2  ;;  %v5420_v20 = vld [vmem:[%s3922_s23 + $0x98] sm:$0xfc]  ;;  %v5425_v55 = vld [vmem:[%s3922_s23 + $0x90] sm:$0xfc] }
 0x647   : > { %v2345_v8 = vrot.slane %v2288_v16, 2  ;;  %v2341_v42 = vrot.slane %v2285_v38, 2  ;;  %v2342_v4 = vrot.slane %v2287_v36, 2  ;;  %v2289_v26 = vmul.f32 %v5312_v27, %v5413_v29  ;;  %7001 = vst [vmem:[#allocation170_spill] sm:$0xff] %v5420_v20  ;;  %7002 = vst [vmem:[#allocation171_spill] sm:$0xff] %v5425_v55 }
 0x648   : > { %2371 = vrot.lane.b32.xlu0 %v2336_v47, %s3794_s24  ;;  %2369 = vrot.lane.b32.xlu1 %v2333_v35, %s3794_s24  ;;  %v2340_v47 = vsel %vm2097_vm3, %v2335_v10, %v2339_v14  ;;  %v2338_v35 = vsel %vm2097_vm3, %v2332_v0, %v2337_v46  ;;  %v2263_v43 = vadd.f32 %v2247_v37, %v2198_v13  ;;  %v2349_v60 = vrot.slane %v2290_v18, 2  ;;  %v5438_v14 = vld [vmem:[%s3922_s23 + $0xb8] sm:$0x3] }
 0x649   : > { %v2346_v17 = vsel %vm2097_vm3, %v2344_v62, %v2345_v8  ;;  %v2292_v10 = vmul.f32 %v5312_v27, %v5420_v20  ;;  %v2294_v0 = vmul.f32 %v4760_v6, %v5312_v27  ;;  %v2343_v16 = vsel %vm2097_vm3, %v2341_v42, %v2342_v4 }
 0x64a   : > { %v2347_v38 = vrot.slane %v2289_v26, 2  ;;  %v2291_v13 = vmul.f32 %v5312_v27, %v5425_v55  ;;  %v2293_v36 = vmul.f32 %v4769_v25, %v5312_v27  ;;  %v2350_v46 = vsel %vm2097_vm3, %v2345_v8, %v2349_v60 }
 0x64b   : > { %v2354_v37 = vrot.slane %v2292_v10, 2  ;;  %v2355_v18 = vrot.slane %v2294_v0, 2  ;;  %v2296_v6 = vmul.f32 %v5312_v27, %v5438_v14  ;;  %v2295_v25 = vmul.f32 %v5312_v27, %v5279_v11  ;;  %v3448_v27 = vld [vmem:[%s6786_s1 + $0x10] ss:$0 sm:$0xff] }
 0x64c   : > { %2375 = vrot.lane.b32.xlu0 %v2340_v47, %s3794_s24  ;;  %2373 = vrot.lane.b32.xlu1 %v2338_v35, %s3794_s24  ;;  %v2348_v26 = vsel %vm2097_vm3, %v2342_v4, %v2347_v38  ;;  %v2351_v62 = vrot.slane %v2291_v13, 2  ;;  %v2352_v42 = vrot.slane %v2293_v36, 2 }
 0x64d   : > { %v2356_v47 = vsel %vm2097_vm3, %v2354_v37, %v2355_v18  ;;  %v2359_v35 = vrot.slane %v2296_v6, 2 }
 0x64e   : > { %v2353_v8 = vsel %vm2097_vm3, %v2351_v62, %v2352_v42 }
 0x64f   : > { %v2360_v4 = vsel %vm2097_vm3, %v2355_v18, %v2359_v35 }
 0x650   : > { %2379 = vrot.lane.b32.xlu0 %v2346_v17, %s3794_s24  ;;  %2377 = vrot.lane.b32.xlu1 %v2343_v16, %s3794_s24  ;;  %v2357_v17 = vrot.slane %v2295_v25, 2 }
 0x652   : > { %v2358_v60 = vsel %vm2097_vm3, %v2352_v42, %v2357_v17 }
 0x654   : > { %2383 = vrot.lane.b32.xlu0 %v2350_v46, %s3794_s24  ;;  %2381 = vrot.lane.b32.xlu1 %v2348_v26, %s3794_s24 }
 0x658   : > { %2387 = vrot.lane.b32.xlu0 %v2356_v47, %s3794_s24  ;;  %2385 = vrot.lane.b32.xlu1 %v2353_v8, %s3794_s24 }
 0x65c   : > { %2391 = vrot.lane.b32.xlu0 %v2360_v4, %s3794_s24  ;;  %2389 = vrot.lane.b32.xlu1 %v2358_v60, %s3794_s24 }
 0x660   : > { %2423 = vrot.lane.b32.xlu1 %v3448_v27, %s3792_s12 }
 0x6b2   : > { %v5462_v10 = vpop.permute.xlu0 %2363  ;;  %v5464_v0 = vpop.permute.xlu1 %2361 }
 0x6b3   : > { %7003 = vst [vmem:[#allocation172_spill] sm:$0xff] %v5462_v10  ;;  %7004 = vst [vmem:[#allocation173_spill] sm:$0xff] %v5464_v0 }
 0x6b6   : > { %v5466_v16 = vpop.permute.xlu0 %2367  ;;  %v5468_v38 = vpop.permute.xlu1 %2365 }
 0x6b7   : > { %7005 = vst [vmem:[#allocation174_spill] sm:$0xff] %v5466_v16  ;;  %7006 = vst [vmem:[#allocation175_spill] sm:$0xff] %v5468_v38 }
 0x6ba   : > { %v2372_v13 = vpop.permute.xlu0 %2371  ;;  %v2370_v36 = vpop.permute.xlu1 %2369 }
 0x6bb   : > { %v5471_v46 = vsel %vm395_vm0, %v2370_v36, %v2372_v13 }
 0x6bc   : > { %7007 = vst [vmem:[#allocation176_spill] sm:$0xff] %v5471_v46 }
 0x6be   : > { %v2376_v37 = vpop.permute.xlu0 %2375  ;;  %v2374_v18 = vpop.permute.xlu1 %2373 }
 0x6bf   : > { %v5474_v6 = vsel %vm395_vm0, %v2374_v18, %v2376_v37 }
 0x6c0   : > { %7008 = vst [vmem:[#allocation177_spill] sm:$0xff] %v5474_v6 }
 0x6c2   : > { %v2380_v26 = vpop.permute.xlu0 %2379  ;;  %v2378_v62 = vpop.permute.xlu1 %2377 }
 0x6c3   : > { %v5477_v42 = vsel %vm395_vm0, %v2378_v62, %v2380_v26 }
 0x6c4   : > { %7009 = vst [vmem:[#allocation178_spill] sm:$0xff] %v5477_v42 }
 0x6c6   : > { %v2384_v25 = vpop.permute.xlu0 %2383  ;;  %v2382_v47 = vpop.permute.xlu1 %2381 }
 0x6c7   : > { %v5480_v8 = vsel %vm395_vm0, %v2382_v47, %v2384_v25 }
 0x6c8   : > { %7010 = vst [vmem:[#allocation179_spill] sm:$0xff] %v5480_v8 }
 0x6ca   : > { %v2388_v35 = vpop.permute.xlu0 %2387  ;;  %v2386_v17 = vpop.permute.xlu1 %2385 }
 0x6cb   : > { %v5483_v4 = vsel %vm395_vm0, %v2386_v17, %v2388_v35 }
 0x6cc   : > { %7011 = vst [vmem:[#allocation180_spill] sm:$0xff] %v5483_v4 }
 0x6ce   : > { %v2392_v60 = vpop.permute.xlu0 %2391  ;;  %v2390_v27 = vpop.permute.xlu1 %2389 }
 0x6cf   : > { %v2400_v13 = vsel %vm395_vm0, %v2390_v27, %v2392_v60 }
 0x6d0   : > { %v5486_v36 = vadd.f32 %v2400_v13, %v2263_v43 }
 0x6d2   : > { %7012 = vst [vmem:[#allocation181_spill] sm:$0xff] %v5486_v36  ;;  %v5488_v37 = vpop.permute.xlu1 %2423 }
 0x6d3   : > { %v2427_v18 = vmul.f32 %v5488_v37, %v5321_v40  ;;  %v2429_v26 = vmul.f32 %v4911_v3, %v5488_v37  ;;  %v2426_v62 = vmul.f32 %v5488_v37, %v5342_v52  ;;  %v2428_v25 = vmul.f32 %v4920_v9, %v5488_v37  ;;  %v5505_v3 = vld [vmem:[%s3922_s23 + $0x70] sm:$0xff] }
 0x6d4   : > { %v2431_v47 = vmul.f32 %v5488_v37, %v5362_v50  ;;  %v2430_v43 = vmul.f32 %v5488_v37, %v5371_v22  ;;  %v2432_v40 = vmul.f32 %v5488_v37, %v5385_v48  ;;  %7013 = vst [vmem:[#allocation182_spill] sm:$0xff] %v5505_v3  ;;  %v2434_v13 = vmul.f32 %v5505_v3, %v5488_v37 }
 0x6d5   : > { %v2477_v35 = vrot.slane %v2427_v18, 2  ;;  %v2478_v17 = vrot.slane %v2429_v26, 2  ;;  %v2474_v60 = vrot.slane %v2426_v62, 2  ;;  %v2475_v27 = vrot.slane %v2428_v25, 2 }
 0x6d6   : > { %v2482_v0 = vrot.slane %v2431_v47, 2  ;;  %v2480_v10 = vrot.slane %v2430_v43, 2  ;;  %v2484_v62 = vrot.slane %v2432_v40, 2  ;;  %v2485_v25 = vrot.slane %v2434_v13, 2 }
 0x6d7   : > { %v2479_v9 = vsel %vm2097_vm3, %v2477_v35, %v2478_v17  ;;  %v2476_v50 = vsel %vm2097_vm3, %v2474_v60, %v2475_v27  ;;  %v3449_v35 = vld [vmem:[%s6786_s1 + $0x19] ss:$0 sm:$0xff]  ;;  %v2433_v43 = vmul.f32 %v5488_v37, %v5380_v12  ;;  %v2437_v40 = vmul.f32 %v5488_v37, %v5400_v23 }
 0x6d8   : > { %2516 = vrot.lane.b32.xlu1 %v2479_v9, %s3794_s24  ;;  %2514 = vrot.lane.b32.xlu0 %v2476_v50, %s3794_s24  ;;  %v2483_v18 = vsel %vm2097_vm3, %v2478_v17, %v2482_v0  ;;  %v2481_v26 = vsel %vm2097_vm3, %v2475_v27, %v2480_v10  ;;  %v2486_v47 = vsel %vm2097_vm3, %v2484_v62, %v2485_v25  ;;  %v5524_v60 = vld [vmem:[%s3922_s23 + $0x78] sm:$0xff]  ;;  %v3451_v0 = vld [vmem:[%s6786_s1 + $0x11] ss:$0 sm:$0xff] }
 0x6d9   : > { %7014 = vst [vmem:[#allocation183_spill] sm:$0xff] %v5524_v60  ;;  %v2435_v10 = vmul.f32 %v5524_v60, %v5488_v37  ;;  %v3450_v17 = vld [vmem:[%s6786_s1 + $0x8] ss:$0 sm:$0xff]  ;;  %v2487_v27 = vrot.slane %v2433_v43, 2  ;;  %v2436_v13 = vmul.f32 %v5488_v37, %v5413_v29  ;;  %v3452_v9 = vld [vmem:[%s6786_s1 + $0x1a] ss:$0 sm:$0xff]  ;;  %v2439_v50 = vmul.f32 %v5488_v37, %v5420_v20 }
 0x6da   : > { %v2438_v23 = vmul.f32 %v5488_v37, %v5425_v55  ;;  %v5556_v43 = vld [vmem:[%s3922_s23 + $0xa0] sm:$0xff]  ;;  %v2443_v4 = vmul.f32 %v5488_v37, %v5438_v14  ;;  %v2442_v8 = vmul.f32 %v5488_v37, %v5279_v11  ;;  %v3583_v55 = vld [vmem:[%s3922_s23 + $0xf0] sm:$0xff] }
 0x6db   : > { %v2488_v12 = vrot.slane %v2435_v10, 2  ;;  %7016 = vst [vmem:[#allocation185_spill] sm:$0xff] %v5556_v43  ;;  %v2440_v10 = vmul.f32 %v5556_v43, %v5488_v37  ;;  %v3581_v20 = vld [vmem:[%s3922_s23 + $0xc0] sm:$0xff] }
 0x6dc   : > { %2520 = vrot.lane.b32.xlu1 %v2483_v18, %s3794_s24  ;;  %2518 = vrot.lane.b32.xlu0 %v2481_v26, %s3794_s24  ;;  %v5548_v18 = vld [vmem:[%s3922_s23 + $0xa8] sm:$0xff]  ;;  %v2494_v36 = vrot.slane %v2438_v23, 2  ;;  %v2500_v23 = vrot.slane %v2442_v8, 2 }
 0x6dd   : > { %7015 = vst [vmem:[#allocation184_spill] sm:$0xff] %v5548_v18  ;;  %v2441_v26 = vmul.f32 %v5548_v18, %v5488_v37  ;;  %v2489_v62 = vsel %vm2097_vm3, %v2487_v27, %v2488_v12 }
 0x6e0   : > { %2576 = vrot.lane.b32.xlu1 %v3449_v35, %s3792_s12  ;;  %2522 = vrot.lane.b32.xlu0 %v2486_v47, %s3794_s24  ;;  %v2492_v35 = vrot.slane %v2437_v40, 2  ;;  %v2490_v47 = vrot.slane %v2436_v13, 2  ;;  %v2495_v13 = vrot.slane %v2440_v10, 2 }
 0x6e2   : > { %v2493_v27 = vsel %vm2097_vm3, %v2488_v12, %v2492_v35  ;;  %v2491_v40 = vsel %vm2097_vm3, %v2485_v25, %v2490_v47  ;;  %v5580_v25 = vld [vmem:[%s3922_s23 + $0xd8] sm:$0xff]  ;;  %v2496_v11 = vsel %vm2097_vm3, %v2494_v36, %v2495_v13  ;;  %v5588_v47 = vld [vmem:[%s3922_s23 + $0xd0] sm:$0xff] }
 0x6e3   : > { %7019 = vst [vmem:[#allocation188_spill] sm:$0xff] %v5580_v25  ;;  %v2446_v10 = vmul.f32 %v5588_v47, %v5488_v37 }
 0x6e4   : > { %2882 = vrot.lane.b32.xlu1 %v3451_v0, %s3793_s5  ;;  %2729 = vrot.lane.b32.xlu0 %v3450_v17, %s3793_s5  ;;  %v2497_v0 = vrot.slane %v2439_v50, 2  ;;  %v2498_v17 = vrot.slane %v2441_v26, 2  ;;  %v2502_v50 = vrot.slane %v2443_v4, 2  ;;  %v2447_v26 = vmul.f32 %v5580_v25, %v5488_v37  ;;  %v5593_v4 = vld [vmem:[%s3922_s23 + $0xe8] sm:$0x3] }
 0x6e5   : > { %7020 = vst [vmem:[#allocation189_spill] sm:$0xff] %v5593_v4  ;;  %v2449_v8 = vmul.f32 %v5488_v37, %v5593_v4  ;;  %v2505_v25 = vrot.slane %v2446_v10, 2 }
 0x6e6   : > { %v2499_v14 = vsel %vm2097_vm3, %v2497_v0, %v2498_v17  ;;  %v2503_v0 = vsel %vm2097_vm3, %v2498_v17, %v2502_v50  ;;  %v2508_v36 = vrot.slane %v2447_v26, 2  ;;  %v5617_v26 = vld [vmem:[%s3922_s23 + $0x40] sm:$0xff] }
 0x6e7   : > { %v2512_v50 = vrot.slane %v2449_v8, 2  ;;  %7022 = vst [vmem:[#allocation191_spill] sm:$0xff] %v5617_v26 }
 0x6e8   : > { %2524 = vrot.lane.b32.xlu1 %v2489_v62, %s3794_s24  ;;  %3035 = vrot.lane.b32.xlu0 %v3452_v9, %s3793_s5  ;;  %v5569_v62 = vld [vmem:[%s3922_s23 + $0xc8] sm:$0xfc]  ;;  %v5574_v9 = vld [vmem:[%s3922_s23 + $0xc0] sm:$0xfc] }
 0x6e9   : > { %7017 = vst [vmem:[#allocation186_spill] sm:$0xff] %v5569_v62  ;;  %7018 = vst [vmem:[#allocation187_spill] sm:$0xff] %v5574_v9  ;;  %v2445_v12 = vmul.f32 %v5488_v37, %v5569_v62  ;;  %v2444_v35 = vmul.f32 %v5488_v37, %v5574_v9  ;;  %v2448_v62 = vmul.f32 %v5488_v37, %v5329_v51  ;;  %v3575_v51 = vld [vmem:[%s6786_s1] ss:$0 sm:$0xff] }
 0x6ea   : > { %v2513_v4 = vsel %vm2097_vm3, %v2508_v36, %v2512_v50 }
 0x6eb   : > { %v2504_v42 = vrot.slane %v2444_v35, 2  ;;  %v3579_v35 = vld [vmem:[%s3922_s23 + $0x60] sm:$0xff] }
 0x6ec   : > { %2528 = vrot.lane.b32.xlu1 %v2493_v27, %s3794_s24  ;;  %2526 = vrot.lane.b32.xlu0 %v2491_v40, %s3794_s24  ;;  %v2507_v27 = vrot.slane %v2445_v12, 2  ;;  %v2501_v40 = vsel %vm2097_vm3, %v2495_v13, %v2500_v23  ;;  %v2510_v12 = vrot.slane %v2448_v62, 2  ;;  %v5610_v13 = vld [vmem:[%s3922_s23 + $0x10] sm:$0xff]  ;;  %v268_v8 = vmul.f32 %v3579_v35, %v3575_v51 }
 0x6ed   : > { %7021 = vst [vmem:[#allocation190_spill] sm:$0xff] %v5610_v13  ;;  %v265_v37 = vmul.f32 %v3575_v51, %v5610_v13 }
 0x6ee   : > { %v2509_v17 = vsel %vm2097_vm3, %v2507_v27, %v2508_v36  ;;  %v2511_v6 = vsel %vm2097_vm3, %v2505_v25, %v2510_v12 }
 0x6f0   : > { %2532 = vrot.lane.b32.xlu1 %v2499_v14, %s3794_s24  ;;  %2530 = vrot.lane.b32.xlu0 %v2496_v11, %s3794_s24  ;;  %v2506_v14 = vsel %vm2097_vm3, %v2504_v42, %v2505_v25  ;;  %v3577_v42 = vld [vmem:[%s6786_s1 + $0x9] ss:$0 sm:$0xff]  ;;  %v3578_v11 = vld [vmem:[%s3922_s23 + $0x30] sm:$0xff] }
 0x6f1   : > { %v286_v62 = vmul.f32 %v3577_v42, %v5617_v26  ;;  %v266_v23 = vmul.f32 %v3578_v11, %v3575_v51  ;;  %v287_v10 = vmul.f32 %v3579_v35, %v3577_v42  ;;  %v288_v27 = vmul.f32 %v3577_v42, %v5505_v3  ;;  %v3582_v35 = vld [vmem:[%s6786_s1 + $0x12] ss:$0 sm:$0xff] }
 0x6f2   : > { %v290_v46 = vmul.f32 %v3577_v42, %v5556_v43  ;;  %v291_v11 = vmul.f32 %v3581_v20, %v3577_v42  ;;  %v307_v38 = vmul.f32 %v3582_v35, %v5505_v3  ;;  %v309_v12 = vmul.f32 %v3582_v35, %v5556_v43 }
 0x6f3   : > { %v294_v60 = vadd.f32 %v286_v62, %v265_v37  ;;  %v295_v36 = vadd.f32 %v287_v10, %v266_v23  ;;  %v311_v16 = vmul.f32 %v3582_v35, %v5588_v47  ;;  %v397_v62 = vsel %vm395_vm0, %v4176_v24, %v4132_v54  ;;  %v7025_v54 = vld [vmem:[#allocation27_spill] sm:$0xff] }
 0x6f4   : > { %2536 = vrot.lane.b32.xlu1 %v2503_v0, %s3794_s24  ;;  %2534 = vrot.lane.b32.xlu0 %v2501_v40, %s3794_s24  ;;  %v267_v0 = vmul.f32 %v5617_v26, %v3575_v51  ;;  %v3580_v40 = vld [vmem:[%s3922_s23 + $0x90] sm:$0xff]  ;;  %v398_v23 = vsel %vm395_vm0, %v4180_v33, %v4138_v57 }
 0x6f5   : > { %v270_v18 = vmul.f32 %v3580_v40, %v3575_v51  ;;  %v308_v50 = vmul.f32 %v3582_v35, %v3580_v40  ;;  %v315_v37 = vadd.f32 %v307_v38, %v294_v60  ;;  %v7024_v60 = vld [vmem:[#allocation10_spill] sm:$0xff] }
 0x6f6   : > { %v296_v25 = vadd.f32 %v288_v27, %v267_v0  ;;  %v401_v24 = vsel %vm395_vm0, %v7025_v54, %v7024_v60  ;;  %v7040_v60 = vld [vmem:[#allocation21_spill] sm:$0xff] }
 0x6f7   : > { %v316_v29 = vadd.f32 %v308_v50, %v295_v36  ;;  %v413_v27 = vadd.f32 %v397_v62, %v315_v37  ;;  %v7034_v50 = vld [vmem:[#allocation41_spill] sm:$0xff] }
 0x6f8   : > { %2540 = vrot.lane.b32.xlu1 %v2509_v17, %s3794_s24  ;;  %2538 = vrot.lane.b32.xlu0 %v2506_v14, %s3794_s24  ;;  %v289_v17 = vmul.f32 %v3580_v40, %v3577_v42  ;;  %v269_v14 = vmul.f32 %v3575_v51, %v5505_v3  ;;  %v310_v51 = vmul.f32 %v3582_v35, %v3581_v20  ;;  %v7027_v40 = vld [vmem:[#allocation29_spill] sm:$0xff] }
 0x6f9   : > { %v317_v10 = vadd.f32 %v309_v12, %v296_v25  ;;  %v399_v20 = vsel %vm395_vm0, %v4186_v39, %v4147_v63  ;;  %v414_v33 = vadd.f32 %v398_v23, %v316_v29  ;;  %v7030_v39 = vld [vmem:[#allocation37_spill] sm:$0xff]  ;;  %v7035_v25 = vld [vmem:[#allocation16_spill] sm:$0xff] }
 0x6fa   : > { %v297_v42 = vadd.f32 %v289_v17, %v268_v8  ;;  %v298_v9 = vadd.f32 %v290_v46, %v269_v14  ;;  %v7026_v8 = vld [vmem:[#allocation11_spill] sm:$0xff]  ;;  %v7029_v14 = vld [vmem:[#allocation13_spill] sm:$0xff]  ;;  %v497_v12 = vsel %vm395_vm0, %v7035_v25, %v7034_v50 }
 0x6fb   : > { %v402_v57 = vsel %vm395_vm0, %v7027_v40, %v7026_v8  ;;  %v7028_v17 = vld [vmem:[#allocation35_spill] sm:$0xff]  ;;  %v415_v36 = vadd.f32 %v399_v20, %v317_v10  ;;  %v7041_v54 = vld [vmem:[#allocation45_spill] sm:$0xff] }
 0x6fc   : > { %2544 = vrot.lane.b32.xlu1 %v2513_v4, %s3794_s24  ;;  %2542 = vrot.lane.b32.xlu0 %v2511_v6, %s3794_s24  ;;  %v299_v4 = vadd.f32 %v291_v11, %v270_v18  ;;  %v312_v6 = vmul.f32 %v3583_v55, %v3582_v35  ;;  %v318_v0 = vadd.f32 %v310_v51, %v297_v42  ;;  %v7023_v55 = vld [vmem:[#allocation24_spill] sm:$0xff]  ;;  %v7033_v35 = vld [vmem:[#allocation15_spill] sm:$0xff]  ;;  %v7036_v51 = vld [vmem:[#allocation42_spill] sm:$0xff] }
 0x6fd   : > { %v319_v46 = vadd.f32 %v311_v16, %v298_v9  ;;  %v400_v38 = vsel %vm395_vm0, %v7023_v55, %v4150_v1  ;;  %v494_v63 = vsel %vm395_vm0, %v7029_v14, %v7028_v17  ;;  %v7031_v16 = vld [vmem:[#allocation14_spill] sm:$0xff]  ;;  %v7032_v11 = vld [vmem:[#allocation40_spill] sm:$0xff]  ;;  %v7037_v42 = vld [vmem:[#allocation17_spill] sm:$0xff]  ;;  %v591_v8 = vsel %vm395_vm0, %v7041_v54, %v7040_v60 }
 0x6fe   : > { %v320_v18 = vadd.f32 %v312_v6, %v299_v4  ;;  %v495_v9 = vsel %vm395_vm0, %v7031_v16, %v7030_v39  ;;  %v496_v1 = vsel %vm395_vm0, %v7033_v35, %v7032_v11  ;;  %v498_v29 = vsel %vm395_vm0, %v7037_v42, %v7036_v51  ;;  %v7038_v4 = vld [vmem:[#allocation43_spill] sm:$0xff]  ;;  %v7042_v17 = vld [vmem:[#allocation22_spill] sm:$0xff]  ;;  %v7059_v54 = vld [vmem:[#allocation36_spill] sm:$0xff] }
 0x6ff   : > { %v7039_v6 = vld [vmem:[#allocation19_spill] sm:$0xff]  ;;  %v416_v62 = vadd.f32 %v400_v38, %v318_v0  ;;  %v417_v23 = vadd.f32 %v401_v24, %v319_v46  ;;  %v510_v10 = vadd.f32 %v494_v63, %v413_v27  ;;  %v511_v20 = vadd.f32 %v495_v9, %v414_v33  ;;  %v7043_v14 = vld [vmem:[#allocation46_spill] sm:$0xff]  ;;  %v7047_v38 = vld [vmem:[#allocation48_spill] sm:$0xff] }
 0x700   : > { %v499_v37 = vsel %vm395_vm0, %v7039_v6, %v7038_v4  ;;  %v418_v55 = vadd.f32 %v402_v57, %v320_v18  ;;  %v512_v40 = vadd.f32 %v496_v1, %v415_v36  ;;  %v592_v39 = vsel %vm395_vm0, %v7043_v14, %v7042_v17  ;;  %v7044_v50 = vld [vmem:[#allocation23_spill] sm:$0xff]  ;;  %v7046_v18 = vld [vmem:[#allocation25_spill] sm:$0xff]  ;;  %v7048_v57 = vld [vmem:[#allocation26_spill] sm:$0xff] }
 0x701   : > { %v513_v16 = vadd.f32 %v497_v12, %v416_v62  ;;  %v514_v11 = vadd.f32 %v498_v29, %v417_v23  ;;  %v7045_v25 = vld [vmem:[#allocation47_spill] sm:$0xff]  ;;  %v607_v46 = vadd.f32 %v591_v8, %v510_v10  ;;  %v594_v24 = vsel %vm395_vm0, %v7047_v38, %v7046_v18  ;;  %v7049_v27 = vld [vmem:[#allocation49_spill] sm:$0xff]  ;;  %v7050_v63 = vld [vmem:[#allocation28_spill] sm:$0xff] }
 0x702   : > { %v515_v35 = vadd.f32 %v499_v37, %v418_v55  ;;  %v593_v0 = vsel %vm395_vm0, %v7045_v25, %v7044_v50  ;;  %v595_v33 = vsel %vm395_vm0, %v7049_v27, %v7048_v57  ;;  %v7051_v9 = vld [vmem:[#allocation50_spill] sm:$0xff]  ;;  %v608_v36 = vadd.f32 %v592_v39, %v511_v20  ;;  %v7052_v12 = vld [vmem:[#allocation52_spill] sm:$0xff]  ;;  %v7053_v51 = vld [vmem:[#allocation31_spill] sm:$0xff] }
 0x703   : > { %v596_v1 = vsel %vm395_vm0, %v7051_v9, %v7050_v63  ;;  %v689_v42 = vsel %vm687_vm1, %v7053_v51, %v7052_v12  ;;  %v7054_v29 = vld [vmem:[#allocation53_spill] sm:$0xff]  ;;  %v7056_v37 = vld [vmem:[#allocation54_spill] sm:$0xff]  ;;  %v609_v55 = vadd.f32 %v593_v0, %v512_v40  ;;  %v7058_v60 = vld [vmem:[#allocation55_spill] sm:$0xff]  ;;  %v610_v25 = vadd.f32 %v594_v24, %v513_v16 }
 0x704   : > { %v7055_v4 = vld [vmem:[#allocation33_spill] sm:$0xff]  ;;  %v7057_v62 = vld [vmem:[#allocation34_spill] sm:$0xff]  ;;  %v692_v8 = vsel %vm687_vm1, %v7059_v54, %v7058_v60  ;;  %v7060_v10 = vld [vmem:[#allocation56_spill] sm:$0xff]  ;;  %v611_v18 = vadd.f32 %v595_v33, %v514_v11  ;;  %v612_v38 = vadd.f32 %v596_v1, %v515_v35  ;;  %v705_v0 = vadd.f32 %v689_v42, %v607_v46 }
 0x705   : > { %v690_v6 = vsel %vm687_vm1, %v7055_v4, %v7054_v29  ;;  %v691_v23 = vsel %vm687_vm1, %v7057_v62, %v7056_v37  ;;  %v7061_v17 = vld [vmem:[#allocation38_spill] sm:$0xff]  ;;  %v7062_v14 = vld [vmem:[#allocation57_spill] sm:$0xff]  ;;  %v7063_v39 = vld [vmem:[#allocation39_spill] sm:$0xff]  ;;  %v708_v4 = vadd.f32 %v692_v8, %v610_v25 }
 0x706   : > { %v693_v20 = vsel %vm687_vm1, %v7061_v17, %v7060_v10  ;;  %v694_v50 = vsel %vm687_vm1, %v7063_v39, %v7062_v14  ;;  %v7064_v57 = vld [vmem:[#allocation66_spill] sm:$0xff]  ;;  %v7065_v27 = vld [vmem:[#allocation59_spill] sm:$0xff]  ;;  %v706_v63 = vadd.f32 %v690_v6, %v608_v36  ;;  %v707_v9 = vadd.f32 %v691_v23, %v609_v55  ;;  %v7067_v51 = vld [vmem:[#allocation60_spill] sm:$0xff] }
 0x707   : > { %v786_v40 = vsel %vm687_vm1, %v7065_v27, %v7064_v57  ;;  %v7066_v12 = vld [vmem:[#allocation67_spill] sm:$0xff]  ;;  %v709_v37 = vadd.f32 %v693_v20, %v611_v18  ;;  %v710_v62 = vadd.f32 %v694_v50, %v612_v38  ;;  %v7068_v16 = vld [vmem:[#allocation68_spill] sm:$0xff]  ;;  %v7069_v24 = vld [vmem:[#allocation61_spill] sm:$0xff] }
 0x708   : > { %v787_v29 = vsel %vm687_vm1, %v7067_v51, %v7066_v12  ;;  %v788_v11 = vsel %vm687_vm1, %v7069_v24, %v7068_v16  ;;  %v5723_v35 = vadd.f32 %v786_v40, %v705_v0  ;;  %v7070_v33 = vld [vmem:[#allocation69_spill] sm:$0xff]  ;;  %v7071_v1 = vld [vmem:[#allocation62_spill] sm:$0xff]  ;;  %v7073_v42 = vld [vmem:[#allocation63_spill] sm:$0xff] }
 0x709   : > { %v789_v46 = vsel %vm687_vm1, %v7071_v1, %v7070_v33  ;;  %v7072_v36 = vld [vmem:[#allocation70_spill] sm:$0xff]  ;;  %v3584_v23 = vld [vmem:[%s6786_s1 + $0x3] ss:$0 sm:$0xff]  ;;  %v3585_v55 = vld [vmem:[%s3922_s23 + $0x20] sm:$0x1]  ;;  %v5735_v54 = vadd.f32 %v787_v29, %v706_v63  ;;  %v804_v39 = vadd.f32 %v788_v11, %v707_v9 }
 0x70a   : > { %v790_v6 = vsel %vm687_vm1, %v7073_v42, %v7072_v36  ;;  %v937_v60 = vmul.f32 %v3585_v55, %v3584_v23  ;;  %v3586_v8 = vld [vmem:[%s3922_s23 + $0x30] sm:$0xfe]  ;;  %v939_v17 = vmul.f32 %v3584_v23, %v5617_v26  ;;  %v3587_v20 = vld [vmem:[%s3922_s23 + $0x50] sm:$0x1]  ;;  %v5741_v50 = vmul.f32 %v3584_v23, %v5610_v13  ;;  %v3588_v25 = vld [vmem:[%s3922_s23 + $0x60] sm:$0xfe] }
 0x70b   : > { %v938_v10 = vmul.f32 %v3586_v8, %v3584_v23  ;;  %v940_v14 = vmul.f32 %v3587_v20, %v3584_v23  ;;  %v941_v18 = vmul.f32 %v3588_v25, %v3584_v23  ;;  %v942_v38 = vmul.f32 %v3584_v23, %v5505_v3  ;;  %v3589_v40 = vld [vmem:[%s3922_s23 + $0x80] sm:$0x1]  ;;  %v3590_v63 = vld [vmem:[%s6786_s1 + $0xc] ss:$0 sm:$0xff]  ;;  %v7075_v51 = vld [vmem:[#allocation71_spill] sm:$0xff] }
 0x70c   : > { %7074 = vst [vmem:[#allocation24_spill] sm:$0xff] %v5741_v50  ;;  %v805_v57 = vadd.f32 %v789_v46, %v708_v4  ;;  %v806_v27 = vadd.f32 %v790_v6, %v709_v37  ;;  %v943_v0 = vmul.f32 %v3589_v40, %v3584_v23  ;;  %v1003_v12 = vmul.f32 %v3590_v63, %v3587_v20  ;;  %v7076_v29 = vld [vmem:[#allocation64_spill] sm:$0xff]  ;;  %v3591_v6 = vld [vmem:[%s6786_s1 + $0x15] ss:$0 sm:$0xff] }
 0x70d   : > { %v791_v9 = vsel %vm687_vm1, %v7076_v29, %v7075_v51  ;;  %v963_v16 = vrot.slane %v937_v60, 1  ;;  %v1004_v24 = vmul.f32 %v3590_v63, %v3588_v25  ;;  %v5753_v11 = vmul.f32 %v3590_v63, %v5505_v3  ;;  %v3592_v8 = vld [vmem:[%s3922_s23 + $0x90] sm:$0xfe] }
 0x70e   : > { %v965_v33 = vrot.slane %v938_v10, 1  ;;  %v966_v4 = vrot.slane %v939_v17, 1  ;;  %v968_v37 = vrot.slane %v940_v14, 1  ;;  %v5756_v1 = vmul.f32 %v3590_v63, %v5617_v26 }
 0x70f   : > { %v6817_v46 = vrot.slane %v5741_v50, 1  ;;  %v970_v36 = vrot.slane %v941_v18, 1  ;;  %v971_v42 = vrot.slane %v942_v38, 1  ;;  %v5763_v55 = vmul.f32 %v3591_v6, %v5505_v3 }
 0x710   : > { %7077 = vst [vmem:[#allocation10_spill] sm:$0xff] %v5756_v1  ;;  %v973_v60 = vrot.slane %v943_v0, 1  ;;  %v944_v20 = vmul.f32 %v3592_v8, %v3584_v23  ;;  %v1028_v10 = vrot.slane %v1003_v12, 1  ;;  %v5766_v17 = vmul.f32 %v3591_v6, %v3589_v40 }
 0x711   : > { %v807_v14 = vadd.f32 %v791_v9, %v710_v62  ;;  %v964_v25 = vsel %vm959_vm2, %v6817_v46, %v963_v16  ;;  %v1030_v18 = vrot.slane %v1004_v24, 1  ;;  %v1031_v38 = vrot.slane %v5753_v11, 1  ;;  %v7081_v46 = vld [vmem:[#allocation77_spill] sm:$0xff] }
 0x712   : > { %v967_v51 = vsel %vm959_vm2, %v965_v33, %v966_v4  ;;  %v969_v29 = vsel %vm959_vm2, %v966_v4, %v968_v37  ;;  %v6821_v21 = vrot.slane %v5756_v1, 1  ;;  %v1069_v0 = vmul.f32 %v3592_v8, %v3591_v6  ;;  %v7078_v33 = vld [vmem:[#allocation74_spill] sm:$0xff]  ;;  %v7079_v4 = vld [vmem:[#allocation75_spill] sm:$0xff]  ;;  %v7084_v1 = vld [vmem:[#allocation80_spill] sm:$0xff] }
 0x713   : > { %v972_v23 = vsel %vm959_vm2, %v970_v36, %v971_v42  ;;  %v1070_v62 = vmul.f32 %v3591_v6, %v5556_v43  ;;  %v1006_v9 = vmul.f32 %v3590_v63, %v3589_v40  ;;  %v974_v50 = vsel %vm959_vm2, %v971_v42, %v973_v60  ;;  %v7080_v36 = vld [vmem:[#allocation76_spill] sm:$0xff]  ;;  %v7082_v42 = vld [vmem:[#allocation78_spill] sm:$0xff]  ;;  %v7083_v60 = vld [vmem:[#allocation79_spill] sm:$0xff] }
 0x714   : > { %v975_v16 = vrot.slane %v944_v20, 1  ;;  %v1029_v24 = vsel %vm959_vm2, %v6821_v21, %v1028_v10  ;;  %v1093_v11 = vrot.slane %v5766_v17, 1  ;;  %v883_v37 = vsel %vm687_vm1, %v7079_v4, %v7078_v33  ;;  %v7085_v10 = vld [vmem:[#allocation81_spill] sm:$0xff]  ;;  %v7087_v33 = vld [vmem:[#allocation83_spill] sm:$0xff] }
 0x715   : > { %v884_v12 = vsel %vm687_vm1, %v7081_v46, %v7080_v36  ;;  %v1032_v40 = vsel %vm959_vm2, %v1030_v18, %v1031_v38  ;;  %v1007_v44 = vmul.f32 %v3592_v8, %v3590_v63  ;;  %v885_v20 = vsel %vm687_vm1, %v7083_v60, %v7082_v42  ;;  %v7088_v42 = vld [vmem:[#allocation85_spill] sm:$0xff]  ;;  %v7089_v60 = vld [vmem:[#allocation86_spill] sm:$0xff] }
 0x716   : > { %v886_v17 = vsel %vm687_vm1, %v7085_v10, %v7084_v1  ;;  %v1095_v21 = vrot.slane %v1069_v0, 1  ;;  %v1008_v53 = vmul.f32 %v3590_v63, %v5556_v43  ;;  %v887_v4 = vsel %vm687_vm1, %v7087_v33, %v7086_v19  ;;  %v3593_v0 = vld [vmem:[%s3922_s23 + $0xc0] sm:$0xfe] }
 0x717   : > { %v1096_v3 = vrot.slane %v1070_v62, 1  ;;  %v1033_v46 = vrot.slane %v1006_v9, 1  ;;  %v1009_v18 = vmul.f32 %v3590_v63, %v5167_v61  ;;  %v899_v8 = vadd.f32 %v883_v37, %v5723_v35 }
 0x718   : > { %v900_v36 = vadd.f32 %v884_v12, %v5735_v54  ;;  %v888_v1 = vsel %vm687_vm1, %v7089_v60, %v7088_v42  ;;  %v1010_v10 = vmul.f32 %v3593_v0, %v3590_v63  ;;  %v901_v43 = vadd.f32 %v885_v20, %v804_v39  ;;  %v3594_v12 = vld [vmem:[%s3922_s23 + $0xf0] sm:$0xfe]  ;;  %v7090_v60 = vld [vmem:[#allocation84_spill] sm:$0xff] }
 0x719   : > { %v902_v48 = vadd.f32 %v886_v17, %v805_v57  ;;  %v1071_v22 = vmul.f32 %v3591_v6, %v5167_v61  ;;  %v1035_v19 = vrot.slane %v1007_v44, 1  ;;  %v903_v62 = vadd.f32 %v887_v4, %v806_v27 }
 0x71a   : > { %v1036_v9 = vrot.slane %v1008_v53, 1  ;;  %v1072_v33 = vmul.f32 %v3593_v0, %v3591_v6  ;;  %v1073_v52 = vmul.f32 %v3591_v6, %v5588_v47  ;;  %v904_v35 = vadd.f32 %v888_v1, %v807_v14 }
 0x71b   : > { %v1038_v37 = vrot.slane %v1009_v18, 1  ;;  %v1074_v54 = vmul.f32 %v3591_v6, %v5190_v45  ;;  %v1075_v26 = vmul.f32 %v3594_v12, %v3591_v6  ;;  %v989_v13 = vadd.f32 %v964_v25, %v899_v8 }
 0x71c   : > { %v990_v42 = vadd.f32 %v967_v51, %v900_v36  ;;  %v7091_v63 = vrot.slane %v7090_v60, 1  ;;  %v1040_v57 = vrot.slane %v1010_v10, 1  ;;  %v991_v61 = vadd.f32 %v969_v29, %v901_v43  ;;  %v7092_v36 = vld [vmem:[#allocation87_spill] sm:$0xff]  ;;  %v7097_v10 = vld [vmem:[#allocation97_spill] sm:$0xff] }
 0x71d   : > { %v992_v44 = vadd.f32 %v972_v23, %v902_v48  ;;  %v1034_v53 = vsel %vm959_vm2, %v1031_v38, %v1033_v46  ;;  %v1098_v27 = vrot.slane %v1071_v22, 1  ;;  %v993_v20 = vadd.f32 %v974_v50, %v903_v62  ;;  %v7099_v62 = vld [vmem:[#allocation98_spill] sm:$0xff]  ;;  %v7104_v60 = vld [vmem:[#allocation93_spill] sm:$0xff] }
 0x71e   : > { %v977_v39 = vsel %vm959_vm2, %v975_v16, %v7091_v63  ;;  %v1037_v14 = vsel %vm959_vm2, %v1035_v19, %v1036_v9  ;;  %v1100_v17 = vrot.slane %v1072_v33, 1  ;;  %v1101_v4 = vrot.slane %v1073_v52, 1  ;;  %v7098_v19 = vld [vmem:[#allocation90_spill] sm:$0xff] }
 0x71f   : > { %v994_v45 = vadd.f32 %v977_v39, %v904_v35  ;;  %v1039_v6 = vsel %vm959_vm2, %v1036_v9, %v1038_v37  ;;  %v1103_v25 = vrot.slane %v1074_v54, 1  ;;  %v1105_v51 = vrot.slane %v1075_v26, 1  ;;  %v7100_v9 = vld [vmem:[#allocation91_spill] sm:$0xff]  ;;  %v7102_v37 = vld [vmem:[#allocation92_spill] sm:$0xff] }
 0x720   : > { %v1054_v18 = vadd.f32 %v1029_v24, %v989_v13  ;;  %v1055_v8 = vadd.f32 %v1032_v40, %v990_v42  ;;  %v7093_v16 = vrot.slane %v7092_v36, 1  ;;  %v7094_v48 = vrot.slane %v5763_v55, 1  ;;  %v7095_v24 = vld [vmem:[#allocation88_spill] sm:$0xff]  ;;  %v7101_v35 = vld [vmem:[#allocation99_spill] sm:$0xff] }
 0x721   : > { %v1097_v50 = vsel %vm959_vm2, %v1095_v21, %v1096_v3  ;;  %v1056_v38 = vadd.f32 %v1034_v53, %v991_v61  ;;  %v1057_v29 = vadd.f32 %v1037_v14, %v992_v44  ;;  %v1099_v52 = vsel %vm959_vm2, %v1096_v3, %v1098_v27  ;;  %v7103_v42 = vld [vmem:[#allocation100_spill] sm:$0xff]  ;;  %v7106_v61 = vld [vmem:[#allocation94_spill] sm:$0xff]  ;;  %v7108_v27 = vld [vmem:[#allocation95_spill] sm:$0xff] }
 0x722   : > { %v1042_v43 = vsel %vm959_vm2, %v1040_v57, %v7093_v16  ;;  %v1094_v22 = vsel %vm959_vm2, %v7094_v48, %v1093_v11  ;;  %v1102_v23 = vsel %vm959_vm2, %v1100_v17, %v1101_v4  ;;  %v1058_v46 = vadd.f32 %v1039_v6, %v993_v20  ;;  %v7105_v57 = vld [vmem:[#allocation101_spill] sm:$0xff]  ;;  %v7107_v53 = vld [vmem:[#allocation102_spill] sm:$0xff]  ;;  %v7109_v14 = vld [vmem:[#allocation111_spill] sm:$0xff] }
 0x723   : > { %v1104_v13 = vsel %vm959_vm2, %v1101_v4, %v1103_v25  ;;  %v1059_v26 = vadd.f32 %v1042_v43, %v994_v45  ;;  %v7096_v40 = vrot.slane %v7095_v24, 1  ;;  %v1119_v0 = vadd.f32 %v1094_v22, %v1054_v18  ;;  %v7110_v17 = vld [vmem:[#allocation104_spill] sm:$0xff]  ;;  %v7112_v18 = vld [vmem:[#allocation105_spill] sm:$0xff]  ;;  %v7114_v48 = vld [vmem:[#allocation106_spill] sm:$0xff] }
 0x724   : > { %v1256_v11 = vsel %vm395_vm0, %v7098_v19, %v7097_v10  ;;  %v1120_v21 = vadd.f32 %v1097_v50, %v1055_v8  ;;  %v1257_v3 = vsel %vm395_vm0, %v7100_v9, %v7099_v62  ;;  %v1121_v33 = vadd.f32 %v1099_v52, %v1056_v38  ;;  %v7113_v43 = vld [vmem:[#allocation113_spill] sm:$0xff]  ;;  %v7115_v50 = vld [vmem:[#allocation114_spill] sm:$0xff]  ;;  %v7116_v38 = vld [vmem:[#allocation107_spill] sm:$0xff] }
 0x725   : > { %v1107_v1 = vsel %vm959_vm2, %v1105_v51, %v7096_v40  ;;  %v1258_v54 = vsel %vm395_vm0, %v7102_v37, %v7101_v35  ;;  %v1122_v12 = vadd.f32 %v1102_v23, %v1057_v29  ;;  %v1259_v63 = vsel %vm395_vm0, %v7104_v60, %v7103_v42  ;;  %v7111_v51 = vld [vmem:[#allocation112_spill] sm:$0xff]  ;;  %v7121_v19 = vld [vmem:[#allocation118_spill] sm:$0xff] }
 0x726   : > { %v1123_v39 = vadd.f32 %v1104_v13, %v1058_v46  ;;  %v1260_v44 = vsel %vm395_vm0, %v7106_v61, %v7105_v57  ;;  %v1261_v20 = vsel %vm395_vm0, %v7108_v27, %v7107_v53  ;;  %v1409_v4 = vsel %vm395_vm0, %v7110_v17, %v7109_v14  ;;  %v7117_v13 = vld [vmem:[#allocation115_spill] sm:$0xff]  ;;  %v7118_v24 = vld [vmem:[#allocation108_spill] sm:$0xff] }
 0x727   : > { %v1272_v45 = vadd.f32 %v1256_v11, %v1119_v0  ;;  %v1273_v6 = vadd.f32 %v1257_v3, %v1120_v21  ;;  %v1124_v25 = vadd.f32 %v1107_v1, %v1059_v26  ;;  %v1410_v8 = vsel %vm395_vm0, %v7112_v18, %v7111_v51  ;;  %v7119_v1 = vld [vmem:[#allocation116_spill] sm:$0xff]  ;;  %v7120_v0 = vld [vmem:[#allocation109_spill] sm:$0xff]  ;;  %v7122_v21 = vld [vmem:[#allocation119_spill] sm:$0xff] }
 0x728   : > { %v1274_v36 = vadd.f32 %v1258_v54, %v1121_v33  ;;  %v1275_v16 = vadd.f32 %v1259_v63, %v1122_v12  ;;  %v1411_v22 = vsel %vm395_vm0, %v7114_v48, %v7113_v43  ;;  %v1412_v29 = vsel %vm395_vm0, %v7116_v38, %v7115_v50  ;;  %v7123_v33 = vld [vmem:[#allocation125_spill] sm:$0xff]  ;;  %v7124_v35 = vld [vmem:[#allocation120_spill] sm:$0xff]  ;;  %v7125_v54 = vld [vmem:[#allocation126_spill] sm:$0xff] }
 0x729   : > { %v1276_v52 = vadd.f32 %v1260_v44, %v1123_v39  ;;  %v1277_v23 = vadd.f32 %v1261_v20, %v1124_v25  ;;  %v1425_v46 = vadd.f32 %v1409_v4, %v1272_v45  ;;  %v1413_v26 = vsel %vm395_vm0, %v7118_v24, %v7117_v13  ;;  %v7126_v12 = vld [vmem:[#allocation121_spill] sm:$0xff]  ;;  %v7127_v63 = vld [vmem:[#allocation127_spill] sm:$0xff]  ;;  %v7128_v39 = vld [vmem:[#allocation122_spill] sm:$0xff] }
 0x72a   : > { %v1426_v40 = vadd.f32 %v1410_v8, %v1273_v6  ;;  %v1414_v10 = vsel %vm395_vm0, %v7120_v0, %v7119_v1  ;;  %v1562_v11 = vsel %vm395_vm0, %v7121_v19, %v4988_v7  ;;  %v1563_v62 = vsel %vm395_vm0, %v7122_v21, %v4990_v5  ;;  %v7129_v7 = vld [vmem:[#allocation128_spill] sm:$0xff]  ;;  %v7130_v61 = vld [vmem:[#allocation123_spill] sm:$0xff]  ;;  %v7131_v5 = vld [vmem:[#allocation130_spill] sm:$0xff] }
 0x72b   : > { %v1427_v9 = vadd.f32 %v1411_v22, %v1274_v36  ;;  %v1428_v3 = vadd.f32 %v1412_v29, %v1275_v16  ;;  %v1564_v37 = vsel %vm395_vm0, %v7124_v35, %v7123_v33  ;;  %v1565_v42 = vsel %vm395_vm0, %v7126_v12, %v7125_v54  ;;  %v7132_v17 = vld [vmem:[#allocation131_spill] sm:$0xff]  ;;  %v7133_v25 = vld [vmem:[#allocation132_spill] sm:$0xff]  ;;  %v7134_v18 = vld [vmem:[#allocation133_spill] sm:$0xff] }
 0x72c   : > { %v1429_v60 = vadd.f32 %v1413_v26, %v1276_v52  ;;  %v1566_v57 = vsel %vm395_vm0, %v7128_v39, %v7127_v63  ;;  %v1567_v44 = vsel %vm395_vm0, %v7130_v61, %v7129_v7  ;;  %v1715_v53 = vsel %vm687_vm1, %v7131_v5, %v5106_v41  ;;  %v7135_v43 = vld [vmem:[#allocation134_spill] sm:$0xff]  ;;  %v7138_v29 = vld [vmem:[#allocation139_spill] sm:$0xff]  ;;  %v7147_v54 = vld [vmem:[#allocation149_spill] sm:$0xff] }
 0x72d   : > { %v1430_v27 = vadd.f32 %v1414_v10, %v1277_v23  ;;  %v1578_v20 = vadd.f32 %v1562_v11, %v1425_v46  ;;  %v1579_v14 = vadd.f32 %v1563_v62, %v1426_v40  ;;  %v1716_v4 = vsel %vm687_vm1, %v7132_v17, %v5108_v59  ;;  %v7136_v59 = vld [vmem:[#allocation135_spill] sm:$0xff]  ;;  %v7137_v38 = vld [vmem:[#allocation138_spill] sm:$0xff]  ;;  %v7139_v46 = vld [vmem:[#allocation140_spill] sm:$0xff] }
 0x72e   : > { %v1580_v45 = vadd.f32 %v1564_v37, %v1427_v9  ;;  %v1581_v6 = vadd.f32 %v1565_v42, %v1428_v3  ;;  %v1717_v51 = vsel %vm687_vm1, %v7133_v25, %v5110_v28  ;;  %v1718_v8 = vsel %vm687_vm1, %v7134_v18, %v5112_v2  ;;  %v7143_v11 = vld [vmem:[#allocation164_spill] sm:$0xff]  ;;  %v7146_v3 = vld [vmem:[#allocation182_spill] sm:$0xff]  ;;  %v7150_v39 = vld [vmem:[#allocation145_spill] sm:$0xff] }
 0x72f   : > { %v1582_v36 = vadd.f32 %v1566_v57, %v1429_v60  ;;  %v1583_v16 = vadd.f32 %v1567_v44, %v1430_v27  ;;  %v1731_v41 = vadd.f32 %v1715_v53, %v1578_v20  ;;  %v1719_v48 = vsel %vm687_vm1, %v7135_v43, %v5114_v49  ;;  %v7145_v9 = vld [vmem:[#allocation168_spill] sm:$0xff]  ;;  %v7148_v12 = vld [vmem:[#allocation150_spill] sm:$0xff]  ;;  %v7153_v44 = vld [vmem:[#allocation143_spill] sm:$0xff] }
 0x730   : > { %v1732_v22 = vadd.f32 %v1716_v4, %v1579_v14  ;;  %v1720_v50 = vsel %vm687_vm1, %v7136_v59, %v5116_v30  ;;  %v1868_v28 = vsel %vm687_vm1, %v7137_v38, %v5230_v15  ;;  %v1869_v2 = vsel %vm687_vm1, %v7138_v29, %v5232_v58  ;;  %v7140_v30 = vld [vmem:[#allocation141_spill] sm:$0xff]  ;;  %v7141_v15 = vld [vmem:[#allocation190_spill] sm:$0xff]  ;;  %v7142_v58 = vld [vmem:[#allocation191_spill] sm:$0xff] }
 0x731   : > { %v1733_v52 = vadd.f32 %v1717_v51, %v1580_v45  ;;  %v1734_v23 = vadd.f32 %v1718_v8, %v1581_v6  ;;  %v1870_v13 = vsel %vm687_vm1, %v7139_v46, %v5234_v32  ;;  %v2075_v49 = vmul.f32 %v5272_v31, %v5308_v34  ;;  %v7144_v34 = vld [vmem:[#allocation167_spill] sm:$0xff]  ;;  %v7149_v60 = vld [vmem:[#allocation162_spill] sm:$0xff]  ;;  %v3595_v20 = vld [vmem:[%s6786_s1 + $0x6] ss:$0 sm:$0xff] }
 0x732   : > { %v1735_v24 = vadd.f32 %v1719_v48, %v1582_v36  ;;  %v1871_v26 = vsel %vm687_vm1, %v7140_v30, %v5236_v56  ;;  %v5918_v40 = vmul.f32 %v7141_v15, %v5272_v31  ;;  %v2077_v1 = vmul.f32 %v7142_v58, %v5272_v31  ;;  %v7151_v57 = vld [vmem:[#allocation142_spill] sm:$0xff]  ;;  %v7154_v14 = vld [vmem:[#allocation169_spill] sm:$0xff]  ;;  %v7158_v29 = vld [vmem:[#allocation152_spill] sm:$0xff] }
 0x733   : > { %v1736_v0 = vadd.f32 %v1720_v50, %v1583_v16  ;;  %v1884_v10 = vadd.f32 %v1868_v28, %v1731_v41  ;;  %v1885_v19 = vadd.f32 %v1869_v2, %v1732_v22  ;;  %v2076_v32 = vmul.f32 %v5272_v31, %v7143_v11  ;;  %v7152_v61 = vld [vmem:[#allocation146_spill] sm:$0xff]  ;;  %v7155_v45 = vld [vmem:[#allocation165_spill] sm:$0xff]  ;;  %v7156_v16 = vld [vmem:[#allocation171_spill] sm:$0xff] }
 0x734   : > { %v1886_v21 = vadd.f32 %v1870_v13, %v1733_v52  ;;  %v2078_v62 = vmul.f32 %v5272_v31, %v7144_v34  ;;  %v2079_v56 = vmul.f32 %v5272_v31, %v7145_v9  ;;  %v2080_v33 = vmul.f32 %v7146_v3, %v5272_v31  ;;  %v7157_v28 = vld [vmem:[#allocation151_spill] sm:$0xff] }
 0x735   : > { %v5930_v35 = vadd.f32 %v1871_v26, %v1734_v23  ;;  %v2101_v37 = vrot.slane %v2075_v49, 2  ;;  %v2021_v42 = vsel %vm687_vm1, %v7148_v12, %v7147_v54  ;;  %v2141_v63 = vmul.f32 %v7149_v60, %v7144_v34 }
 0x736   : > { %v1872_v7 = vsel %vm687_vm1, %v7151_v57, %v7150_v39  ;;  %v1873_v5 = vsel %vm687_vm1, %v7153_v44, %v7152_v61  ;;  %v2099_v31 = vrot.slane %v5918_v40, 2  ;;  %v2104_v53 = vrot.slane %v2077_v1, 2  ;;  %v7162_v44 = vld [vmem:[#allocation187_spill] sm:$0xff] }
 0x737   : > { %v2103_v27 = vrot.slane %v2076_v32, 2  ;;  %v2081_v17 = vmul.f32 %v3595_v20, %v7154_v14  ;;  %v5950_v4 = vmul.f32 %v7142_v58, %v7149_v60  ;;  %v2206_v6 = vmul.f32 %v7155_v45, %v7154_v14 }
 0x738   : > { %v2037_v25 = vadd.f32 %v2021_v42, %v1884_v10  ;;  %v2106_v51 = vrot.slane %v2078_v62, 2  ;;  %v2108_v18 = vrot.slane %v2079_v56, 2  ;;  %v2109_v8 = vrot.slane %v2080_v33, 2  ;;  %v7159_v62 = vld [vmem:[#allocation185_spill] sm:$0xff]  ;;  %v7161_v33 = vld [vmem:[#allocation154_spill] sm:$0xff] }
 0x739   : > { %v2102_v36 = vsel %vm2097_vm3, %v2099_v31, %v2101_v37  ;;  %v5958_v41 = vmul.f32 %v3595_v20, %v7156_v16  ;;  %v5962_v43 = vmul.f32 %v7146_v3, %v7155_v45  ;;  %v2166_v48 = vrot.slane %v2141_v63, 2  ;;  %v7160_v56 = vld [vmem:[#allocation153_spill] sm:$0xff]  ;;  %v6005_v63 = vld [vmem:[%s3922_s23 + $0xb0] sm:$0x3] }
 0x73a   : > { %v5964_v22 = vadd.f32 %v1872_v7, %v1735_v24  ;;  %v5966_v59 = vadd.f32 %v1873_v5, %v1736_v0  ;;  %v2142_v50 = vmul.f32 %v7149_v60, %v7145_v9  ;;  %v2143_v38 = vmul.f32 %v7146_v3, %v7149_v60 }
 0x73b   : > { %v2022_v2 = vsel %vm687_vm1, %v7158_v29, %v7157_v28  ;;  %v2111_v52 = vrot.slane %v2081_v17, 2  ;;  %v2164_v23 = vrot.slane %v5950_v4, 2  ;;  %v2231_v46 = vrot.slane %v2206_v6, 2 }
 0x73c   : > { %v2127_v13 = vadd.f32 %v2102_v36, %v2037_v25  ;;  %v2105_v49 = vsel %vm2097_vm3, %v2103_v27, %v2104_v53  ;;  %v2107_v24 = vsel %vm2097_vm3, %v2104_v53, %v2106_v51  ;;  %v2110_v30 = vsel %vm2097_vm3, %v2108_v18, %v2109_v8  ;;  %v7163_v18 = vld [vmem:[#allocation155_spill] sm:$0xff] }
 0x73d   : > { %v2113_v26 = vrot.slane %v5958_v41, 2  ;;  %v2229_v1 = vrot.slane %v5962_v43, 2  ;;  %v2167_v0 = vsel %vm2097_vm3, %v2164_v23, %v2166_v48  ;;  %v2207_v10 = vmul.f32 %v7155_v45, %v7156_v16  ;;  %v7166_v41 = vld [vmem:[#allocation175_spill] sm:$0xff] }
 0x73e   : > { %v2038_v11 = vadd.f32 %v2022_v2, %v1885_v19  ;;  %v2168_v32 = vrot.slane %v2142_v50, 2  ;;  %v2169_v34 = vrot.slane %v2143_v38, 2  ;;  %v2208_v9 = vmul.f32 %v7159_v62, %v7155_v45  ;;  %v6000_v19 = vld [vmem:[%s6786_s1 + $0xf] ss:$0 sm:$0xff] }
 0x73f   : > { %v2023_v37 = vsel %vm687_vm1, %v7161_v33, %v7160_v56  ;;  %v5992_v54 = vsel %vm2097_vm3, %v2109_v8, %v2111_v52  ;;  %v2232_v12 = vsel %vm2097_vm3, %v2229_v1, %v2231_v46  ;;  %v2144_v42 = vmul.f32 %v6000_v19, %v7154_v14  ;;  %v7164_v8 = vld [vmem:[#allocation156_spill] sm:$0xff]  ;;  %v6044_v56 = vld [vmem:[%s3922_s23 + $0xf0] sm:$0xfc] }
 0x740   : > { %v2192_v60 = vadd.f32 %v2167_v0, %v2127_v13  ;;  %v2209_v39 = vmul.f32 %v6005_v63, %v7155_v45  ;;  %v2145_v57 = vmul.f32 %v6000_v19, %v7156_v16  ;;  %v2146_v7 = vmul.f32 %v6000_v19, %v7159_v62  ;;  %v7165_v16 = vld [vmem:[#allocation174_spill] sm:$0xff]  ;;  %v6033_v13 = vld [vmem:[%s3922_s23 + $0xe0] sm:$0x3] }
 0x741   : > { %v2233_v61 = vrot.slane %v2207_v10, 2  ;;  %v2210_v5 = vmul.f32 %v7155_v45, %v7162_v44  ;;  %v6017_v53 = vmul.f32 %v5588_v47, %v7155_v45  ;;  %v2147_v27 = vmul.f32 %v6005_v63, %v6000_v19 }
 0x742   : > { %v2128_v20 = vadd.f32 %v2105_v49, %v2038_v11  ;;  %v2039_v14 = vadd.f32 %v2023_v37, %v1886_v21  ;;  %v2170_v17 = vsel %vm2097_vm3, %v2168_v32, %v2169_v34  ;;  %v2234_v6 = vrot.slane %v2208_v9, 2  ;;  %v6038_v49 = vld [vmem:[%s6786_s1 + $0x18] ss:$0 sm:$0xff] }
 0x743   : > { %v2024_v36 = vsel %vm687_vm1, %v7164_v8, %v7163_v18  ;;  %v2394_v45 = vsel %vm395_vm0, %v7166_v41, %v7165_v16  ;;  %v2171_v48 = vrot.slane %v2144_v42, 2  ;;  %v2257_v21 = vadd.f32 %v2232_v12, %v2192_v60  ;;  %v7167_v12 = vld [vmem:[#allocation159_spill] sm:$0xff] }
 0x744   : > { %v2236_v38 = vrot.slane %v2209_v39, 2  ;;  %v2173_v28 = vrot.slane %v2145_v57, 2  ;;  %v2174_v29 = vrot.slane %v2146_v7, 2  ;;  %v2238_v2 = vrot.slane %v2210_v5, 2  ;;  %v7171_v41 = vld [vmem:[#allocation183_spill] sm:$0xff] }
 0x745   : > { %v2239_v52 = vrot.slane %v6017_v53, 2  ;;  %v2176_v46 = vrot.slane %v2147_v27, 2  ;;  %v2212_v0 = vmul.f32 %v6038_v49, %v6033_v13  ;;  %v2129_v10 = vadd.f32 %v2107_v24, %v2039_v14  ;;  %v7170_v27 = vld [vmem:[#allocation158_spill] sm:$0xff] }
 0x746   : > { %v2040_v11 = vadd.f32 %v2024_v36, %v5930_v35  ;;  %v2410_v32 = vadd.f32 %v2394_v45, %v2257_v21  ;;  %v2193_v9 = vadd.f32 %v2170_v17, %v2128_v20  ;;  %v7168_v42 = vrot.slane %v7167_v12, 2  ;;  %v6074_v36 = vld [vmem:[%s3922_s23 + $0x68] sm:$0xfc] }
 0x747   : > { %v2235_v39 = vsel %vm2097_vm3, %v2233_v61, %v2234_v6  ;;  %v2172_v57 = vsel %vm2097_vm3, %v2169_v34, %v2171_v48  ;;  %v2237_v35 = vsel %vm2097_vm3, %v2234_v6, %v2236_v38  ;;  %v2175_v7 = vsel %vm2097_vm3, %v2173_v28, %v2174_v29  ;;  %v6081_v48 = vld [vmem:[%s3922_s23 + $0x60] sm:$0xfc]  ;;  %v6089_v28 = vld [vmem:[%s3922_s23 + $0x88] sm:$0x3] }
 0x748   : > { %v6049_v60 = vsel %vm2097_vm3, %v2113_v26, %v7168_v42  ;;  %v6058_v5 = vmul.f32 %v6000_v19, %v7162_v44  ;;  %v7169_v26 = vld [vmem:[#allocation157_spill] sm:$0xff]  ;;  %v2240_v34 = vsel %vm2097_vm3, %v2238_v2, %v2239_v52  ;;  %v2241_v20 = vrot.slane %v2212_v0, 2  ;;  %v6094_v2 = vld [vmem:[%s3922_s23 + $0x80] sm:$0x3]  ;;  %v7172_v0 = vld [vmem:[#allocation170_spill] sm:$0xff] }
 0x749   : > { %v2025_v61 = vsel %vm687_vm1, %v7170_v27, %v7169_v26  ;;  %v6068_v14 = vmul.f32 %v6038_v49, %v6044_v56  ;;  %v2130_v17 = vadd.f32 %v2110_v30, %v2040_v11  ;;  %v2258_v6 = vadd.f32 %v2235_v39, %v2193_v9 }
 0x74a   : > { %v2517_v25 = vpop.permute.xlu1 %2516  ;;  %v2515_v51 = vpop.permute.xlu0 %2514  ;;  %v2041_v38 = vadd.f32 %v2025_v61, %v5964_v22  ;;  %v7174_v22 = vld [vmem:[#allocation161_spill] sm:$0xff] }
 0x74b   : > { %v6029_v50 = vsel %vm395_vm0, %v2515_v51, %v2517_v25  ;;  %v2194_v25 = vadd.f32 %v2172_v57, %v2129_v10  ;;  %v2177_v51 = vsel %vm2097_vm3, %v2174_v29, %v2176_v46 }
 0x74e   : > { %v2521_v33 = vpop.permute.xlu1 %2520  ;;  %v2519_v37 = vpop.permute.xlu0 %2518 }
 0x74f   : > { %v2547_v24 = vsel %vm395_vm0, %v2519_v37, %v2521_v33  ;;  %v7173_v33 = vld [vmem:[#allocation160_spill] sm:$0xff] }
 0x750   : > { %v6060_v53 = vadd.f32 %v2547_v24, %v2410_v32  ;;  %v2026_v37 = vsel %vm687_vm1, %v7174_v22, %v7173_v33  ;;  %v7175_v24 = vld [vmem:[#allocation184_spill] sm:$0xff] }
 0x752   : > { %v6071_v18 = vpop.permute.xlu1 %2576  ;;  %v2523_v8 = vpop.permute.xlu0 %2522 }
 0x753   : > { %v2580_v16 = vmul.f32 %v6074_v36, %v6071_v18  ;;  %v2582_v45 = vmul.f32 %v7171_v41, %v6071_v18  ;;  %v2579_v30 = vmul.f32 %v6081_v48, %v6071_v18  ;;  %v2581_v21 = vmul.f32 %v7146_v3, %v6071_v18 }
 0x754   : > { %v2584_v29 = vmul.f32 %v6089_v28, %v6071_v18  ;;  %v2583_v46 = vmul.f32 %v6094_v2, %v6071_v18  ;;  %v2586_v10 = vmul.f32 %v6071_v18, %v7172_v0  ;;  %v2588_v26 = vmul.f32 %v7175_v24, %v6071_v18 }
 0x755   : > { %v2630_v11 = vrot.slane %v2580_v16, 2  ;;  %v2631_v32 = vrot.slane %v2582_v45, 2  ;;  %v2627_v9 = vrot.slane %v2579_v30, 2  ;;  %v2628_v3 = vrot.slane %v2581_v21, 2  ;;  %v6112_v16 = vld [vmem:[%s3922_s23 + $0x90] sm:$0xfc] }
 0x756   : > { %v6103_v12 = vpop.permute.xlu1 %2882  ;;  %v6105_v42 = vpop.permute.xlu0 %2729  ;;  %v2635_v39 = vrot.slane %v2584_v29, 2  ;;  %v2633_v57 = vrot.slane %v2583_v46, 2  ;;  %v2585_v41 = vmul.f32 %v6112_v16, %v6071_v18  ;;  %v2587_v45 = vmul.f32 %v7159_v62, %v6071_v18 }
 0x757   : > { %v2632_v27 = vsel %vm2097_vm3, %v2630_v11, %v2631_v32  ;;  %v2629_v61 = vsel %vm2097_vm3, %v2627_v9, %v2628_v3  ;;  %v2259_v30 = vadd.f32 %v2237_v35, %v2194_v25  ;;  %v2195_v21 = vadd.f32 %v2175_v7, %v2130_v17  ;;  %v7176_v9 = vld [vmem:[#allocation176_spill] sm:$0xff] }
 0x758   : > { %v2242_v29 = vsel %vm2097_vm3, %v2239_v52, %v2241_v20  ;;  %v2178_v46 = vrot.slane %v6058_v5, 2  ;;  %2669 = vrot.lane.b32.xlu1 %v2632_v27, %s3794_s24  ;;  %2667 = vrot.lane.b32.xlu0 %v2629_v61, %s3794_s24  ;;  %v2131_v0 = vadd.f32 %v5992_v54, %v2041_v38  ;;  %v2042_v11 = vadd.f32 %v2026_v37, %v5966_v59  ;;  %v6130_v5 = vld [vmem:[%s3922_s23 + $0xb8] sm:$0x3]  ;;  %v7180_v27 = vld [vmem:[#allocation186_spill] sm:$0xff] }
 0x759   : > { %v2411_v33 = vadd.f32 %v7176_v9, %v2258_v6  ;;  %v2640_v22 = vrot.slane %v2586_v10, 2  ;;  %v2636_v35 = vsel %vm2097_vm3, %v2631_v32, %v2635_v39  ;;  %v2634_v52 = vsel %vm2097_vm3, %v2628_v3, %v2633_v57  ;;  %v7177_v38 = vld [vmem:[#allocation163_spill] sm:$0xff]  ;;  %v7179_v39 = vld [vmem:[#allocation177_spill] sm:$0xff] }
 0x75a   : > { %v2525_v24 = vpop.permute.xlu1 %2524  ;;  %v6125_v62 = vpop.permute.xlu0 %3035  ;;  %v2641_v7 = vrot.slane %v2588_v26, 2  ;;  %v2590_v20 = vmul.f32 %v6130_v5, %v6071_v18  ;;  %v2637_v17 = vrot.slane %v2585_v41, 2  ;;  %v2638_v59 = vrot.slane %v2587_v45, 2 }
 0x75b   : > { %v2548_v54 = vsel %vm395_vm0, %v2523_v8, %v2525_v24  ;;  %v2589_v6 = vmul.f32 %v6005_v63, %v6071_v18  ;;  %v2260_v25 = vadd.f32 %v2240_v34, %v2195_v21  ;;  %v7178_v10 = vrot.slane %v7177_v38, 2 }
 0x75c   : > { %v2243_v3 = vrot.slane %v6068_v14, 2  ;;  %v6141_v37 = vadd.f32 %v2548_v54, %v2411_v33  ;;  %2673 = vrot.lane.b32.xlu1 %v2636_v35, %s3794_s24  ;;  %2671 = vrot.lane.b32.xlu0 %v2634_v52, %s3794_s24  ;;  %v2132_v8 = vadd.f32 %v6049_v60, %v2042_v11  ;;  %v2412_v57 = vadd.f32 %v7179_v39, %v2259_v30  ;;  %v7181_v14 = vld [vmem:[#allocation188_spill] sm:$0xff]  ;;  %v7185_v39 = vld [vmem:[#allocation189_spill] sm:$0xff] }
 0x75d   : > { %v2180_v32 = vsel %vm2097_vm3, %v2178_v46, %v7178_v10  ;;  %v2196_v26 = vadd.f32 %v2177_v51, %v2131_v0  ;;  %v2592_v34 = vmul.f32 %v6071_v18, %v7180_v27  ;;  %v2642_v45 = vsel %vm2097_vm3, %v2640_v22, %v2641_v7  ;;  %v7182_v0 = vld [vmem:[#allocation166_spill] sm:$0xff] }
 0x75e   : > { %v2529_v61 = vpop.permute.xlu1 %2528  ;;  %v2527_v41 = vpop.permute.xlu0 %2526  ;;  %v2645_v21 = vrot.slane %v2590_v20, 2  ;;  %v2594_v46 = vmul.f32 %v7181_v14, %v6071_v18  ;;  %v2591_v9 = vmul.f32 %v6071_v18, %v7162_v44  ;;  %v2639_v60 = vsel %vm2097_vm3, %v2637_v17, %v2638_v59  ;;  %v7184_v44 = vld [vmem:[#allocation178_spill] sm:$0xff] }
 0x75f   : > { %v2549_v33 = vsel %vm395_vm0, %v2527_v41, %v2529_v61  ;;  %v2643_v30 = vrot.slane %v2589_v6, 2  ;;  %v2593_v51 = vmul.f32 %v5588_v47, %v6071_v18  ;;  %v7183_v11 = vrot.slane %v7182_v0, 2  ;;  %v6185_v14 = vld [vmem:[%s3922_s23 + $0x108] sm:$0xff] }
 0x760   : > { %v6161_v24 = vadd.f32 %v2549_v33, %v2412_v57  ;;  %2677 = vrot.lane.b32.xlu1 %v2642_v45, %s3794_s24  ;;  %2675 = vrot.lane.b32.xlu0 %v2639_v60, %s3794_s24  ;;  %v2413_v35 = vadd.f32 %v7184_v44, %v2260_v25  ;;  %v2261_v52 = vadd.f32 %v2242_v29, %v2196_v26  ;;  %v2650_v54 = vrot.slane %v2592_v34, 2  ;;  %v6170_v57 = vld [vmem:[%s3922_s23 + $0xf8] sm:$0xfc] }
 0x761   : > { %v2245_v22 = vsel %vm2097_vm3, %v2243_v3, %v7183_v11  ;;  %v2197_v20 = vadd.f32 %v2180_v32, %v2132_v8  ;;  %v2646_v38 = vsel %vm2097_vm3, %v2641_v7, %v2645_v21  ;;  %v2651_v47 = vrot.slane %v2594_v46, 2  ;;  %v7186_v7 = vld [vmem:[#allocation179_spill] sm:$0xff]  ;;  %v7187_v44 = vld [vmem:[#allocation180_spill] sm:$0xff] }
 0x762   : > { %v2533_v17 = vpop.permute.xlu1 %2532  ;;  %v2531_v6 = vpop.permute.xlu0 %2530  ;;  %v2647_v10 = vrot.slane %v2591_v9, 2  ;;  %v2596_v3 = vmul.f32 %v6071_v18, %v7185_v39  ;;  %v2644_v61 = vsel %vm2097_vm3, %v2638_v59, %v2643_v30  ;;  %v2648_v25 = vrot.slane %v2593_v51, 2  ;;  %v6194_v51 = vld [vmem:[%s3922_s23 + $0x100] sm:$0xff]  ;;  %v6199_v11 = vld [vmem:[%s3922_s23 + $0x118] sm:$0x3] }
 0x763   : > { %v2550_v27 = vsel %vm395_vm0, %v2531_v6, %v2533_v17  ;;  %v2595_v29 = vmul.f32 %v6033_v13, %v6071_v18  ;;  %v2414_v8 = vadd.f32 %v7186_v7, %v2261_v52  ;;  %v2262_v26 = vadd.f32 %v2245_v22, %v2197_v20 }
 0x764   : > { %v6176_v32 = vadd.f32 %v2550_v27, %v2413_v35  ;;  %2681 = vrot.lane.b32.xlu1 %v2646_v38, %s3794_s24  ;;  %2679 = vrot.lane.b32.xlu0 %v2644_v61, %s3794_s24  ;;  %v2598_v34 = vmul.f32 %v6071_v18, %v6170_v57  ;;  %v2652_v45 = vsel %vm2097_vm3, %v2650_v54, %v2651_v47  ;;  %v2655_v21 = vrot.slane %v2596_v3, 2  ;;  %v6212_v61 = vld [vmem:[%s3922_s23 + $0x110] sm:$0x3] }
 0x765   : > { %v2600_v46 = vmul.f32 %v6185_v14, %v6071_v18  ;;  %v2597_v9 = vmul.f32 %v6071_v18, %v6044_v56  ;;  %v2649_v60 = vsel %vm2097_vm3, %v2647_v10, %v2648_v25  ;;  %v2653_v30 = vrot.slane %v2595_v29, 2 }
 0x766   : > { %v2537_v41 = vpop.permute.xlu1 %2536  ;;  %v2535_v59 = vpop.permute.xlu0 %2534  ;;  %v2599_v0 = vmul.f32 %v6194_v51, %v6071_v18  ;;  %v2415_v35 = vadd.f32 %v7187_v44, %v2262_v26  ;;  %v2660_v52 = vrot.slane %v2598_v34, 2  ;;  %v2656_v17 = vsel %vm2097_vm3, %v2651_v47, %v2655_v21  ;;  %v3609_v47 = vld [vmem:[%s3922_s23 + $0x8] sm:$0xfc]  ;;  %v3610_v26 = vld [vmem:[%s3922_s23 + $0x18] sm:$0xff] }
 0x767   : > { %v2551_v33 = vsel %vm395_vm0, %v2535_v59, %v2537_v41  ;;  %v2661_v6 = vrot.slane %v2600_v46, 2  ;;  %v2657_v38 = vrot.slane %v2597_v9, 2  ;;  %v2602_v10 = vmul.f32 %v6071_v18, %v6199_v11 }
 0x768   : > { %v6201_v22 = vadd.f32 %v2551_v33, %v2414_v8  ;;  %2685 = vrot.lane.b32.xlu1 %v2652_v45, %s3794_s24  ;;  %2683 = vrot.lane.b32.xlu0 %v2649_v60, %s3794_s24  ;;  %v2654_v3 = vsel %vm2097_vm3, %v2648_v25, %v2653_v30  ;;  %v2658_v27 = vrot.slane %v2599_v0, 2  ;;  %v2601_v29 = vmul.f32 %v6212_v61, %v6071_v18  ;;  %v6225_v25 = vld [vmem:[%s3922_s23] sm:$0xfc]  ;;  %v3612_v0 = vld [vmem:[%s3922_s23 + $0x28] sm:$0x3] }
 0x769   : > { %v2733_v8 = vmul.f32 %v3609_v47, %v6105_v42  ;;  %v2735_v34 = vmul.f32 %v3610_v26, %v6105_v42  ;;  %v2732_v41 = vmul.f32 %v6225_v25, %v6105_v42  ;;  %v2734_v18 = vmul.f32 %v7141_v15, %v6105_v42 }
 0x76a   : > { %v2541_v20 = vpop.permute.xlu1 %2540  ;;  %v2539_v54 = vpop.permute.xlu0 %2538  ;;  %v2662_v59 = vsel %vm2097_vm3, %v2660_v52, %v2661_v6  ;;  %v2659_v45 = vsel %vm2097_vm3, %v2657_v38, %v2658_v27  ;;  %v2665_v21 = vrot.slane %v2602_v10, 2  ;;  %v2663_v46 = vrot.slane %v2601_v29, 2  ;;  %v3613_v52 = vld [vmem:[%s3922_s23 + $0x20] sm:$0x3]  ;;  %v3614_v10 = vld [vmem:[%s3922_s23 + $0x38] sm:$0xfc] }
 0x76b   : > { %v2552_v39 = vsel %vm395_vm0, %v2539_v54, %v2541_v20  ;;  %v2783_v9 = vrot.slane %v2733_v8, 2  ;;  %v2784_v33 = vrot.slane %v2735_v34, 2  ;;  %v2780_v60 = vrot.slane %v2732_v41, 2  ;;  %v3615_v29 = vld [vmem:[%s3922_s23 + $0x48] sm:$0xff] }
 0x76c   : > { %v6216_v7 = vadd.f32 %v2552_v39, %v2415_v35  ;;  %2689 = vrot.lane.b32.xlu1 %v2656_v17, %s3794_s24  ;;  %2687 = vrot.lane.b32.xlu0 %v2654_v3, %s3794_s24  ;;  %v2781_v30 = vrot.slane %v2734_v18, 2  ;;  %v2737_v15 = vmul.f32 %v3612_v0, %v6105_v42  ;;  %v2666_v44 = vsel %vm2097_vm3, %v2661_v6, %v2665_v21 }
 0x76d   : > { %v2664_v35 = vsel %vm2097_vm3, %v2658_v27, %v2663_v46  ;;  %v2736_v20 = vmul.f32 %v3613_v52, %v6105_v42  ;;  %v2785_v54 = vsel %vm2097_vm3, %v2783_v9, %v2784_v33  ;;  %v2739_v39 = vmul.f32 %v3614_v10, %v6105_v42  ;;  %v6250_v27 = vld [vmem:[%s3922_s23 + $0x30] sm:$0xfc]  ;;  %v3617_v52 = vld [vmem:[%s3922_s23 + $0x58] sm:$0x3] }
 0x76e   : > { %v2782_v17 = vsel %vm2097_vm3, %v2780_v60, %v2781_v30  ;;  %v2788_v38 = vrot.slane %v2737_v15, 2  ;;  %v2741_v6 = vmul.f32 %v3615_v29, %v6105_v42  ;;  %v2738_v47 = vmul.f32 %v6250_v27, %v6105_v42 }
 0x76f   : > { %v2786_v3 = vrot.slane %v2736_v20, 2  ;;  %v2740_v8 = vmul.f32 %v7142_v58, %v6105_v42  ;;  %v2886_v26 = vmul.f32 %v3614_v10, %v6103_v12  ;;  %v2888_v34 = vmul.f32 %v3615_v29, %v6103_v12 }
 0x770   : > { %2693 = vrot.lane.b32.xlu1 %v2662_v59, %s3794_s24  ;;  %2691 = vrot.lane.b32.xlu0 %v2659_v45, %s3794_s24  ;;  %v2885_v41 = vmul.f32 %v6250_v27, %v6103_v12  ;;  %v2887_v18 = vmul.f32 %v7142_v58, %v6103_v12  ;;  %v2789_v59 = vsel %vm2097_vm3, %v2784_v33, %v2788_v38  ;;  %v2793_v45 = vrot.slane %v2739_v39, 2 }
 0x771   : > { %v2787_v21 = vsel %vm2097_vm3, %v2781_v30, %v2786_v3  ;;  %v2794_v46 = vrot.slane %v2741_v6, 2  ;;  %v2790_v9 = vrot.slane %v2738_v47, 2  ;;  %v2791_v60 = vrot.slane %v2740_v8, 2 }
 0x772   : > { %v2936_v0 = vrot.slane %v2886_v26, 2  ;;  %v2937_v15 = vrot.slane %v2888_v34, 2  ;;  %v2890_v58 = vmul.f32 %v3617_v52, %v6103_v12  ;;  %v2743_v39 = vmul.f32 %v3617_v52, %v6105_v42 }
 0x773   : > { %v2795_v33 = vsel %vm2097_vm3, %v2793_v45, %v2794_v46  ;;  %v2792_v20 = vsel %vm2097_vm3, %v2790_v9, %v2791_v60  ;;  %v2892_v26 = vmul.f32 %v6074_v36, %v6103_v12  ;;  %v3620_v45 = vld [vmem:[%s3922_s23 + $0x70] sm:$0xff]  ;;  %v3039_v9 = vmul.f32 %v6074_v36, %v6125_v62 }
 0x774   : > { %2697 = vrot.lane.b32.xlu1 %v2666_v44, %s3794_s24  ;;  %2695 = vrot.lane.b32.xlu0 %v2664_v35, %s3794_s24  ;;  %v2933_v44 = vrot.slane %v2885_v41, 2  ;;  %v2934_v35 = vrot.slane %v2887_v18, 2  ;;  %v2941_v10 = vrot.slane %v2890_v58, 2  ;;  %v2798_v47 = vrot.slane %v2743_v39, 2  ;;  %v3619_v41 = vld [vmem:[%s3922_s23 + $0x78] sm:$0xff] }
 0x775   : > { %v6288_v18 = vmul.f32 %v3619_v41, %v6103_v12  ;;  %v2946_v58 = vrot.slane %v2892_v26, 2  ;;  %v3043_v39 = vmul.f32 %v6089_v28, %v6125_v62  ;;  %v2747_v26 = vmul.f32 %v3619_v41, %v6105_v42 }
 0x776   : > { %v2935_v38 = vsel %vm2097_vm3, %v2933_v44, %v2934_v35  ;;  %v2942_v6 = vsel %vm2097_vm3, %v2937_v15, %v2941_v10  ;;  %v3040_v44 = vmul.f32 %v3620_v45, %v6125_v62 }
 0x778   : > { %2822 = vrot.lane.b32.xlu1 %v2785_v54, %s3795_s9  ;;  %2820 = vrot.lane.b32.xlu0 %v2782_v17, %s3795_s9  ;;  %v3618_v54 = vld [vmem:[%s3922_s23 + $0x50] sm:$0x3]  ;;  %v2938_v17 = vsel %vm2097_vm3, %v2936_v0, %v2937_v15  ;;  %v3041_v0 = vmul.f32 %v3619_v41, %v6125_v62  ;;  %v3038_v15 = vmul.f32 %v6081_v48, %v6125_v62  ;;  %v3087_v10 = vrot.slane %v3040_v44, 2 }
 0x779   : > { %v2889_v30 = vmul.f32 %v3618_v54, %v6103_v12  ;;  %v2742_v3 = vmul.f32 %v3618_v54, %v6105_v42  ;;  %v2804_v41 = vrot.slane %v2747_v26, 2 }
 0x77b   : > { %v2939_v29 = vrot.slane %v2889_v30, 2  ;;  %v2796_v8 = vrot.slane %v2742_v3, 2  ;;  %v3089_v30 = vrot.slane %v3039_v9, 2  ;;  %v3042_v3 = vmul.f32 %v6094_v2, %v6125_v62 }
 0x77c   : > { %2826 = vrot.lane.b32.xlu1 %v2789_v59, %s3795_s9  ;;  %2824 = vrot.lane.b32.xlu0 %v2787_v21, %s3795_s9  ;;  %v2891_v59 = vmul.f32 %v6081_v48, %v6103_v12  ;;  %v6294_v21 = vmul.f32 %v3620_v45, %v6103_v12 }
 0x77d   : > { %v2940_v34 = vsel %vm2097_vm3, %v2934_v35, %v2939_v29  ;;  %v2799_v35 = vsel %vm2097_vm3, %v2794_v46, %v2798_v47  ;;  %v2797_v52 = vsel %vm2097_vm3, %v2791_v60, %v2796_v8  ;;  %v3094_v47 = vrot.slane %v3043_v39, 2 }
 0x77e   : > { %v2944_v54 = vrot.slane %v6294_v21, 2  ;;  %v2745_v8 = vmul.f32 %v6074_v36, %v6105_v42  ;;  %v6330_v21 = vmul.f32 %v6125_v62, %v6199_v11  ;;  %v3044_v39 = vmul.f32 %v6112_v16, %v6125_v62 }
 0x780   : > { %2830 = vrot.lane.b32.xlu1 %v2795_v33, %s3795_s9  ;;  %2828 = vrot.lane.b32.xlu0 %v2792_v20, %s3795_s9  ;;  %v2947_v33 = vrot.slane %v6288_v18, 2  ;;  %v2943_v20 = vrot.slane %v2891_v59, 2  ;;  %v2744_v18 = vmul.f32 %v6081_v48, %v6105_v42  ;;  %v2746_v59 = vmul.f32 %v3620_v45, %v6105_v42 }
 0x781   : > { %v2803_v9 = vrot.slane %v2745_v8, 2  ;;  %v3096_v26 = vrot.slane %v3044_v39, 2 }
 0x782   : > { %v2948_v46 = vsel %vm2097_vm3, %v2946_v58, %v2947_v33  ;;  %v2945_v60 = vsel %vm2097_vm3, %v2943_v20, %v2944_v54  ;;  %v2801_v44 = vrot.slane %v2746_v59, 2  ;;  %v3621_v58 = vld [vmem:[%s3922_s23 + $0x98] sm:$0xfc] }
 0x783   : > { %v2805_v11 = vsel %vm2097_vm3, %v2803_v9, %v2804_v41  ;;  %v3045_v20 = vmul.f32 %v3621_v58, %v6125_v62 }
 0x784   : > { %2975 = vrot.lane.b32.xlu1 %v2938_v17, %s3795_s9  ;;  %2973 = vrot.lane.b32.xlu0 %v2935_v38, %s3795_s9  ;;  %v3090_v17 = vrot.slane %v3041_v0, 2  ;;  %v3086_v38 = vrot.slane %v3038_v15, 2  ;;  %v2896_v0 = vmul.f32 %v6089_v28, %v6103_v12  ;;  %v2800_v15 = vrot.slane %v2744_v18, 2 }
 0x785   : > { %v2748_v18 = vmul.f32 %v6094_v2, %v6105_v42 }
 0x786   : > { %v3091_v29 = vsel %vm2097_vm3, %v3089_v30, %v3090_v17  ;;  %v3095_v36 = vsel %vm2097_vm3, %v3090_v17, %v3094_v47  ;;  %v3622_v30 = vld [vmem:[%s3922_s23 + $0xa8] sm:$0xff]  ;;  %v2749_v47 = vmul.f32 %v6089_v28, %v6105_v42 }
 0x787   : > { %v3047_v17 = vmul.f32 %v3622_v30, %v6125_v62  ;;  %v2900_v9 = vmul.f32 %v3622_v30, %v6103_v12 }
 0x788   : > { %2979 = vrot.lane.b32.xlu1 %v2942_v6, %s3795_s9  ;;  %2977 = vrot.lane.b32.xlu0 %v2940_v34, %s3795_s9  ;;  %v3088_v6 = vsel %vm2097_vm3, %v3086_v38, %v3087_v10  ;;  %v3092_v34 = vrot.slane %v3042_v3, 2  ;;  %v2802_v38 = vsel %vm2097_vm3, %v2800_v15, %v2801_v44 }
 0x78a   : > { %v3093_v45 = vsel %vm2097_vm3, %v3087_v10, %v3092_v34 }
 0x78c   : > { %2834 = vrot.lane.b32.xlu1 %v2799_v35, %s3795_s9  ;;  %2832 = vrot.lane.b32.xlu0 %v2797_v52, %s3795_s9  ;;  %v2895_v35 = vmul.f32 %v6094_v2, %v6103_v12  ;;  %v2951_v52 = vrot.slane %v2896_v0, 2  ;;  %v2806_v0 = vrot.slane %v2748_v18, 2 }
 0x78e   : > { %v2949_v10 = vrot.slane %v2895_v35, 2  ;;  %v2952_v3 = vsel %vm2097_vm3, %v2947_v33, %v2951_v52  ;;  %v2898_v33 = vmul.f32 %v3621_v58, %v6103_v12  ;;  %v2957_v35 = vrot.slane %v2900_v9, 2 }
 0x78f   : > { %v2807_v52 = vsel %vm2097_vm3, %v2801_v44, %v2806_v0  ;;  %v2750_v44 = vmul.f32 %v6112_v16, %v6105_v42 }
 0x790   : > { %2983 = vrot.lane.b32.xlu1 %v2948_v46, %s3795_s9  ;;  %2981 = vrot.lane.b32.xlu0 %v2945_v60, %s3795_s9  ;;  %v3623_v46 = vld [vmem:[%s3922_s23 + $0xa0] sm:$0xff]  ;;  %v2950_v8 = vsel %vm2097_vm3, %v2944_v54, %v2949_v10  ;;  %v2897_v54 = vmul.f32 %v6112_v16, %v6103_v12  ;;  %v2956_v15 = vrot.slane %v2898_v33, 2  ;;  %v3624_v33 = vld [vmem:[%s3922_s23 + $0xc8] sm:$0xfc] }
 0x791   : > { %v3046_v60 = vmul.f32 %v3623_v46, %v6125_v62  ;;  %v2810_v16 = vrot.slane %v2750_v44, 2  ;;  %v3051_v9 = vmul.f32 %v3624_v33, %v6125_v62  ;;  %v2904_v44 = vmul.f32 %v3624_v33, %v6103_v12 }
 0x792   : > { %v2958_v10 = vsel %vm2097_vm3, %v2956_v15, %v2957_v35  ;;  %v3627_v15 = vld [vmem:[%s3922_s23 + $0xd0] sm:$0xff]  ;;  %v3054_v33 = vmul.f32 %v6033_v13, %v6125_v62 }
 0x793   : > { %v3097_v34 = vrot.slane %v3046_v60, 2  ;;  %v2753_v60 = vmul.f32 %v3622_v30, %v6105_v42  ;;  %v2902_v30 = vmul.f32 %v6130_v5, %v6103_v12 }
 0x794   : > { %3128 = vrot.lane.b32.xlu1 %v3091_v29, %s3795_s9  ;;  %3126 = vrot.lane.b32.xlu0 %v3088_v6, %s3795_s9  ;;  %v3099_v29 = vrot.slane %v3045_v20, 2  ;;  %v3100_v6 = vrot.slane %v3047_v17, 2  ;;  %v2953_v20 = vrot.slane %v2897_v54, 2 }
 0x795   : > { %v3098_v28 = vsel %vm2097_vm3, %v3096_v26, %v3097_v34 }
 0x796   : > { %v3101_v59 = vsel %vm2097_vm3, %v3099_v29, %v3100_v6 }
 0x798   : > { %3132 = vrot.lane.b32.xlu1 %v3095_v36, %s3795_s9  ;;  %3130 = vrot.lane.b32.xlu0 %v3093_v45, %s3795_s9  ;;  %v2808_v36 = vrot.slane %v2749_v47, 2  ;;  %v2899_v45 = vmul.f32 %v3623_v46, %v6103_v12  ;;  %v2752_v47 = vmul.f32 %v3623_v46, %v6105_v42  ;;  %v2901_v46 = vmul.f32 %v6005_v63, %v6103_v12 }
 0x79a   : > { %v2809_v2 = vsel %vm2097_vm3, %v2804_v41, %v2808_v36  ;;  %v2954_v17 = vrot.slane %v2899_v45, 2  ;;  %v2751_v41 = vmul.f32 %v3621_v58, %v6105_v42  ;;  %v2814_v58 = vrot.slane %v2753_v60, 2  ;;  %v3626_v45 = vld [vmem:[%s3922_s23 + $0xc0] sm:$0xfc] }
 0x79b   : > { %v2961_v36 = vrot.slane %v2902_v30, 2  ;;  %v2959_v54 = vrot.slane %v2901_v46, 2 }
 0x79c   : > { %2838 = vrot.lane.b32.xlu1 %v2805_v11, %s3795_s9  ;;  %2836 = vrot.lane.b32.xlu0 %v2802_v38, %s3795_s9  ;;  %v3049_v11 = vmul.f32 %v6130_v5, %v6125_v62  ;;  %v3048_v38 = vmul.f32 %v6005_v63, %v6125_v62  ;;  %v2813_v26 = vrot.slane %v2751_v41, 2 }
 0x79e   : > { %v3104_v39 = vrot.slane %v3049_v11, 2  ;;  %v3102_v29 = vrot.slane %v3048_v38, 2  ;;  %v3052_v11 = vmul.f32 %v3627_v15, %v6125_v62 }
 0x7a0   : > { %2987 = vrot.lane.b32.xlu1 %v2952_v3, %s3795_s9  ;;  %2985 = vrot.lane.b32.xlu0 %v2950_v8, %s3795_s9  ;;  %v2955_v3 = vsel %vm2097_vm3, %v2953_v20, %v2954_v17  ;;  %v3105_v8 = vsel %vm2097_vm3, %v3100_v6, %v3104_v39  ;;  %v3103_v18 = vsel %vm2097_vm3, %v3097_v34, %v3102_v29  ;;  %v3109_v20 = vrot.slane %v3051_v9, 2  ;;  %v3629_v9 = vld [vmem:[%s3922_s23] sm:$0xff] }
 0x7a1   : > { %v2815_v6 = vsel %vm2097_vm3, %v2813_v26, %v2814_v58  ;;  %v2960_v39 = vsel %vm2097_vm3, %v2954_v17, %v2959_v54  ;;  %v3107_v60 = vrot.slane %v3052_v11, 2  ;;  %v2966_v26 = vrot.slane %v2904_v44, 2 }
 0x7a2   : > { %v3059_v44 = vmul.f32 %v6185_v14, %v6125_v62 }
 0x7a4   : > { %3136 = vrot.lane.b32.xlu1 %v3101_v59, %s3795_s9  ;;  %3134 = vrot.lane.b32.xlu0 %v3098_v28, %s3795_s9  ;;  %v2811_v59 = vrot.slane %v2752_v47, 2  ;;  %v3625_v28 = vld [vmem:[%s3922_s23 + $0xd8] sm:$0xff] }
 0x7a5   : > { %v6399_v0 = vmul.f32 %v3625_v28, %v6125_v62  ;;  %v2906_v47 = vmul.f32 %v3625_v28, %v6103_v12 }
 0x7a6   : > { %v2812_v34 = vsel %vm2097_vm3, %v2810_v16, %v2811_v59 }
 0x7a7   : > { %v3110_v38 = vrot.slane %v6399_v0, 2  ;;  %v2967_v30 = vrot.slane %v2906_v47, 2  ;;  %v3631_v0 = vld [vmem:[%s3922_s23 + $0x30] sm:$0xff] }
 0x7a8   : > { %2842 = vrot.lane.b32.xlu1 %v2809_v2, %s3795_s9  ;;  %2840 = vrot.lane.b32.xlu0 %v2807_v52, %s3795_s9  ;;  %v3050_v2 = vmul.f32 %v3626_v45, %v6125_v62  ;;  %v2962_v52 = vsel %vm2097_vm3, %v2957_v35, %v2961_v36 }
 0x7a9   : > { %v3111_v35 = vsel %vm2097_vm3, %v3109_v20, %v3110_v38  ;;  %v3633_v20 = vld [vmem:[%s3922_s23 + $0x60] sm:$0xff] }
 0x7aa   : > { %v3106_v41 = vrot.slane %v3050_v2, 2  ;;  %v2968_v2 = vsel %vm2097_vm3, %v2966_v26, %v2967_v30 }
 0x7ac   : > { %2991 = vrot.lane.b32.xlu1 %v2958_v10, %s3795_s9  ;;  %2989 = vrot.lane.b32.xlu0 %v2955_v3, %s3795_s9  ;;  %v2755_v10 = vmul.f32 %v6130_v5, %v6105_v42  ;;  %v2754_v3 = vmul.f32 %v6005_v63, %v6105_v42  ;;  %v3108_v5 = vsel %vm2097_vm3, %v3106_v41, %v3107_v60 }
 0x7ad   : > { %v2905_v63 = vmul.f32 %v3627_v15, %v6103_v12 }
 0x7ae   : > { %v2818_v29 = vrot.slane %v2755_v10, 2  ;;  %v2816_v17 = vrot.slane %v2754_v3, 2  ;;  %v3634_v10 = vld [vmem:[%s6786_s1 + $0x12] ss:$0 sm:$0xff]  ;;  %v6452_v3 = vpop.permute.xlu1 %2544 }
 0x7af   : > { %v2964_v36 = vrot.slane %v2905_v63, 2 }
 0x7b0   : > { %3140 = vrot.lane.b32.xlu1 %v3105_v8, %s3795_s9  ;;  %3138 = vrot.lane.b32.xlu0 %v3103_v18, %s3795_s9  ;;  %v2903_v8 = vmul.f32 %v3626_v45, %v6103_v12  ;;  %v2819_v42 = vsel %vm2097_vm3, %v2814_v58, %v2818_v29  ;;  %v3628_v18 = vld [vmem:[%s3922_s23 + $0xe8] sm:$0x3]  ;;  %v2817_v46 = vsel %vm2097_vm3, %v2811_v59, %v2816_v17  ;;  %v3630_v58 = vld [vmem:[%s6786_s1] ss:$0 sm:$0xff] }
 0x7b1   : > { %v3055_v16 = vmul.f32 %v3628_v18, %v6125_v62  ;;  %v264_v28 = vmul.f32 %v3630_v58, %v3629_v9  ;;  %v3632_v59 = vld [vmem:[%s6786_s1 + $0x9] ss:$0 sm:$0xff]  ;;  %v2908_v54 = vmul.f32 %v3628_v18, %v6103_v12  ;;  %v2907_v45 = vmul.f32 %v6033_v13, %v6103_v12  ;;  %v6454_v13 = vpop.permute.xlu0 %2542  ;;  %v7191_v9 = vld [vmem:[#allocation12_spill] sm:$0xff] }
 0x7b2   : > { %v3057_v29 = vmul.f32 %v6125_v62, %v6170_v57  ;;  %v3056_v17 = vmul.f32 %v6125_v62, %v6044_v56  ;;  %v7189_v57 = vld [vmem:[#allocation9_spill] sm:$0xff] }
 0x7b3   : > { %v3114_v11 = vrot.slane %v3055_v16, 2  ;;  %v2971_v12 = vrot.slane %v2908_v54, 2  ;;  %v3120_v16 = vrot.slane %v3059_v44, 2  ;;  %v3124_v54 = vrot.slane %v6330_v21, 2 }
 0x7b4   : > { %2846 = vrot.lane.b32.xlu1 %v2815_v6, %s3795_s9  ;;  %2844 = vrot.lane.b32.xlu0 %v2812_v34, %s3795_s9  ;;  %v2963_v6 = vrot.slane %v2903_v8, 2  ;;  %v285_v34 = vmul.f32 %v3632_v59, %v3631_v0  ;;  %v3058_v8 = vmul.f32 %v6194_v51, %v6125_v62  ;;  %v3119_v18 = vrot.slane %v3057_v29, 2  ;;  %v7193_v0 = vld [vmem:[#allocation44_spill] sm:$0xff]  ;;  %v7197_v29 = vld [vmem:[#allocation58_spill] sm:$0xff] }
 0x7b5   : > { %v3115_v47 = vsel %vm2097_vm3, %v3110_v38, %v3114_v11  ;;  %v3116_v51 = vrot.slane %v3056_v17, 2  ;;  %v7195_v11 = vld [vmem:[#allocation30_spill] sm:$0xff] }
 0x7b6   : > { %v2965_v15 = vsel %vm2097_vm3, %v2963_v6, %v2964_v36  ;;  %v293_v41 = vadd.f32 %v285_v34, %v264_v28  ;;  %v3060_v6 = vmul.f32 %v6212_v61, %v6125_v62  ;;  %v3121_v62 = vsel %vm2097_vm3, %v3119_v18, %v3120_v16 }
 0x7b8   : > { %2995 = vrot.lane.b32.xlu1 %v2962_v52, %s3795_s9  ;;  %2993 = vrot.lane.b32.xlu0 %v2960_v39, %s3795_s9  ;;  %v3112_v52 = vrot.slane %v3054_v33, 2  ;;  %v306_v39 = vmul.f32 %v3634_v10, %v3633_v20  ;;  %v7190_v33 = vld [vmem:[#allocation32_spill] sm:$0xff] }
 0x7b9   : > { %v493_v58 = vsel %vm395_vm0, %v7191_v9, %v7190_v33  ;;  %v3635_v20 = vld [vmem:[%s6786_s1 + $0x3] ss:$0 sm:$0xff] }
 0x7ba   : > { %v314_v63 = vadd.f32 %v306_v39, %v293_v41  ;;  %v3636_v10 = vld [vmem:[%s3922_s23] sm:$0xfe] }
 0x7bb   : > { %v935_v39 = vmul.f32 %v3636_v10, %v3635_v20  ;;  %v7200_v9 = vld [vmem:[#allocation24_spill] sm:$0xff] }
 0x7bc   : > { %3144 = vrot.lane.b32.xlu1 %v3111_v35, %s3795_s9  ;;  %3142 = vrot.lane.b32.xlu0 %v3108_v5, %s3795_s9  ;;  %v2969_v35 = vrot.slane %v2907_v45, 2  ;;  %v3113_v5 = vsel %vm2097_vm3, %v3107_v60, %v3112_v52  ;;  %v2972_v60 = vsel %vm2097_vm3, %v2967_v30, %v2971_v12  ;;  %v7192_v30 = vld [vmem:[#allocation20_spill] sm:$0xff]  ;;  %v3122_v45 = vrot.slane %v3060_v6, 2 }
 0x7be   : > { %v2970_v56 = vsel %vm2097_vm3, %v2964_v36, %v2969_v35  ;;  %v590_v36 = vsel %vm395_vm0, %v7193_v0, %v7192_v30  ;;  %v7196_v35 = vld [vmem:[#allocation65_spill] sm:$0xff]  ;;  %v3639_v0 = vld [vmem:[%s6786_s1 + $0x15] ss:$0 sm:$0xff] }
 0x7bf   : > { %v785_v44 = vsel %vm687_vm1, %v7197_v29, %v7196_v35 }
 0x7c0   : > { %2850 = vrot.lane.b32.xlu1 %v2819_v42, %s3795_s9  ;;  %2848 = vrot.lane.b32.xlu0 %v2817_v46, %s3795_s9  ;;  %v7188_v42 = vld [vmem:[#allocation18_spill] sm:$0xff]  ;;  %v3117_v46 = vrot.slane %v3058_v8, 2  ;;  %v960_v8 = vrot.slane %v935_v39, 1 }
 0x7c1   : > { %v396_v26 = vsel %vm395_vm0, %v7189_v57, %v7188_v42  ;;  %v7199_v42 = vld [vmem:[#allocation73_spill] sm:$0xff] }
 0x7c2   : > { %v412_v28 = vadd.f32 %v396_v26, %v314_v63  ;;  %v3118_v61 = vsel %vm2097_vm3, %v3116_v51, %v3117_v46  ;;  %v7198_v63 = vld [vmem:[#allocation72_spill] sm:$0xff]  ;;  %v3637_v26 = vld [vmem:[%s6786_s1 + $0xc] ss:$0 sm:$0xff] }
 0x7c3   : > { %v882_v57 = vsel %vm687_vm1, %v7199_v42, %v7198_v63  ;;  %v2553_v42 = vsel %vm395_vm0, %v6454_v13, %v6452_v3 }
 0x7c4   : > { %2999 = vrot.lane.b32.xlu1 %v2968_v2, %s3795_s9  ;;  %2997 = vrot.lane.b32.xlu0 %v2965_v15, %s3795_s9  ;;  %v509_v2 = vadd.f32 %v493_v58, %v412_v28  ;;  %v7194_v15 = vld [vmem:[#allocation51_spill] sm:$0xff]  ;;  %v7201_v58 = vrot.slane %v7200_v9, 1  ;;  %v7210_v9 = vld [vmem:[#allocation124_spill] sm:$0xff] }
 0x7c5   : > { %v688_v52 = vsel %vm687_vm1, %v7195_v11, %v7194_v15 }
 0x7c6   : > { %v606_v41 = vadd.f32 %v590_v36, %v509_v2  ;;  %v962_v28 = vsel %vm959_vm2, %v960_v8, %v7201_v58  ;;  %v3640_v36 = vld [vmem:[%s3922_s23 + $0x60] sm:$0xfe] }
 0x7c7   : > { %v7206_v8 = vld [vmem:[#allocation89_spill] sm:$0xff] }
 0x7c8   : > { %3148 = vrot.lane.b32.xlu1 %v3115_v47, %s3795_s9  ;;  %3146 = vrot.lane.b32.xlu0 %v3113_v5, %s3795_s9  ;;  %v3125_v47 = vsel %vm2097_vm3, %v3120_v16, %v3124_v54  ;;  %v3123_v5 = vsel %vm2097_vm3, %v3117_v46, %v3122_v45  ;;  %v704_v17 = vadd.f32 %v688_v52, %v606_v41  ;;  %v7211_v58 = vld [vmem:[#allocation117_spill] sm:$0xff] }
 0x7ca   : > { %v6471_v14 = vpop.permute.xlu1 %2669  ;;  %v6473_v38 = vpop.permute.xlu0 %2667  ;;  %v801_v18 = vadd.f32 %v785_v44, %v704_v17  ;;  %v7204_v44 = vrot.slane %v5763_v55, 1  ;;  %v7205_v17 = vld [vmem:[#allocation96_spill] sm:$0xff]  ;;  %v7208_v55 = vld [vmem:[#allocation103_spill] sm:$0xff] }
 0x7cb   : > { %v1255_v63 = vsel %vm395_vm0, %v7206_v8, %v7205_v17 }
 0x7cc   : > { %3003 = vrot.lane.b32.xlu1 %v2972_v60, %s3795_s9  ;;  %3001 = vrot.lane.b32.xlu0 %v2970_v56, %s3795_s9  ;;  %v3638_v60 = vld [vmem:[%s3922_s23 + $0x30] sm:$0xfe]  ;;  %v898_v6 = vadd.f32 %v882_v57, %v801_v18  ;;  %s6657_s23 = scalar_lea.hbm %s6787_s2, %s3457_s8 }
 0x7cd   : > { %v1001_v56 = vmul.f32 %v3638_v60, %v3637_v26  ;;  %v7207_v60 = vld [vmem:[#allocation110_spill] sm:$0xff] }
 0x7ce   : > { %v6487_v59 = vpop.permute.xlu1 %2673  ;;  %v6489_v34 = vpop.permute.xlu0 %2671  ;;  %v988_v2 = vadd.f32 %v962_v28, %v898_v6  ;;  %v1561_v28 = vsel %vm395_vm0, %v7211_v58, %v7210_v9 }
 0x7cf   : > { %v1025_v30 = vrot.slane %v1001_v56, 1  ;;  %v1408_v56 = vsel %vm395_vm0, %v7208_v55, %v7207_v60 }
 0x7d0   : > { %3152 = vrot.lane.b32.xlu1 %v3121_v62, %s3795_s9  ;;  %3150 = vrot.lane.b32.xlu0 %v3118_v61, %s3795_s9  ;;  %v1066_v62 = vmul.f32 %v3640_v36, %v3639_v0  ;;  %v7213_v0 = vld [vmem:[#allocation129_spill] sm:$0xff] }
 0x7d2   : > { %v6503_v12 = vpop.permute.xlu1 %2677  ;;  %v6505_v21 = vpop.permute.xlu0 %2675  ;;  %v1090_v20 = vrot.slane %v1066_v62, 1  ;;  %v3641_v62 = vld [vmem:[%s6786_s1 + $0x6] ss:$0 sm:$0xff] }
 0x7d4   : > { %3156 = vrot.lane.b32.xlu1 %v3125_v47, %s3795_s9  ;;  %3154 = vrot.lane.b32.xlu0 %v3123_v5, %s3795_s9  ;;  %v1092_v47 = vsel %vm959_vm2, %v1090_v20, %v7204_v44  ;;  %v2139_v44 = vmul.f32 %v6250_v27, %v6000_v19 }
 0x7d6   : > { %v2682_v16 = vpop.permute.xlu1 %2681  ;;  %v2680_v51 = vpop.permute.xlu0 %2679  ;;  %v2163_v8 = vrot.slane %v2139_v44, 2 }
 0x7d7   : > { %v2702_v46 = vsel %vm395_vm0, %v2680_v51, %v2682_v16  ;;  %v7209_v16 = vld [vmem:[#allocation181_spill] sm:$0xff] }
 0x7d8   : > { %v6523_v33 = vadd.f32 %v2702_v46, %v6161_v24  ;;  %v7202_v24 = vld [vmem:[#allocation10_spill] sm:$0xff]  ;;  %v2569_v51 = vadd.f32 %v2553_v42, %v7209_v16  ;;  %v2165_v60 = vsel %vm2097_vm3, %v2163_v8, %v2164_v23  ;;  %v7218_v16 = vld [vmem:[#allocation172_spill] sm:$0xff]  ;;  %v2699_v23 = vsel %vm395_vm0, %v6473_v38, %v6471_v14 }
 0x7d9   : > { %v7203_v11 = vrot.slane %v7202_v24, 1  ;;  %v7214_v24 = vld [vmem:[#allocation144_spill] sm:$0xff] }
 0x7da   : > { %v2686_v61 = vpop.permute.xlu1 %2685  ;;  %v2684_v54 = vpop.permute.xlu0 %2683 }
 0x7db   : > { %v2703_v45 = vsel %vm395_vm0, %v2684_v54, %v2686_v61  ;;  %v1027_v52 = vsel %vm959_vm2, %v1025_v30, %v7203_v11  ;;  %v2073_v61 = vmul.f32 %v3641_v62, %v6225_v25  ;;  %v7215_v11 = vld [vmem:[#allocation137_spill] sm:$0xff] }
 0x7dc   : > { %v6534_v15 = vadd.f32 %v2703_v45, %v6176_v32  ;;  %v1053_v35 = vadd.f32 %v1027_v52, %v988_v2  ;;  %v1867_v52 = vsel %vm687_vm1, %v7215_v11, %v7214_v24 }
 0x7de   : > { %v2690_v10 = vpop.permute.xlu1 %2689  ;;  %v2688_v39 = vpop.permute.xlu0 %2687  ;;  %v1118_v26 = vadd.f32 %v1092_v47, %v1053_v35 }
 0x7df   : > { %v2704_v41 = vsel %vm395_vm0, %v2688_v39, %v2690_v10  ;;  %v2098_v10 = vrot.slane %v2073_v61, 2  ;;  %v7216_v39 = vld [vmem:[#allocation147_spill] sm:$0xff] }
 0x7e0   : > { %v6541_v29 = vadd.f32 %v2704_v41, %v6201_v22  ;;  %v1271_v18 = vadd.f32 %v1255_v63, %v1118_v26  ;;  %v7217_v41 = vld [vmem:[#allocation148_spill] sm:$0xff]  ;;  %v2204_v63 = vmul.f32 %v6081_v48, %v6038_v49  ;;  %v7219_v49 = vld [vmem:[#allocation173_spill] sm:$0xff] }
 0x7e1   : > { %v2020_v35 = vsel %vm687_vm1, %v7217_v41, %v7216_v39  ;;  %v2100_v17 = vsel %vm2097_vm3, %v2098_v10, %v2099_v31  ;;  %v2393_v48 = vsel %vm395_vm0, %v7219_v49, %v7218_v16  ;;  %v2701_v41 = vsel %vm395_vm0, %v6505_v21, %v6503_v12 }
 0x7e2   : > { %v2694_v5 = vpop.permute.xlu1 %2693  ;;  %v2692_v32 = vpop.permute.xlu0 %2691  ;;  %v1424_v13 = vadd.f32 %v1408_v56, %v1271_v18  ;;  %v2228_v19 = vrot.slane %v2204_v63, 2 }
 0x7e3   : > { %v2705_v57 = vsel %vm395_vm0, %v2692_v32, %v2694_v5 }
 0x7e4   : > { %v6554_v22 = vadd.f32 %v2705_v57, %v6216_v7  ;;  %v7212_v7 = vld [vmem:[#allocation136_spill] sm:$0xff]  ;;  %v1577_v54 = vadd.f32 %v1561_v28, %v1424_v13  ;;  %v2230_v40 = vsel %vm2097_vm3, %v2228_v19, %v2229_v1 }
 0x7e5   : > { %v1714_v36 = vsel %vm687_vm1, %v7213_v0, %v7212_v7 }
 0x7e6   : > { %v2698_v46 = vpop.permute.xlu1 %2697  ;;  %v2696_v6 = vpop.permute.xlu0 %2695  ;;  %v1730_v20 = vadd.f32 %v1714_v36, %v1577_v54 }
 0x7e7   : > { %v2706_v3 = vsel %vm395_vm0, %v2696_v6, %v2698_v46 }
 0x7e8   : > { %v6564_v30 = vadd.f32 %v2706_v3, %v2569_v51  ;;  %v1883_v47 = vadd.f32 %v1867_v52, %v1730_v20  ;;  %v2700_v3 = vsel %vm395_vm0, %v6489_v34, %v6487_v59 }
 0x7ea   : > { %v2823_v45 = vpop.permute.xlu1 %2822  ;;  %v2821_v2 = vpop.permute.xlu0 %2820  ;;  %v2036_v25 = vadd.f32 %v2020_v35, %v1883_v47  ;;  %v2717_v47 = vadd.f32 %v2701_v41, %v6141_v37 }
 0x7eb   : > { %v2852_v43 = vsel %vm687_vm1, %v2821_v2, %v2823_v45 }
 0x7ec   : > { %v2126_v26 = vadd.f32 %v2100_v17, %v2036_v25 }
 0x7ee   : > { %v2827_v5 = vpop.permute.xlu1 %2826  ;;  %v2825_v32 = vpop.permute.xlu0 %2824  ;;  %v2191_v56 = vadd.f32 %v2165_v60, %v2126_v26 }
 0x7ef   : > { %v2853_v14 = vsel %vm687_vm1, %v2825_v32, %v2827_v5 }
 0x7f0   : > { %v2256_v51 = vadd.f32 %v2230_v40, %v2191_v56 }
 0x7f2   : > { %v2831_v42 = vpop.permute.xlu1 %2830  ;;  %v2829_v57 = vpop.permute.xlu0 %2828  ;;  %v2409_v46 = vadd.f32 %v2393_v48, %v2256_v51 }
 0x7f3   : > { %v2854_v44 = vsel %vm687_vm1, %v2829_v57, %v2831_v42 }
 0x7f4   : > { %v2562_v9 = vadd.f32 %v6029_v50, %v2409_v46  ;;  %v2716_v50 = vadd.f32 %v2700_v3, %v6060_v53  ;;  %v2870_v17 = vadd.f32 %v2854_v44, %v2717_v47 }
 0x7f6   : > { %v2976_v27 = vpop.permute.xlu1 %2975  ;;  %v2974_v55 = vpop.permute.xlu0 %2973  ;;  %v2715_v1 = vadd.f32 %v2699_v23, %v2562_v9  ;;  %v2869_v54 = vadd.f32 %v2853_v14, %v2716_v50 }
 0x7f7   : > { %v3005_v13 = vsel %vm687_vm1, %v2974_v55, %v2976_v27 }
 0x7f8   : > { %v2868_v7 = vadd.f32 %v2852_v43, %v2715_v1 }
 0x7fa   : > { %v2980_v31 = vpop.permute.xlu1 %2979  ;;  %v2978_v18 = vpop.permute.xlu0 %2977  ;;  %v3021_v38 = vadd.f32 %v3005_v13, %v2868_v7 }
 0x7fb   : > { %v3006_v62 = vsel %vm687_vm1, %v2978_v18, %v2980_v31 }
 0x7fc   : > { %v3022_v2 = vadd.f32 %v3006_v62, %v2869_v54 }
 0x7fe   : > { %v2835_v4 = vpop.permute.xlu1 %2834  ;;  %v2833_v6 = vpop.permute.xlu0 %2832 }
 0x7ff   : > { %v2855_v37 = vsel %vm687_vm1, %v2833_v6, %v2835_v4 }
 0x800   : > { %v2871_v31 = vadd.f32 %v2855_v37, %v6523_v33 }
 0x802   : > { %v2984_v58 = vpop.permute.xlu1 %2983  ;;  %v2982_v28 = vpop.permute.xlu0 %2981 }
 0x803   : > { %v3007_v25 = vsel %vm687_vm1, %v2982_v28, %v2984_v58 }
 0x804   : > { %v3023_v8 = vadd.f32 %v3007_v25, %v2870_v17 }
 0x806   : > { %v3129_v0 = vpop.permute.xlu1 %3128  ;;  %v3127_v36 = vpop.permute.xlu0 %3126 }
 0x807   : > { %v3158_v61 = vsel %vm687_vm1, %v3127_v36, %v3129_v0 }
 0x808   : > { %v3174_v45 = vadd.f32 %v3158_v61, %v3021_v38 }
 0x80a   : > { %3182 = vst [vmem:[%s6612_s13] sm:$0xff] %v3174_v45  ;;  %v3133_v59 = vpop.permute.xlu1 %3132  ;;  %v3131_v34 = vpop.permute.xlu0 %3130  ;;  %v3204_v11 = vmul.f32 %v3174_v45, %v3174_v45 }
 0x80b   : > { %v3159_v24 = vsel %vm687_vm1, %v3131_v34, %v3133_v59 }
 0x80c   : > { %v3175_v53 = vadd.f32 %v3159_v24, %v3022_v2 }
 0x80e   : > { %3183 = vst [vmem:[%s6612_s13 + $0x8] sm:$0xff] %v3175_v53  ;;  %v3190_v52 = vadd.f32 %v3175_v53, %v3174_v45  ;;  %v3205_v20 = vmul.f32 %v3175_v53, %v3175_v53  ;;  %v2839_v10 = vpop.permute.xlu1 %2838  ;;  %v2837_v39 = vpop.permute.xlu0 %2836 }
 0x80f   : > { %v2856_v4 = vsel %vm687_vm1, %v2837_v39, %v2839_v10 }
 0x810   : > { %v3212_v35 = vadd.f32 %v3205_v20, %v3204_v11  ;;  %v2872_v33 = vadd.f32 %v2856_v4, %v6534_v15 }
 0x812   : > { %v2988_v5 = vpop.permute.xlu1 %2987  ;;  %v2986_v32 = vpop.permute.xlu0 %2985 }
 0x813   : > { %v3008_v40 = vsel %vm687_vm1, %v2986_v32, %v2988_v5 }
 0x814   : > { %v3024_v18 = vadd.f32 %v3008_v40, %v2871_v31 }
 0x816   : > { %v3137_v63 = vpop.permute.xlu1 %3136  ;;  %v3135_v26 = vpop.permute.xlu0 %3134 }
 0x817   : > { %v3160_v60 = vsel %vm687_vm1, %v3135_v26, %v3137_v63 }
 0x818   : > { %v3176_v19 = vadd.f32 %v3160_v60, %v3023_v8 }
 0x81a   : > { %3184 = vst [vmem:[%s6612_s13 + $0x10] sm:$0xff] %v3176_v19  ;;  %v3191_v27 = vadd.f32 %v3190_v52, %v3176_v19  ;;  %v3206_v12 = vmul.f32 %v3176_v19, %v3176_v19  ;;  %v2843_v21 = vpop.permute.xlu1 %2842  ;;  %v2841_v55 = vpop.permute.xlu0 %2840 }
 0x81b   : > { %v2857_v54 = vsel %vm687_vm1, %v2841_v55, %v2843_v21 }
 0x81c   : > { %v3213_v42 = vadd.f32 %v3212_v35, %v3206_v12  ;;  %v2873_v59 = vadd.f32 %v2857_v54, %v6541_v29 }
 0x81e   : > { %v2992_v57 = vpop.permute.xlu1 %2991  ;;  %v2990_v56 = vpop.permute.xlu0 %2989 }
 0x81f   : > { %v3009_v28 = vsel %vm687_vm1, %v2990_v56, %v2992_v57 }
 0x820   : > { %v3025_v3 = vadd.f32 %v3009_v28, %v2872_v33 }
 0x822   : > { %v3141_v16 = vpop.permute.xlu1 %3140  ;;  %v3139_v49 = vpop.permute.xlu0 %3138 }
 0x823   : > { %v3161_v48 = vsel %vm687_vm1, %v3139_v49, %v3141_v16 }
 0x824   : > { %v3177_v51 = vadd.f32 %v3161_v48, %v3024_v18 }
 0x826   : > { %3185 = vst [vmem:[%s6612_s13 + $0x18] sm:$0xff] %v3177_v51  ;;  %v3192_v46 = vadd.f32 %v3191_v27, %v3177_v51  ;;  %v3207_v23 = vmul.f32 %v3177_v51, %v3177_v51  ;;  %v2847_v9 = vpop.permute.xlu1 %2846  ;;  %v2845_v43 = vpop.permute.xlu0 %2844 }
 0x827   : > { %v2858_v20 = vsel %vm687_vm1, %v2845_v43, %v2847_v9 }
 0x828   : > { %v3214_v1 = vadd.f32 %v3213_v42, %v3207_v23  ;;  %v2874_v29 = vadd.f32 %v2858_v20, %v6554_v22 }
 0x82a   : > { %v2996_v6 = vpop.permute.xlu1 %2995  ;;  %v2994_v58 = vpop.permute.xlu0 %2993 }
 0x82b   : > { %v3010_v15 = vsel %vm687_vm1, %v2994_v58, %v2996_v6 }
 0x82c   : > { %v3026_v34 = vadd.f32 %v3010_v15, %v2873_v59 }
 0x82e   : > { %v3145_v13 = vpop.permute.xlu1 %3144  ;;  %v3143_v7 = vpop.permute.xlu0 %3142 }
 0x82f   : > { %v3162_v14 = vsel %vm687_vm1, %v3143_v7, %v3145_v13 }
 0x830   : > { %v3178_v50 = vadd.f32 %v3162_v14, %v3025_v3 }
 0x832   : > { %3186 = vst [vmem:[%s6612_s13 + $0x20] sm:$0xff] %v3178_v50  ;;  %v3193_v38 = vadd.f32 %v3192_v46, %v3178_v50  ;;  %v3208_v0 = vmul.f32 %v3178_v50, %v3178_v50  ;;  %v2851_v36 = vpop.permute.xlu1 %2850  ;;  %v2849_v62 = vpop.permute.xlu0 %2848 }
 0x833   : > { %v2859_v5 = vsel %vm687_vm1, %v2849_v62, %v2851_v36 }
 0x834   : > { %v3215_v61 = vadd.f32 %v3214_v1, %v3208_v0  ;;  %v2875_v26 = vadd.f32 %v2859_v5, %v6564_v30 }
 0x836   : > { %v3000_v45 = vpop.permute.xlu1 %2999  ;;  %v2998_v2 = vpop.permute.xlu0 %2997 }
 0x837   : > { %v3011_v44 = vsel %vm687_vm1, %v2998_v2, %v3000_v45 }
 0x838   : > { %v3027_v32 = vadd.f32 %v3011_v44, %v2874_v29 }
 0x83a   : > { %v3149_v24 = vpop.permute.xlu1 %3148  ;;  %v3147_v53 = vpop.permute.xlu0 %3146 }
 0x83b   : > { %v3163_v11 = vsel %vm687_vm1, %v3147_v53, %v3149_v24 }
 0x83c   : > { %v3179_v52 = vadd.f32 %v3163_v11, %v3026_v34 }
 0x83e   : > { %3187 = vst [vmem:[%s6612_s13 + $0x28] sm:$0xff] %v3179_v52  ;;  %v3194_v10 = vadd.f32 %v3193_v38, %v3179_v52  ;;  %v3209_v39 = vmul.f32 %v3179_v52, %v3179_v52  ;;  %v3004_v41 = vpop.permute.xlu1 %3003  ;;  %v3002_v35 = vpop.permute.xlu0 %3001 }
 0x83f   : > { %v3012_v8 = vsel %vm687_vm1, %v3002_v35, %v3004_v41 }
 0x840   : > { %v3216_v47 = vadd.f32 %v3215_v61, %v3209_v39  ;;  %v3028_v19 = vadd.f32 %v3012_v8, %v2875_v26 }
 0x842   : > { %v3153_v25 = vpop.permute.xlu1 %3152  ;;  %v3151_v17 = vpop.permute.xlu0 %3150 }
 0x843   : > { %v3164_v63 = vsel %vm687_vm1, %v3151_v17, %v3153_v25 }
 0x844   : > { %v3180_v60 = vadd.f32 %v3164_v63, %v3027_v32 }
 0x846   : > { %3188 = vst [vmem:[%s6612_s13 + $0x30] sm:$0xff] %v3180_v60  ;;  %v3195_v22 = vadd.f32 %v3194_v10, %v3180_v60  ;;  %v3210_v27 = vmul.f32 %v3180_v60, %v3180_v60  ;;  %v3157_v12 = vpop.permute.xlu1 %3156  ;;  %v3155_v21 = vpop.permute.xlu0 %3154 }
 0x847   : > { %v3165_v55 = vsel %vm687_vm1, %v3155_v21, %v3157_v12 }
 0x848   : > { %v3217_v42 = vadd.f32 %v3216_v47, %v3210_v27  ;;  %v3181_v30 = vadd.f32 %v3165_v55, %v3028_v19 }
 0x84a   : > { %3189 = vst [vmem:[%s6612_s13 + $0x38] sm:$0xff] %v3181_v30  ;;  %v3196_v37 = vadd.f32 %v3195_v22, %v3181_v30  ;;  %v3211_v57 = vmul.f32 %v3181_v30, %v3181_v30 }
 0x84b   : > { %3655 = shalt.err (!%p3652_p6)
}
 0x84c   : > { %s3656_s13 = scalar_lea.hbm %s6657_s23, 1024  ;;  %s3660_s24 = scalar_lea.hbm %s6787_s2, 8192 }
 0x84d   : > { %p3657_p7 = scmp.ne.s32.totalorder %s6657_s23, %s3656_s13  ;;  %p3661_p11 = scmp.lt.s32.totalorder %s6657_s23, %s6787_s2 }
 0x84e   : > { %p3662_p12 = scmp.lt.s32.totalorder %s3660_s24, %s3656_s13 }
 0x84f   : > { %p3658_p9 = pnand %p3657_p7, %p3878_p3 }
 0x850   : > { %p3663_p13 = por %p3662_p12, %p3661_p11 }
 0x851   : > { %p3659_p10 = pneg %p3658_p9 }
 0x853   : > { %p3664_p0 = pnand %p3663_p13, %p3659_p10 }
 0x855   : > { %3667 = shalt.err (!%p3664_p0)
}
 0x856   : > { %s3797_s11 = smov 128   ;;  %s7220_s27 = scalar_lea.sflag [#allocation3], %s6601_s10  ;;  %v3197_v56 = vrot.slane %v3196_v37, 4  ;;  %v3218_v40 = vadd.f32 %v3217_v42, %v3211_v57 }
 0x857   : > { %3467 = dma.vmem_to_hbm [thread:$0]  (%p3878_p3), %s6652_s6, 1024, %s6657_s23, %s7220_s27, %s3797_s11, %s3797_s11, %s3792_s12  }
 0x858   : > { %s3458_s5 = sshll.u32 %s3778_s19, 2  ;;  %v3198_v31 = vadd.f32 %v3197_v56, %v3196_v37  ;;  %v3219_v18 = vrot.slane %v3218_v40, 4  ;;  %s7221_s13 = sadd.s32 4294967295, %s3790_s22  }
 0x859   : > { %s3265_s30 = sadd.s32 %s3774_s18, %s3458_s5  ;;  %s6688_s8 = sand.u32 1, %s7221_s13  }
 0x85a   : > { %v3220_v16 = vadd.f32 %v3219_v18, %v3218_v40  ;;  %v3199_v49 = vrot.slane %v3198_v31, 2  ;;  %s3459_s9 = sshll.u32 %s3265_s30, 4  ;;  %s218_s24 = scalar_lea.vmem [#allocation4], %s6601_s10 }
 0x85b   : > { %s3269_s14 = sshll.u32 %s218_s24, 4  ;;  %s6835_s12 = scalar_lea.vmem [#allocation6], %s6601_s10  ;;  %s6699_s14 = int_to_ptr.vmem [resolvable:$true] %s3269_s14 }
 0x85c   : > { %v3200_v48 = vadd.f32 %v3199_v49, %v3198_v31  ;;  %v3221_v51 = vrot.slane %v3220_v16, 2  ;;  %s3284_s19 = sshll.u32 %s6835_s12, 4  ;;  %s6697_s18 = scalar_lea.hbm %s6788_s3, %s3459_s9  ;;  %s6706_s19 = int_to_ptr.vmem [resolvable:$true] %s3284_s19 }
 0x85d   : > { %s6704_s5 = scalar_lea.hbm %s6789_s4, %s3459_s9  ;;  %s3668_s13 = scalar_lea.vmem %s6699_s14, 16 }
 0x85e   : > { %v3201_v46 = vrot.slane %v3200_v48, 1  ;;  %v3222_v23 = vadd.f32 %v3221_v51, %v3220_v16  ;;  %p3669_p1 = scmp.ne.s32.totalorder %s6699_s14, %s3668_s13  ;;  %s3798_s6 = smov [#allocation4]  }
 0x85f   : > { %s3672_s23 = sshll.u32 %s3798_s6, 4  ;;  %s3673_s23 = int_to_ptr.vmem [resolvable:$false] %s3672_s23 }
 0x860   : > { %v3202_v9 = vadd.f32 %v3201_v46, %v3200_v48  ;;  %v3223_v43 = vrot.slane %v3222_v23, 1  ;;  %p3670_p2 = pnand %p3669_p1, %p3878_p3  ;;  %s3674_s12 = scalar_lea.vmem %s3673_s23, 32 }
 0x861   : > { %p3675_p5 = scmp.lt.s32.totalorder %s6699_s14, %s3673_s23  ;;  %p3676_p6 = scmp.lt.s32.totalorder %s3674_s12, %s3668_s13 }
 0x862   : > { %3203 = vst [vmem:[%s218_s24] sm:$0x1] %v3202_v9  ;;  %v3224_v1 = vadd.f32 %v3223_v43, %v3222_v23  ;;  %p3671_p4 = pneg %p3670_p2 }
 0x863   : > { %p3677_p7 = por %p3676_p6, %p3675_p5 }
 0x865   : > { %p3678_p9 = pnand %p3677_p7, %p3671_p4 }
 0x867   : > { %3681 = shalt.err (!%p3678_p9)
}
 0x868   : > { %s3682_s9 = scalar_lea.hbm %s6697_s18, 16  ;;  %s3686_s27 = scalar_lea.hbm %s6788_s3, 128 }
 0x869   : > { %p3683_p10 = scmp.ne.s32.totalorder %s6697_s18, %s3682_s9  ;;  %p3687_p13 = scmp.lt.s32.totalorder %s6697_s18, %s6788_s3 }
 0x86a   : > { %p3688_p0 = scmp.lt.s32.totalorder %s3686_s27, %s3682_s9 }
 0x86b   : > { %p3684_p11 = pnand %p3683_p10, %p3878_p3 }
 0x86c   : > { %p3689_p1 = por %p3688_p0, %p3687_p13 }
 0x86d   : > { %p3685_p12 = pneg %p3684_p11 }
 0x86f   : > { %p3690_p2 = pnand %p3689_p1, %p3685_p12 }
 0x871   : > { %3693 = shalt.err (!%p3690_p2)
}
 0x872   : > { %s7222_s12 = scalar_lea.sflag [#allocation5], %s6688_s8  ;;  %s7223_s13 = scalar_lea.vmem [#allocation6], %s6601_s10 }
 0x873   : > { %3468 = dma.vmem_to_hbm [thread:$0]  (%p3878_p3), %s6699_s14, 16, %s6697_s18, %s7222_s12   ;;  %3225 = vst [vmem:[%s7223_s13] sm:$0x1] %v3224_v1 }
 0x874   : > { %s3694_s30 = scalar_lea.vmem %s6706_s19, 16  ;;  %s3799_s23 = smov [#allocation6]  }
 0x875   : > { %p3695_p4 = scmp.ne.s32.totalorder %s6706_s19, %s3694_s30  ;;  %s3698_s9 = sshll.u32 %s3799_s23, 4  ;;  %s3699_s9 = int_to_ptr.vmem [resolvable:$false] %s3698_s9 }
 0x876   : > { %s3700_s24 = scalar_lea.vmem %s3699_s9, 32  ;;  %p3701_p7 = scmp.lt.s32.totalorder %s6706_s19, %s3699_s9 }
 0x877   : > { %p3696_p5 = pnand %p3695_p4, %p3878_p3  ;;  %p3702_p9 = scmp.lt.s32.totalorder %s3700_s24, %s3694_s30 }
 0x879   : > { %p3697_p6 = pneg %p3696_p5  ;;  %p3703_p10 = por %p3702_p9, %p3701_p7 }
 0x87b   : > { %p3704_p11 = pnand %p3703_p10, %p3697_p6 }
 0x87d   : > { %3707 = shalt.err (!%p3704_p11)
}
 0x87e   : > { %s3708_s10 = scalar_lea.hbm %s6704_s5, 16  ;;  %s3712_s11 = scalar_lea.hbm %s6789_s4, 128 }
 0x87f   : > { %p3709_p12 = scmp.ne.s32.totalorder %s6704_s5, %s3708_s10  ;;  %p3713_p1 = scmp.lt.s32.totalorder %s6704_s5, %s6789_s4 }
 0x880   : > { %p3714_p2 = scmp.lt.s32.totalorder %s3712_s11, %s3708_s10 }
 0x881   : > { %p3710_p13 = pnand %p3709_p12, %p3878_p3 }
 0x882   : > { %p3715_p4 = por %p3714_p2, %p3713_p1 }
 0x883   : > { %p3711_p0 = pneg %p3710_p13 }
 0x885   : > { %p3716_p5 = pnand %p3715_p4, %p3711_p0 }
 0x887   : > { %3719 = shalt.err (!%p3716_p5)
}
 0x888   : > { %3469 = dma.vmem_to_hbm [thread:$0]  (%p3878_p3), %s6706_s19, 16, %s6704_s5, %s7222_s12  }
 0x889 PF: > { %p3483_p6 = scmp.ge.s32.totalorder %s3790_s22, 2  ;;  %s3296_s13 = sand.u32 1, %s3762_s15  }
 0x88a   : > { %s3297_s30 = scalar_lea.sflag [#allocation3], %s3296_s13 }
 0x88b   : > { %p3474_p7 = pnand %p3483_p6, %p3889_p8 }
 0x88d   : > { %p3475_p9 = pneg %p3474_p7 }
 0x88f   : > { %3753 = dma.done.wait (%p3475_p9), %s3297_s30, 1024  }
 0x890   : > { %3755 = vsyncadd (%p3475_p9), %s3297_s30, 4294966272  ;;  %s7224_s23 = sadd.s32 4294967294, %s3790_s22  }
 0x891   : > { %s3305_s28 = sand.u32 1, %s7224_s23  }
 0x892   : > { %s3306_s9 = scalar_lea.sflag [#allocation5], %s3305_s28 }
 0x893   : > { %3757 = dma.done.wait (%p3475_p9), %s3306_s9, 32  }
 0x894   : > { %3759 = vsyncadd (%p3475_p9), %s3306_s9, 4294967264  ;;  %s21_s22 = sadd.s32 1, %s3790_s22   ;;  %s7225_s15 = smov %s3766_s16 }
 0x895   : > { %p18_p3 = scmp.ge.s32.totalorder %s21_s22, 10   ;;  %s7226_s16 = smov %s3770_s17 }
 0x896   : > { %s7227_s17 = smov %s3898_s7  ;;  %s7228_s18 = smov %s3782_s20 }
 0x897   : > { %s7229_s19 = smov %s3786_s21  ;;  %s7230_s20 = smov %s7233_s25 }
 0x898   : > { %s7231_s21 = smov %s7237_s26  ;;  %20 = sbr.rel (!%p18_p3) target bundleno = 7 (0x7), region = 96 }
 0x89d   :  { %3318 = vsyncpa [#allocation3], 1 }
 0x89e   :  { %3320 = vsyncpa [#allocation3 + $0x1], 1 }
 0x89f   :  { %3321 = vsyncpa [#allocation5], 1 }
 0x8a0   :  { %3323 = vsyncpa [#allocation5 + $0x1], 1 }

</bundles_post_ra>
